<compile_context>
chip_gen: v7x
topology: tpu7x:2x2x1
jax: 0.10.0
libtpu: 0.0.40
codegen_flags: <defaults>
</compile_context>

<pallas_src>
import numpy as np
import jax
import jax.numpy as jnp
from jax.experimental import pallas as pl
from jax.experimental.pallas import tpu as pltpu


def _round_up(x, m):
    return (x + m - 1) // m * m


# ----------------------------- Pallas kernel --------------------------------
def _fused_net_kernel(x_ref, w1_ref, b1_ref, w2_ref, b2_ref, w3_ref, b3_ref,
                      wf1_ref, bf1_ref, wf2_ref, bf2_ref, o_ref):
    """conv1/conv2/conv3/fc1/fc2, all pre-lowered to B-row matmuls, fused.
    bf16 MXU operands, f32 accumulation, f32 bias+ReLU epilogue. Intermediates
    never leave VMEM/vregs; only the final tile is stored."""

    def layer(a_bf16, w_ref, b_ref, relu=True):
        acc = jnp.dot(a_bf16, w_ref[...], preferred_element_type=jnp.float32)
        acc = acc + b_ref[...]                      # (1, N) broadcast over rows
        if relu:
            acc = jnp.maximum(acc, 0.0)
        return acc

    a = x_ref[...].astype(jnp.bfloat16)                        # (TM, 161)
    a = layer(a, w1_ref, b1_ref).astype(jnp.bfloat16)          # conv1 -> (TM, 576)
    a = layer(a, w2_ref, b2_ref).astype(jnp.bfloat16)          # conv2 -> (TM, 800)
    a = layer(a, w3_ref, b3_ref).astype(jnp.bfloat16)          # conv3 -> (TM, 1600)
    a = layer(a, wf1_ref, bf1_ref).astype(jnp.bfloat16)        # fc1   -> (TM, 512)
    o_ref[...] = layer(a, wf2_ref, bf2_ref, relu=False).astype(o_ref.dtype)


# ----------------------------- raw parameters --------------------------------
def init_params(key, num_binary):
    ks = jax.random.split(key, 10)

    def kaiming_normal_fan_out(k, shape):          # Conv2d weights (O,I,kh,kw)
        fan_out = shape[0] * shape[2] * shape[3]
        return ((2.0 / fan_out) ** 0.5) * jax.random.normal(k, shape, jnp.float32)

    def conv_bias(k, wshape):                      # PyTorch default bias init
        fan_in = wshape[1] * wshape[2] * wshape[3]
        bound = 1.0 / (fan_in ** 0.5)
        return jax.random.uniform(k, (wshape[0],), jnp.float32, -bound, bound)

    def xavier_uniform(k, shape):                  # Linear weights (out,in)
        bound = (6.0 / (shape[0] + shape[1])) ** 0.5
        return jax.random.uniform(k, shape, jnp.float32, -bound, bound)

    def lin_bias(k, wshape):
        bound = 1.0 / (wshape[1] ** 0.5)
        return jax.random.uniform(k, (wshape[0],), jnp.float32, -bound, bound)

    return dict(
        W1=kaiming_normal_fan_out(ks[0], (64, 161, 3, 3)), b1=conv_bias(ks[1], (64, 161, 3, 3)),
        W2=kaiming_normal_fan_out(ks[2], (32, 64, 3, 3)),  b2=conv_bias(ks[3], (32, 64, 3, 3)),
        W3=kaiming_normal_fan_out(ks[4], (64, 32, 1, 1)),  b3=conv_bias(ks[5], (64, 32, 1, 1)),
        Wf1=xavier_uniform(ks[6], (500, 64 * 7 * 7)),      bf1=lin_bias(ks[7], (500, 64 * 7 * 7)),
        Wf2=xavier_uniform(ks[8], (num_binary, 500)),      bf2=lin_bias(ks[9], (num_binary, 500)),
    )


# ------------------- one-time weight preprocessing (hoisted) -----------------
def prepare_params(raw, num_binary):
    """Lower every layer to a B-row matmul, pre-layout + pre-cast to bf16.
    Called once at init time; the per-step forward does NO weight reshuffling."""
    W1 = np.asarray(raw["W1"], np.float32)    # (64, 161, 3, 3)
    b1 = np.asarray(raw["b1"], np.float32)
    W2 = np.asarray(raw["W2"], np.float32)    # (32, 64, 3, 3)
    b2 = np.asarray(raw["b2"], np.float32)
    W3 = np.asarray(raw["W3"], np.float32)    # (64, 32, 1, 1)
    b3 = np.asarray(raw["b3"], np.float32)
    Wf1 = np.asarray(raw["Wf1"], np.float32)  # (500, 3136)
    bf1 = np.asarray(raw["bf1"], np.float32)
    Wf2 = np.asarray(raw["Wf2"], np.float32)  # (num_binary, 500)
    bf2 = np.asarray(raw["bf2"], np.float32)

    # conv1: 3x3 pad=2 on a 1x1 input -> only padded pixel (2,2) hits the kernel;
    # a single (161 -> 64*3*3) matmul with spatially flipped weights.
    W1m = W1[:, :, ::-1, ::-1].transpose(1, 0, 2, 3).reshape(161, 64 * 9)
    b1m = np.repeat(b1, 9)

    # conv2: 3x3 pad=2 on the 3x3 map -> one (576 -> 32*25) matmul against a
    # zero-expanded weight (rows = (c,i,j), cols = (o2,p,q)).
    W2e = np.zeros((64, 3, 3, 32, 5, 5), np.float32)
    for p in range(5):
        for q in range(5):
            for i in range(3):
                for j in range(3):
                    di, dj = i + 2 - p, j + 2 - q
                    if 0 <= di < 3 and 0 <= dj < 3:
                        W2e[:, i, j, :, p, q] = W2[:, :, di, dj].T     # (c, o2)
    W2m = W2e.reshape(64 * 9, 32 * 25)
    b2m = np.repeat(b2, 25)

    # conv3: 1x1 pad=1 -> interior is a per-pixel 32->64 matmul, expressed as a
    # block-diagonal (800 -> 64*25) matmul; border pixels are the constant
    # relu(b3) and get folded into the fc1 bias below.
    W3m = W3.reshape(64, 32)
    W3e = np.einsum("oc,st->csot", W3m, np.eye(25, dtype=np.float32))
    W3me = W3e.reshape(32 * 25, 64 * 25)
    b3m = np.repeat(b3, 25)

    # fc1: keep only the 5x5-interior columns of Wf1; the 24 border pixels per
    # channel contribute relu(b3[o]) * Wf1[:, border] -> folded into its bias.
    Wf1r = Wf1.reshape(500, 64, 7, 7)
    Wf1i = Wf1r[:, :, 1:6, 1:6].transpose(1, 2, 3, 0).reshape(64 * 25, 500)
    border = np.ones((7, 7), np.float32)
    border[1:6, 1:6] = 0.0
    bf1_eff = bf1 + np.einsum("nouv,o,uv->n", Wf1r, np.maximum(b3, 0.0), border)

    # Lane-dense padding: fc1 hidden 500 -> 512, fc2 output -> multiple of 128.
    H = 512
    n_out_pad = _round_up(num_binary, 128)
    Wf1p = np.zeros((64 * 25, H), np.float32); Wf1p[:, :500] = Wf1i
    bf1p = np.zeros((H,), np.float32);         bf1p[:500] = bf1_eff
    Wf2p = np.zeros((H, n_out_pad), np.float32); Wf2p[:500, :num_binary] = Wf2.T
    bf2p = np.zeros((n_out_pad,), np.float32);   bf2p[:num_binary] = bf2

    as_bf16 = lambda a: jnp.asarray(a, jnp.bfloat16)
    as_row_f32 = lambda a: jnp.asarray(a, jnp.float32).reshape(1, -1)
    return dict(
        W1m=as_bf16(W1m),  b1m=as_row_f32(b1m),
        W2m=as_bf16(W2m),  b2m=as_row_f32(b2m),
        W3m=as_bf16(W3me), b3m=as_row_f32(b3m),
        Wf1m=as_bf16(Wf1p), bf1m=as_row_f32(bf1p),
        Wf2m=as_bf16(Wf2p), bf2m=as_row_f32(bf2p),
    )


# ----------------------------- forward pass ----------------------------------
def binary_coding_forward(fused, x, *, num_binary):
    B = x.shape[0]
    assert x.shape[1:] == (161, 1, 1)
    xf = x.reshape(B, 161).astype(jnp.float32)

    # Tile the batch (M) dimension; TM<=256 keeps the per-step VMEM footprint
    # (resident bf16 weights ~5.4 MB x2 + activation tiles) well under the
    # 32 MiB budget that is safe on v5e/v6e/v7x.
    TM = 256
    if B <= TM:
        m_pad = _round_up(B, 8)
        tm = m_pad
    else:
        tm = TM
        m_pad = _round_up(B, TM)
    if m_pad != B:
        xf = jnp.pad(xf, ((0, m_pad - B), (0, 0)))

    ws = (fused["W1m"], fused["W2m"], fused["W3m"], fused["Wf1m"], fused["Wf2m"])
    bs = (fused["b1m"], fused["b2m"], fused["b3m"], fused["bf1m"], fused["bf2m"])
    n_out_pad = ws[-1].shape[1]

    flops = 2 * m_pad * sum(w.shape[0] * w.shape[1] for w in ws)
    bytes_accessed = (xf.size * xf.dtype.itemsize
                      + sum(t.size * t.dtype.itemsize for t in ws + bs)
                      + m_pad * n_out_pad * 4)

    in_specs = [pl.BlockSpec((tm, 161), lambda i: (i, 0))]
    operands = [xf]
    for w, b in zip(ws, bs):
        in_specs.append(pl.BlockSpec(w.shape, lambda i: (0, 0)))   # resident weight
        in_specs.append(pl.BlockSpec(b.shape, lambda i: (0, 0)))   # resident bias
        operands += [w, b]

    out = pl.pallas_call(
        _fused_net_kernel,
        out_shape=jax.ShapeDtypeStruct((m_pad, n_out_pad), jnp.float32),
        grid=(m_pad // tm,),
        in_specs=in_specs,
        out_specs=pl.BlockSpec((tm, n_out_pad), lambda i: (i, 0)),
        compiler_params=pltpu.CompilerParams(
            dimension_semantics=("parallel",),
            vmem_limit_bytes=32 * 1024 * 1024),
        cost_estimate=pl.CostEstimate(flops=flops, transcendentals=0,
                                      bytes_accessed=bytes_accessed),
    )(*operands)

    return out[:B, :num_binary]


# ----------------------------- reference (checks) ----------------------------
def binary_coding_reference(params, x):
    dn = ("NCHW", "OIHW", "NCHW")

    def conv_relu(x, w, b, pad):
        y = jax.lax.conv_general_dilated(
            x, w, window_strides=(1, 1), padding=[(pad, pad), (pad, pad)],
            dimension_numbers=dn)
        return jnp.maximum(y + b[None, :, None, None], 0.0)

    y = conv_relu(x, params["W1"], params["b1"], 2)
    y = conv_relu(y, params["W2"], params["b2"], 2)
    y = conv_relu(y, params["W3"], params["b3"], 1)
    flat = y.reshape(x.shape[0], -1)
    h = jnp.maximum(flat @ params["Wf1"].T + params["bf1"], 0.0)
    return h @ params["Wf2"].T + params["bf2"]


if __name__ == "__main__":
    key = jax.random.PRNGKey(0)
    pkey, xkey = jax.random.split(key)

    num_binary = 16
    B = 2
    raw = init_params(pkey, num_binary)
    fused = prepare_params(raw, num_binary)          # one-time layout + bf16 cast
    x = jax.random.normal(xkey, (B, 161, 1, 1), dtype=jnp.float32)

    fwd = jax.jit(binary_coding_forward, static_argnames=("num_binary",))
    out = jax.block_until_ready(fwd(fused, x, num_binary=num_binary))
    assert out.shape == (B, num_binary)

    ref = jax.block_until_ready(binary_coding_reference(raw, x))
    # bf16 MXU operands / f32 accumulation: ~1-2% expected deviation vs f32 conv ref.
    assert jnp.allclose(out, ref, rtol=2e-2, atol=2e-2), "mismatch vs XLA conv reference"

    print("KERNEL_OK")
</pallas_src>

<mosaic_0001>
module attributes {stable_mosaic.version = 11 : i64} {
  func.func @_fused_net_kernel(%arg0: i32, %arg1: memref<8x161xf32, #tpu.memory_space<vmem>>, %arg2: memref<161x576xbf16, #tpu.memory_space<vmem>>, %arg3: memref<1x576xf32, #tpu.memory_space<vmem>>, %arg4: memref<576x800xbf16, #tpu.memory_space<vmem>>, %arg5: memref<1x800xf32, #tpu.memory_space<vmem>>, %arg6: memref<800x1600xbf16, #tpu.memory_space<vmem>>, %arg7: memref<1x1600xf32, #tpu.memory_space<vmem>>, %arg8: memref<1600x512xbf16, #tpu.memory_space<vmem>>, %arg9: memref<1x512xf32, #tpu.memory_space<vmem>>, %arg10: memref<512x128xbf16, #tpu.memory_space<vmem>>, %arg11: memref<1x128xf32, #tpu.memory_space<vmem>>, %arg12: memref<8x128xf32, #tpu.memory_space<vmem>>) attributes {dimension_semantics = [#tpu.dimension_semantics<parallel>], iteration_bounds = array<i64: 1>, scalar_prefetch = 0 : i64, scratch_operands = 0 : i64, tpu.core_type = #tpu.core_type<tc>, window_params = [{transform_indices = @transform_0, window_bounds = array<i64: 8, 161>}, {pipeline_mode = #tpu.pipeline_mode<synchronous>, transform_indices = @transform_1, window_bounds = array<i64: 161, 576>}, {pipeline_mode = #tpu.pipeline_mode<synchronous>, transform_indices = @transform_2, window_bounds = array<i64: 1, 576>}, {pipeline_mode = #tpu.pipeline_mode<synchronous>, transform_indices = @transform_3, window_bounds = array<i64: 576, 800>}, {pipeline_mode = #tpu.pipeline_mode<synchronous>, transform_indices = @transform_4, window_bounds = array<i64: 1, 800>}, {pipeline_mode = #tpu.pipeline_mode<synchronous>, transform_indices = @transform_5, window_bounds = array<i64: 800, 1600>}, {pipeline_mode = #tpu.pipeline_mode<synchronous>, transform_indices = @transform_6, window_bounds = array<i64: 1, 1600>}, {pipeline_mode = #tpu.pipeline_mode<synchronous>, transform_indices = @transform_7, window_bounds = array<i64: 1600, 512>}, {pipeline_mode = #tpu.pipeline_mode<synchronous>, transform_indices = @transform_8, window_bounds = array<i64: 1, 512>}, {pipeline_mode = #tpu.pipeline_mode<synchronous>, transform_indices = @transform_9, window_bounds = array<i64: 512, 128>}, {pipeline_mode = #tpu.pipeline_mode<synchronous>, transform_indices = @transform_10, window_bounds = array<i64: 1, 128>}, {transform_indices = @transform_11, window_bounds = array<i64: 8, 128>}]} {
    %c0 = arith.constant 0 : index
    %c0_0 = arith.constant 0 : index
    %0 = vector.load %arg1[%c0, %c0_0] : memref<8x161xf32, #tpu.memory_space<vmem>>, vector<8x161xf32>
    %1 = arith.truncf %0 : vector<8x161xf32> to vector<8x161xbf16>
    %c0_1 = arith.constant 0 : index
    %c0_2 = arith.constant 0 : index
    %2 = vector.load %arg2[%c0_1, %c0_2] : memref<161x576xbf16, #tpu.memory_space<vmem>>, vector<161x576xbf16>
    %cst = arith.constant dense<0.000000e+00> : vector<8x576xf32>
    %3 = tpu.matmul %1, %2, %cst {dimension_numbers = #tpu.dot_dimension_numbers<[1], [0], [0], [1], [0, 0, 1, 1], [], []>} : vector<8x161xbf16>, vector<161x576xbf16>, vector<8x576xf32> -> vector<8x576xf32>
    %c0_3 = arith.constant 0 : index
    %c0_4 = arith.constant 0 : index
    %4 = vector.load %arg3[%c0_3, %c0_4] : memref<1x576xf32, #tpu.memory_space<vmem>>, vector<1x576xf32>
    %5 = vector.broadcast %4 : vector<1x576xf32> to vector<8x576xf32>
    %6 = arith.addf %3, %5 : vector<8x576xf32>
    %cst_5 = arith.constant 0.000000e+00 : f32
    %7 = vector.broadcast %cst_5 : f32 to vector<8x576xf32>
    %8 = arith.maximumf %6, %7 : vector<8x576xf32>
    %9 = arith.truncf %8 : vector<8x576xf32> to vector<8x576xbf16>
    %c0_6 = arith.constant 0 : index
    %c0_7 = arith.constant 0 : index
    %10 = vector.load %arg4[%c0_6, %c0_7] : memref<576x800xbf16, #tpu.memory_space<vmem>>, vector<576x800xbf16>
    %cst_8 = arith.constant dense<0.000000e+00> : vector<8x800xf32>
    %11 = tpu.matmul %9, %10, %cst_8 {dimension_numbers = #tpu.dot_dimension_numbers<[1], [0], [0], [1], [0, 0, 1, 1], [], []>} : vector<8x576xbf16>, vector<576x800xbf16>, vector<8x800xf32> -> vector<8x800xf32>
    %c0_9 = arith.constant 0 : index
    %c0_10 = arith.constant 0 : index
    %12 = vector.load %arg5[%c0_9, %c0_10] : memref<1x800xf32, #tpu.memory_space<vmem>>, vector<1x800xf32>
    %13 = vector.broadcast %12 : vector<1x800xf32> to vector<8x800xf32>
    %14 = arith.addf %11, %13 : vector<8x800xf32>
    %cst_11 = arith.constant 0.000000e+00 : f32
    %15 = vector.broadcast %cst_11 : f32 to vector<8x800xf32>
    %16 = arith.maximumf %14, %15 : vector<8x800xf32>
    %17 = arith.truncf %16 : vector<8x800xf32> to vector<8x800xbf16>
    %c0_12 = arith.constant 0 : index
    %c0_13 = arith.constant 0 : index
    %18 = vector.load %arg6[%c0_12, %c0_13] : memref<800x1600xbf16, #tpu.memory_space<vmem>>, vector<800x1600xbf16>
    %cst_14 = arith.constant dense<0.000000e+00> : vector<8x1600xf32>
    %19 = tpu.matmul %17, %18, %cst_14 {dimension_numbers = #tpu.dot_dimension_numbers<[1], [0], [0], [1], [0, 0, 1, 1], [], []>} : vector<8x800xbf16>, vector<800x1600xbf16>, vector<8x1600xf32> -> vector<8x1600xf32>
    %c0_15 = arith.constant 0 : index
    %c0_16 = arith.constant 0 : index
    %20 = vector.load %arg7[%c0_15, %c0_16] : memref<1x1600xf32, #tpu.memory_space<vmem>>, vector<1x1600xf32>
    %21 = vector.broadcast %20 : vector<1x1600xf32> to vector<8x1600xf32>
    %22 = arith.addf %19, %21 : vector<8x1600xf32>
    %cst_17 = arith.constant 0.000000e+00 : f32
    %23 = vector.broadcast %cst_17 : f32 to vector<8x1600xf32>
    %24 = arith.maximumf %22, %23 : vector<8x1600xf32>
    %25 = arith.truncf %24 : vector<8x1600xf32> to vector<8x1600xbf16>
    %c0_18 = arith.constant 0 : index
    %c0_19 = arith.constant 0 : index
    %26 = vector.load %arg8[%c0_18, %c0_19] : memref<1600x512xbf16, #tpu.memory_space<vmem>>, vector<1600x512xbf16>
    %cst_20 = arith.constant dense<0.000000e+00> : vector<8x512xf32>
    %27 = tpu.matmul %25, %26, %cst_20 {dimension_numbers = #tpu.dot_dimension_numbers<[1], [0], [0], [1], [0, 0, 1, 1], [], []>} : vector<8x1600xbf16>, vector<1600x512xbf16>, vector<8x512xf32> -> vector<8x512xf32>
    %c0_21 = arith.constant 0 : index
    %c0_22 = arith.constant 0 : index
    %28 = vector.load %arg9[%c0_21, %c0_22] : memref<1x512xf32, #tpu.memory_space<vmem>>, vector<1x512xf32>
    %29 = vector.broadcast %28 : vector<1x512xf32> to vector<8x512xf32>
    %30 = arith.addf %27, %29 : vector<8x512xf32>
    %cst_23 = arith.constant 0.000000e+00 : f32
    %31 = vector.broadcast %cst_23 : f32 to vector<8x512xf32>
    %32 = arith.maximumf %30, %31 : vector<8x512xf32>
    %33 = arith.truncf %32 : vector<8x512xf32> to vector<8x512xbf16>
    %c0_24 = arith.constant 0 : index
    %c0_25 = arith.constant 0 : index
    %34 = vector.load %arg10[%c0_24, %c0_25] : memref<512x128xbf16, #tpu.memory_space<vmem>>, vector<512x128xbf16>
    %cst_26 = arith.constant dense<0.000000e+00> : vector<8x128xf32>
    %35 = tpu.matmul %33, %34, %cst_26 {dimension_numbers = #tpu.dot_dimension_numbers<[1], [0], [0], [1], [0, 0, 1, 1], [], []>} : vector<8x512xbf16>, vector<512x128xbf16>, vector<8x128xf32> -> vector<8x128xf32>
    %c0_27 = arith.constant 0 : index
    %c0_28 = arith.constant 0 : index
    %36 = vector.load %arg11[%c0_27, %c0_28] : memref<1x128xf32, #tpu.memory_space<vmem>>, vector<1x128xf32>
    %37 = vector.broadcast %36 : vector<1x128xf32> to vector<8x128xf32>
    %38 = arith.addf %35, %37 : vector<8x128xf32>
    %c0_29 = arith.constant 0 : index
    %c0_30 = arith.constant 0 : index
    %39 = vector.load %arg12[%c0_29, %c0_30] : memref<8x128xf32, #tpu.memory_space<vmem>>, vector<8x128xf32>
    tpu.vector_store %arg12[%c0_29, %c0_30], %38 {strides = array<i32>} : memref<8x128xf32, #tpu.memory_space<vmem>>, vector<8x128xf32>,
    return
  }
  func.func @transform_0(%arg0: i32) -> (i32, i32) {
    %c0_i32 = arith.constant 0 : i32
    %c0_i32_0 = arith.constant 0 : i32
    return %arg0, %c0_i32 : i32, i32
  }
  func.func @transform_1(%arg0: i32) -> (i32, i32) {
    %c0_i32 = arith.constant 0 : i32
    %c0_i32_0 = arith.constant 0 : i32
    %c0_i32_1 = arith.constant 0 : i32
    return %c0_i32, %c0_i32_0 : i32, i32
  }
  func.func @transform_2(%arg0: i32) -> (i32, i32) {
    %c0_i32 = arith.constant 0 : i32
    %c0_i32_0 = arith.constant 0 : i32
    %c0_i32_1 = arith.constant 0 : i32
    return %c0_i32, %c0_i32_0 : i32, i32
  }
  func.func @transform_3(%arg0: i32) -> (i32, i32) {
    %c0_i32 = arith.constant 0 : i32
    %c0_i32_0 = arith.constant 0 : i32
    %c0_i32_1 = arith.constant 0 : i32
    return %c0_i32, %c0_i32_0 : i32, i32
  }
  func.func @transform_4(%arg0: i32) -> (i32, i32) {
    %c0_i32 = arith.constant 0 : i32
    %c0_i32_0 = arith.constant 0 : i32
    %c0_i32_1 = arith.constant 0 : i32
    return %c0_i32, %c0_i32_0 : i32, i32
  }
  func.func @transform_5(%arg0: i32) -> (i32, i32) {
    %c0_i32 = arith.constant 0 : i32
    %c0_i32_0 = arith.constant 0 : i32
    %c0_i32_1 = arith.constant 0 : i32
    return %c0_i32, %c0_i32_0 : i32, i32
  }
  func.func @transform_6(%arg0: i32) -> (i32, i32) {
    %c0_i32 = arith.constant 0 : i32
    %c0_i32_0 = arith.constant 0 : i32
    %c0_i32_1 = arith.constant 0 : i32
    return %c0_i32, %c0_i32_0 : i32, i32
  }
  func.func @transform_7(%arg0: i32) -> (i32, i32) {
    %c0_i32 = arith.constant 0 : i32
    %c0_i32_0 = arith.constant 0 : i32
    %c0_i32_1 = arith.constant 0 : i32
    return %c0_i32, %c0_i32_0 : i32, i32
  }
  func.func @transform_8(%arg0: i32) -> (i32, i32) {
    %c0_i32 = arith.constant 0 : i32
    %c0_i32_0 = arith.constant 0 : i32
    %c0_i32_1 = arith.constant 0 : i32
    return %c0_i32, %c0_i32_0 : i32, i32
  }
  func.func @transform_9(%arg0: i32) -> (i32, i32) {
    %c0_i32 = arith.constant 0 : i32
    %c0_i32_0 = arith.constant 0 : i32
    %c0_i32_1 = arith.constant 0 : i32
    return %c0_i32, %c0_i32_0 : i32, i32
  }
  func.func @transform_10(%arg0: i32) -> (i32, i32) {
    %c0_i32 = arith.constant 0 : i32
    %c0_i32_0 = arith.constant 0 : i32
    %c0_i32_1 = arith.constant 0 : i32
    return %c0_i32, %c0_i32_0 : i32, i32
  }
  func.func @transform_11(%arg0: i32) -> (i32, i32) {
    %c0_i32 = arith.constant 0 : i32
    %c0_i32_0 = arith.constant 0 : i32
    return %arg0, %c0_i32 : i32, i32
  }
}

</mosaic_0001>

<bundles_post_ra>
// kernel: binary_coding_forward.1
= control target key start
LH: loop header
LB: loop body
LE: loop exit
PB: predicated region body
PF: predicated region fallthrough
CT: control target
= control target key end

     0   :  { %16 = vsyncpa [#allocation3], 0  ;;  %s17827_s0 = inlined_call_operand.vmem [shape: f32[8,161], index: 0, kind: input, shape index: {}]   ;;  %s17828_s1 = inlined_call_operand.hbm [shape: bf16[161,576], index: 1, kind: input, shape index: {}]   ;;  %s17829_s2 = inlined_call_operand.hbm [shape: f32[1,576], index: 2, kind: input, shape index: {}]   ;;  %s17830_s3 = inlined_call_operand.vmem [shape: bf16[576,800], index: 3, kind: input, shape index: {}]   ;;  %s17831_s4 = inlined_call_operand.hbm [shape: f32[1,800], index: 4, kind: input, shape index: {}]   ;;  %s17832_s5 = inlined_call_operand.hbm [shape: bf16[800,1600], index: 5, kind: input, shape index: {}]   ;;  %s17833_s6 = inlined_call_operand.hbm [shape: f32[1,1600], index: 6, kind: input, shape index: {}]   ;;  %s17834_s7 = inlined_call_operand.vmem [shape: bf16[1600,512], index: 7, kind: input, shape index: {}]   ;;  %s17835_s8 = inlined_call_operand.hbm [shape: f32[1,512], index: 8, kind: input, shape index: {}]   ;;  %s17836_s9 = inlined_call_operand.hbm [shape: bf16[512,128], index: 9, kind: input, shape index: {}]   ;;  %s17837_s10 = inlined_call_operand.hbm [shape: f32[1,128], index: 10, kind: input, shape index: {}]   ;;  %s17838_s11 = inlined_call_operand.vmem [shape: f32[8,128], index: 11, kind: output, shape index: {}]  }
   0x1   :  { %17 = vsyncpa [#allocation5], 0 }
   0x2   :  { %18 = vsyncpa [#allocation8], 0 }
   0x3   :  { %19 = vsyncpa [#allocation11], 0 }
   0x4   :  { %20 = vsyncpa [#allocation14], 0  ;;  %s15366_s17 = smov [#allocation4]   ;;  %s15367_s19 = smov [#allocation7]  }
   0x5   :  { %s41_s18 = sshll.u32 %s15366_s17, 4  ;;  %s62_s20 = sshll.u32 %s15367_s19, 4  ;;  %s42_s18 = int_to_ptr.vmem [resolvable:$true] %s41_s18  ;;  %s15443_s20 = int_to_ptr.vmem [resolvable:$true] %s62_s20 }
   0x6   :  { %s15180_s23 = scalar_lea.hbm %s17829_s2, 80 }
   0x7   :  { %p15181_p0 = scmp.ne.s32.totalorder %s17829_s2, %s15180_s23  ;;  %p15184_p1 = scmp.lt.u32.totalorder %s15180_s23, %s17829_s2 }
   0x9   :  { %p15186_p2 = pnand %p15184_p1, %p15181_p0 }
   0xb   :  { %15189 = shalt.err (!%p15186_p2)
}
   0xc   :  { %s15190_s28 = scalar_lea.vmem %s42_s18, 80  ;;  %s15194_s29 = scalar_lea.vmem %s42_s18, 96 }
   0xd   :  { %p15191_p3 = scmp.ne.s32.totalorder %s42_s18, %s15190_s28  ;;  %p15195_p4 = scmp.lt.s32.totalorder %s42_s18, %s42_s18 }
   0xe   :  { %p15196_p5 = scmp.lt.s32.totalorder %s15194_s29, %s15190_s28 }
  0x10   :  { %p15197_p6 = por %p15196_p5, %p15195_p4 }
  0x12   :  { %p15198_p7 = pnand %p15197_p6, %p15191_p3 }
  0x14   :  { %15201 = shalt.err (!%p15198_p7)
}
  0x15   :  { %44 = dma.hbm_to_vmem [thread:$0]  %s17829_s2, 80, %s42_s18, [#allocation5]  }
  0x16   :  { %s15202_s15 = scalar_lea.hbm %s17832_s5, 83200 }
  0x17   :  { %p15203_p8 = scmp.ne.s32.totalorder %s17832_s5, %s15202_s15  ;;  %p15206_p9 = scmp.lt.u32.totalorder %s15202_s15, %s17832_s5 }
  0x19   :  { %p15208_p10 = pnand %p15206_p9, %p15203_p8 }
  0x1b   :  { %15211 = shalt.err (!%p15208_p10)
}
  0x1c   :  { %s15212_s22 = scalar_lea.vmem %s15443_s20, 83200  ;;  %p15217_p12 = scmp.lt.s32.totalorder %s15443_s20, %s15443_s20 }
  0x1d   :  { %p15213_p11 = scmp.ne.s32.totalorder %s15443_s20, %s15212_s22  ;;  %p15218_p13 = scmp.lt.s32.totalorder %s15212_s22, %s15212_s22 }
  0x1f   :  { %p15219_p0 = por %p15218_p13, %p15217_p12 }
  0x21   :  { %p15220_p1 = pnand %p15219_p0, %p15213_p11 }
  0x23   :  { %15223 = shalt.err (!%p15220_p1)
}
  0x24   :  { %s15368_s2 = smov 832   ;;  %s15369_s18 = smov 52  }
  0x25   :  { %68 = dma.hbm_to_vmem [thread:$0]  %s17832_s5, 83200, %s15443_s20, [#allocation8], %s15368_s2, %s15368_s2, %s15369_s18  }
  0x26   :  { %s15370_s25 = smov [#allocation10]   ;;  %s15371_s27 = smov [#allocation2]  }
  0x27   :  { %s87_s26 = sshll.u32 %s15370_s25, 4  ;;  %s28_s28 = sshll.u32 %s15371_s27, 4  ;;  %s88_s26 = int_to_ptr.vmem [resolvable:$true] %s87_s26  ;;  %s15474_s28 = int_to_ptr.vmem [resolvable:$true] %s28_s28 }
  0x28   :  { %s15224_s12 = scalar_lea.hbm %s17835_s8, 64 }
  0x29   :  { %p15225_p2 = scmp.ne.s32.totalorder %s17835_s8, %s15224_s12  ;;  %p15228_p3 = scmp.lt.u32.totalorder %s15224_s12, %s17835_s8 }
  0x2b   :  { %p15230_p4 = pnand %p15228_p3, %p15225_p2 }
  0x2d   :  { %15233 = shalt.err (!%p15230_p4)
}
  0x2e   :  { %s15234_s5 = scalar_lea.vmem %s88_s26, 64  ;;  %p15239_p6 = scmp.lt.s32.totalorder %s88_s26, %s88_s26 }
  0x2f   :  { %p15235_p5 = scmp.ne.s32.totalorder %s88_s26, %s15234_s5  ;;  %p15240_p7 = scmp.lt.s32.totalorder %s15234_s5, %s15234_s5 }
  0x31   :  { %p15241_p8 = por %p15240_p7, %p15239_p6 }
  0x33   :  { %p15242_p9 = pnand %p15241_p8, %p15235_p5 }
  0x35   :  { %15245 = shalt.err (!%p15242_p9)
}
  0x36   :  { %90 = dma.hbm_to_vmem [thread:$0]  %s17835_s8, 64, %s88_s26, [#allocation11]  }
  0x37   :  { %s15246_s22 = scalar_lea.hbm %s17828_s1, 6720 }
  0x38   :  { %p15247_p10 = scmp.ne.s32.totalorder %s17828_s1, %s15246_s22  ;;  %p15250_p11 = scmp.lt.u32.totalorder %s15246_s22, %s17828_s1 }
  0x3a   :  { %p15252_p12 = pnand %p15250_p11, %p15247_p10 }
  0x3c   :  { %15255 = shalt.err (!%p15252_p12)
}
  0x3d   :  { %s15256_s25 = scalar_lea.vmem %s15474_s28, 6720  ;;  %p15261_p0 = scmp.lt.s32.totalorder %s15474_s28, %s15474_s28 }
  0x3e   :  { %p15257_p13 = scmp.ne.s32.totalorder %s15474_s28, %s15256_s25  ;;  %p15262_p1 = scmp.lt.s32.totalorder %s15256_s25, %s15256_s25 }
  0x40   :  { %p15263_p2 = por %p15262_p1, %p15261_p0 }
  0x42   :  { %p15264_p3 = pnand %p15263_p2, %p15257_p13 }
  0x44   :  { %15267 = shalt.err (!%p15264_p3)
}
  0x45   :  { %s15372_s8 = smov 320   ;;  %s15373_s26 = smov 20  }
  0x46   :  { %34 = dma.hbm_to_vmem [thread:$0]  %s17828_s1, 6720, %s15474_s28, [#allocation3], %s15372_s8, %s15372_s8, %s15373_s26  }
  0x47   :  { %s15374_s30 = smov [#allocation6]   ;;  %s15375_s13 = smov [#allocation9]  }
  0x48   :  { %s53_s12 = sshll.u32 %s15374_s30, 4  ;;  %s75_s14 = sshll.u32 %s15375_s13, 4  ;;  %s54_s12 = int_to_ptr.vmem [resolvable:$true] %s53_s12  ;;  %s76_s14 = int_to_ptr.vmem [resolvable:$true] %s75_s14 }
  0x49   :  { %s15268_s5 = scalar_lea.hbm %s17831_s4, 112 }
  0x4a   :  { %p15269_p4 = scmp.ne.s32.totalorder %s17831_s4, %s15268_s5  ;;  %p15272_p5 = scmp.lt.u32.totalorder %s15268_s5, %s17831_s4 }
  0x4c   :  { %p15274_p6 = pnand %p15272_p5, %p15269_p4 }
  0x4e   :  { %15277 = shalt.err (!%p15274_p6)
}
  0x4f   :  { %s15278_s1 = scalar_lea.vmem %s54_s12, 112  ;;  %s15282_s28 = scalar_lea.vmem %s54_s12, 128 }
  0x50   :  { %p15279_p7 = scmp.ne.s32.totalorder %s54_s12, %s15278_s1  ;;  %p15283_p8 = scmp.lt.s32.totalorder %s54_s12, %s54_s12 }
  0x51   :  { %p15284_p9 = scmp.lt.s32.totalorder %s15282_s28, %s15278_s1 }
  0x53   :  { %p15285_p10 = por %p15284_p9, %p15283_p8 }
  0x55   :  { %p15286_p11 = pnand %p15285_p10, %p15279_p7 }
  0x57   :  { %15289 = shalt.err (!%p15286_p11)
}
  0x58   :  { %56 = dma.hbm_to_vmem [thread:$0]  %s17831_s4, 112, %s54_s12, [#allocation5]  }
  0x59   :  { %s15290_s24 = scalar_lea.hbm %s17833_s6, 208 }
  0x5a   :  { %p15291_p12 = scmp.ne.s32.totalorder %s17833_s6, %s15290_s24  ;;  %p15294_p13 = scmp.lt.u32.totalorder %s15290_s24, %s17833_s6 }
  0x5c   :  { %p15296_p0 = pnand %p15294_p13, %p15291_p12 }
  0x5e   :  { %15299 = shalt.err (!%p15296_p0)
}
  0x5f   :  { %s15300_s29 = scalar_lea.vmem %s76_s14, 208  ;;  %s15304_s30 = scalar_lea.vmem %s76_s14, 224 }
  0x60   :  { %p15301_p1 = scmp.ne.s32.totalorder %s76_s14, %s15300_s29  ;;  %p15305_p2 = scmp.lt.s32.totalorder %s76_s14, %s76_s14 }
  0x61   :  { %p15306_p3 = scmp.lt.s32.totalorder %s15304_s30, %s15300_s29 }
  0x63   :  { %p15307_p4 = por %p15306_p3, %p15305_p2 }
  0x65   :  { %p15308_p5 = pnand %p15307_p4, %p15301_p1 }
  0x67   :  { %15311 = shalt.err (!%p15308_p5)
}
  0x68   :  { %78 = dma.hbm_to_vmem [thread:$0]  %s17833_s6, 208, %s76_s14, [#allocation8]  }
  0x69   :  { %s15376_s13 = smov [#allocation12]   ;;  %s15312_s20 = scalar_lea.hbm %s17836_s9, 4096 }
  0x6a   :  { %s96_s15 = sshll.u32 %s15376_s13, 4  ;;  %p15313_p6 = scmp.ne.s32.totalorder %s17836_s9, %s15312_s20  ;;  %s97_s15 = int_to_ptr.vmem [resolvable:$true] %s96_s15 }
  0x6b   :  { %p15316_p7 = scmp.lt.u32.totalorder %s15312_s20, %s17836_s9 }
  0x6d   :  { %p15318_p8 = pnand %p15316_p7, %p15313_p6 }
  0x6f   :  { %15321 = shalt.err (!%p15318_p8)
}
  0x70   :  { %s15322_s28 = scalar_lea.vmem %s97_s15, 4096  ;;  %p15327_p10 = scmp.lt.s32.totalorder %s97_s15, %s97_s15 }
  0x71   :  { %p15323_p9 = scmp.ne.s32.totalorder %s97_s15, %s15322_s28  ;;  %p15328_p11 = scmp.lt.s32.totalorder %s15322_s28, %s15322_s28 }
  0x73   :  { %p15329_p12 = por %p15328_p11, %p15327_p10 }
  0x75   :  { %p15330_p13 = pnand %p15329_p12, %p15323_p9 }
  0x77   :  { %15333 = shalt.err (!%p15330_p13)
}
  0x78   :  { %s15377_s6 = smov 64   ;;  %s15378_s14 = smov 4  }
  0x79   :  { %102 = dma.hbm_to_vmem [thread:$0]  %s17836_s9, 4096, %s97_s15, [#allocation11], %s15377_s6, %s15377_s6, %s15378_s14  }
  0x7a   :  { %s15379_s18 = smov [#allocation13]   ;;  %s15334_s8 = scalar_lea.hbm %s17837_s10, 16 }
  0x7b   :  { %s109_s23 = sshll.u32 %s15379_s18, 4  ;;  %p15335_p0 = scmp.ne.s32.totalorder %s17837_s10, %s15334_s8  ;;  %s110_s23 = int_to_ptr.vmem [resolvable:$true] %s109_s23 }
  0x7c   :  { %p15338_p1 = scmp.lt.u32.totalorder %s15334_s8, %s17837_s10 }
  0x7e   :  { %p15340_p2 = pnand %p15338_p1, %p15335_p0 }
  0x80   :  { %15343 = shalt.err (!%p15340_p2)
}
  0x81   :  { %s15344_s4 = scalar_lea.vmem %s110_s23, 16  ;;  %s15348_s9 = scalar_lea.vmem %s110_s23, 32 }
  0x82   :  { %p15345_p3 = scmp.ne.s32.totalorder %s110_s23, %s15344_s4  ;;  %p15349_p4 = scmp.lt.s32.totalorder %s110_s23, %s110_s23 }
  0x83   :  { %p15350_p5 = scmp.lt.s32.totalorder %s15348_s9, %s15344_s4 }
  0x85   :  { %p15351_p6 = por %p15350_p5, %p15349_p4 }
  0x87   :  { %p15352_p7 = pnand %p15351_p6, %p15345_p3 }
  0x89   :  { %15355 = shalt.err (!%p15352_p7)
}
  0x8a   :  { %112 = dma.hbm_to_vmem [thread:$0]  %s17837_s10, 16, %s110_s23, [#allocation14]  }
  0x8b   :  { %15356 = dma.done.wait [#allocation3], 6720  }
  0x8c   :  { %15357 = vsyncadd [#allocation3], 4294960576 }
  0x8d   :  { %15358 = dma.done.wait [#allocation5], 192  }
  0x8e   :  { %15359 = vsyncadd [#allocation5], 4294967104 }
  0x8f   :  { %15360 = dma.done.wait [#allocation8], 83408  }
  0x90   :  { %15361 = vsyncadd [#allocation8], 4294883888 }
  0x91   :  { %15362 = dma.done.wait [#allocation11], 4160  }
  0x92   :  { %15363 = vsyncadd [#allocation11], 4294963136 }
  0x93   :  { %15364 = dma.done.wait [#allocation14], 16  }
  0x94   :  { %15365 = vsyncadd [#allocation14], 4294967280  ;;  %v13161_v0 = vld [vmem:[#allocation2 + $0x4] ss:$20 sps:$4 sm:$0xff]   ;;  %v13163_v1 = vld [vmem:[#allocation2] ss:$20 sps:$4 sm:$0xff]  }
  0x95   :  { %527 = vmatprep.subr.bf16.mxu0 %v13161_v0  ;;  %v13164_v2 = vld [vmem:[#allocation2 + $0x2c] ss:$20 sps:$4 sm:$0xff]   ;;  %v13166_v3 = vld [vmem:[#allocation2 + $0x28] ss:$20 sps:$4 sm:$0xff]   ;;  %v13169_v5 = vld [vmem:[#allocation2 + $0x50] ss:$20 sps:$4 sm:$0xff]  }
  0x96   :  { %528 = vmatpush1.bf16.msra.mxu0 %v13163_v1  ;;  %v13167_v4 = vld [vmem:[#allocation2 + $0x54] ss:$20 sps:$4 sm:$0xff]   ;;  %v13170_v6 = vld [vmem:[#allocation2 + $0x7c] ss:$20 sps:$4 sm:$0xff]   ;;  %v13172_v7 = vld [vmem:[#allocation2 + $0x78] ss:$20 sps:$4 sm:$0xff]  }
  0x97   :  { %529 = vmatprep.subr.bf16.mxu0 %v13164_v2  ;;  %v13173_v8 = vld [vmem:[#allocation2 + $0xa4] ss:$20 sps:$4 sm:$0xff]   ;;  %v139_v9 = vld [vmem:[%s17827_s0 + $0x8] sm:$0xff]  ;;  %vm505_vm0 = vcmask 269312   ;;  %v13175_v10 = vld [vmem:[#allocation2 + $0xa0] ss:$20 sps:$4 sm:$0xff]  }
  0x98   :  { %v15556_v11 = vpack.c.bf16 %v139_v9, %v139_v9  ;;  %v13193_v12 = vld [vmem:[#allocation2 + $0xc] ss:$20 sps:$4 sm:$0xff]   ;;  %v13195_v13 = vld [vmem:[#allocation2 + $0x8] ss:$20 sps:$4 sm:$0xff]   ;;  %v13198_v16 = vld [vmem:[#allocation2 + $0x30] ss:$20 sps:$4 sm:$0xff]  }
  0x99   :  { %v13176_v14 = vld [vmem:[#allocation2 + $0xcc] ss:$20 sps:$4 sm:$0xff]   ;;  %v13196_v15 = vld [vmem:[#allocation2 + $0x34] ss:$20 sps:$4 sm:$0xff]   ;;  %568 = vmatprep.subr.bf16.mxu1 %v13193_v12  ;;  %v13199_v18 = vld [vmem:[#allocation2 + $0x5c] ss:$20 sps:$4 sm:$0xff]  }
  0x9a   :  { %530 = vmatpush1.bf16.msra.mxu0 %v13166_v3  ;;  %11445 = vmatprep.mubr.msk.bf16.mxu0 %vm505_vm0, %v15556_v11  ;;  %v13178_v17 = vld [vmem:[#allocation2 + $0xc8] ss:$20 sps:$4 sm:$0xff]   ;;  %v13181_v20 = vld [vmem:[#allocation2 + $0xf0] ss:$20 sps:$4 sm:$0xff]   ;;  %v13201_v21 = vld [vmem:[#allocation2 + $0x58] ss:$20 sps:$4 sm:$0xff]  }
  0x9b   :  { %531 = vmatprep.subr.bf16.mxu0 %v13167_v4  ;;  %11446 = vmatprep.mubr.msk.bf16.mxu1 %vm505_vm0, %v15556_v11  ;;  %v13179_v19 = vld [vmem:[#allocation2 + $0xf4] ss:$20 sps:$4 sm:$0xff]   ;;  %v13202_v22 = vld [vmem:[#allocation2 + $0x84] ss:$20 sps:$4 sm:$0xff]   ;;  %v13182_v23 = vld [vmem:[#allocation2 + $0x11c] ss:$20 sps:$4 sm:$0xff]  }
  0x9c   :  { %569 = vmatpush1.bf16.msra.mxu1 %v13195_v13  ;;  %v13204_v24 = vld [vmem:[#allocation2 + $0x80] ss:$20 sps:$4 sm:$0xff]   ;;  %v13184_v25 = vld [vmem:[#allocation2 + $0x118] ss:$20 sps:$4 sm:$0xff]   ;;  %vm509_vm1 = vcmask 1040384   ;;  %v15380_v35 = vmov 0  }
  0x9d   :  { %570 = vmatprep.subr.bf16.mxu1 %v13196_v15  ;;  %v13205_v26 = vld [vmem:[#allocation2 + $0xac] ss:$20 sps:$4 sm:$0xff]   ;;  %v13185_v27 = vld [vmem:[#allocation2 + $0x144] ss:$20 sps:$4 sm:$0xff]   ;;  %v202_v29 = vld [vmem:[#allocation2 + $0x190] sm:$0x11] }
  0x9e   :  { %532 = vmatpush1.bf16.msra.mxu0 %v13169_v5  ;;  %v13187_v28 = vld [vmem:[#allocation2 + $0x140] ss:$20 sps:$4 sm:$0xff]   ;;  %v13207_v30 = vld [vmem:[#allocation2 + $0xa8] ss:$20 sps:$4 sm:$0xff]   ;;  %v11441_v33 = vcombine.high %v202_v29, %v202_v29  ;;  %v15563_v36 = vsel %vm509_vm1, 65535, %v15380_v35  ;;  %v11440_v38 = vcombine.low %v202_v29, %v202_v29  ;;  %vm2280_vm2 = vcmask 523264  }
  0x9f   :  { %533 = vmatprep.subr.bf16.mxu0 %v13170_v6  ;;  %v13209_v31 = vld [vmem:[#allocation2 + $0xd4] ss:$20 sps:$4 sm:$0xff]   ;;  %v13188_v32 = vld [vmem:[#allocation2 + $0x16c] ss:$20 sps:$4 sm:$0xff]   ;;  %v13211_v37 = vld [vmem:[#allocation2 + $0xd0] ss:$20 sps:$4 sm:$0xff]  }
  0xa0   :  { %571 = vmatpush1.bf16.msra.mxu1 %v13198_v16  ;;  %v13190_v34 = vld [vmem:[#allocation2 + $0x168] ss:$20 sps:$4 sm:$0xff]   ;;  %v516_v40 = vand.u32 %v11441_v33, %v15563_v36  ;;  %v13215_v41 = vld [vmem:[#allocation2 + $0xf8] ss:$20 sps:$4 sm:$0xff]   ;;  %v513_v42 = vand.u32 %v11440_v38, %v15563_v36  ;;  %v138_v43 = vld [vmem:[%s17827_s0] sm:$0xff]  ;;  %vm15382_vm3 = vmmov 0  }
  0xa1   :  { %572 = vmatprep.subr.bf16.mxu1 %v13199_v18  ;;  %v13213_v39 = vld [vmem:[#allocation2 + $0xfc] ss:$20 sps:$4 sm:$0xff]   ;;  %v13217_v44 = vld [vmem:[#allocation2 + $0x124] ss:$20 sps:$4 sm:$0xff]   ;;  %v15570_v45 = vpack.c.bf16 %v138_v43, %v138_v43  ;;  %v13219_v46 = vld [vmem:[#allocation2 + $0x120] ss:$20 sps:$4 sm:$0xff]  }
  0xa2   :  { %534 = vmatpush1.bf16.msra.mxu0 %v13172_v7  ;;  %v13208_v47 = vld [vmem:[#allocation2 + $0x10] ss:$20 sps:$4 sm:$0xff]   ;;  %v13221_v48 = vld [vmem:[#allocation2 + $0x14c] ss:$20 sps:$4 sm:$0xff]   ;;  %v203_v49 = vld [vmem:[#allocation2 + $0x198] sm:$0x11] }
  0xa3   :  { %535 = vmatprep.subr.bf16.mxu0 %v13173_v8  ;;  %v13223_v50 = vld [vmem:[#allocation2 + $0x148] ss:$20 sps:$4 sm:$0xff]   ;;  %v13212_v51 = vld [vmem:[#allocation2 + $0x38] ss:$20 sps:$4 sm:$0xff]   ;;  %v11443_v53 = vcombine.high %v203_v49, %v203_v49  ;;  %v13227_v54 = vld [vmem:[#allocation2 + $0x170] ss:$20 sps:$4 sm:$0xff]   ;;  %v11442_v55 = vcombine.low %v203_v49, %v203_v49 }
  0xa4   :  { %573 = vmatpush1.bf16.msra.mxu1 %v13201_v21  ;;  %v13225_v52 = vld [vmem:[#allocation2 + $0x174] ss:$20 sps:$4 sm:$0xff]   ;;  %v13238_v60 = vld [vmem:[%s17830_s3 + $0x4] ss:$28 sps:$4 sm:$0xff]   ;;  %v13244_v63 = vld [vmem:[%s17830_s3 + $0x3c] ss:$28 sps:$4 sm:$0xff]  }
  0xa5   :  { %574 = vmatprep.subr.bf16.mxu1 %v13202_v22  ;;  %v13216_v56 = vld [vmem:[#allocation2 + $0x60] ss:$20 sps:$4 sm:$0xff]   ;;  %v522_v57 = vand.u32 %v11443_v53, %v15563_v36  ;;  %v519_v58 = vand.u32 %v11442_v55, %v15563_v36  ;;  %v13220_v59 = vld [vmem:[#allocation2 + $0x88] ss:$20 sps:$4 sm:$0xff]   ;;  %v13224_v62 = vld [vmem:[#allocation2 + $0xb0] ss:$20 sps:$4 sm:$0xff]  }
  0xa6   :  { %536 = vmatpush1.bf16.msra.mxu0 %v13175_v10  ;;  %v13236_v61 = vld [vmem:[%s17830_s3] ss:$28 sps:$4 sm:$0xff]   ;;  %v13242_v0 = vld [vmem:[%s17830_s3 + $0x38] ss:$28 sps:$4 sm:$0xff]   ;;  %v13248_v3 = vld [vmem:[%s17830_s3 + $0x70] ss:$28 sps:$4 sm:$0xff]  }
  0xa7   :  { %537 = vmatprep.subr.bf16.mxu0 %v13176_v14  ;;  %v13228_v1 = vld [vmem:[#allocation2 + $0xd8] ss:$20 sps:$4 sm:$0xff]   ;;  %v13250_v2 = vld [vmem:[%s17830_s3 + $0x74] ss:$28 sps:$4 sm:$0xff]   ;;  %v13254_v6 = vld [vmem:[%s17830_s3 + $0xa8] ss:$28 sps:$4 sm:$0xff]  }
  0xa8   :  { %575 = vmatpush1.bf16.msra.mxu1 %v13204_v24  ;;  %v13231_v4 = vld [vmem:[#allocation2 + $0x100] ss:$20 sps:$4 sm:$0xff]   ;;  %v13256_v5 = vld [vmem:[%s17830_s3 + $0xac] ss:$28 sps:$4 sm:$0xff]   ;;  %v13233_v10 = vld [vmem:[#allocation2 + $0x150] ss:$20 sps:$4 sm:$0xff]  }
  0xa9   :  { %576 = vmatprep.subr.bf16.mxu1 %v13205_v26  ;;  %v13232_v7 = vld [vmem:[#allocation2 + $0x128] ss:$20 sps:$4 sm:$0xff]   ;;  %v13262_v8 = vld [vmem:[%s17830_s3 + $0xe4] ss:$28 sps:$4 sm:$0xff]   ;;  %v13266_v12 = vld [vmem:[%s17830_s3 + $0x118] ss:$28 sps:$4 sm:$0xff]  }
  0xaa   :  { %538 = vmatpush1.bf16.msra.mxu0 %v13178_v17  ;;  %v13260_v9 = vld [vmem:[%s17830_s3 + $0xe0] ss:$28 sps:$4 sm:$0xff]   ;;  %v13234_v13 = vld [vmem:[#allocation2 + $0x178] ss:$20 sps:$4 sm:$0xff]   ;;  %v13274_v15 = vld [vmem:[%s17830_s3 + $0x154] ss:$28 sps:$4 sm:$0xff]  }
  0xab   :  { %539 = vmatprep.subr.bf16.mxu0 %v13179_v19  ;;  %v13235_v14 = vld [vmem:[#allocation2 + $0x1a0] ss:$0 sps:$4 sm:$0x11]   ;;  %v13272_v16 = vld [vmem:[%s17830_s3 + $0x150] ss:$28 sps:$4 sm:$0xff]   ;;  %vm6856_vm4 = vcmask 261120  }
  0xac   :  { %577 = vmatpush1.bf16.msra.mxu1 %v13207_v30  ;;  %v13280_v17 = vld [vmem:[%s17830_s3 + $0x18c] ss:$28 sps:$4 sm:$0xff]   ;;  %v525_v19 = vand.u32 %v13235_v14, %v15563_v36  ;;  %v13286_v22 = vld [vmem:[%s17830_s3 + $0x1c4] ss:$28 sps:$4 sm:$0xff]   ;;  %v13292_v26 = vld [vmem:[%s17830_s3 + $0x1fc] ss:$28 sps:$4 sm:$0xff]  }
  0xad   :  { %578 = vmatprep.subr.bf16.mxu1 %v13209_v31  ;;  %v13241_v18 = vld [vmem:[%s17830_s3 + $0xc] ss:$28 sps:$4 sm:$0xff]   ;;  %v13284_v24 = vld [vmem:[%s17830_s3 + $0x1c0] ss:$28 sps:$4 sm:$0xff]   ;;  %v13251_v29 = vld [vmem:[%s17830_s3 + $0x78] ss:$28 sps:$4 sm:$0xff]  }
  0xae   :  { %540 = vmatpush1.bf16.msra.mxu0 %v13181_v20  ;;  %v13278_v20 = vld [vmem:[%s17830_s3 + $0x188] ss:$28 sps:$4 sm:$0xff]   ;;  %v13298_v30 = vld [vmem:[%s17830_s3 + $0x234] ss:$28 sps:$4 sm:$0xff]   ;;  %v13316_v43 = vld [vmem:[%s17830_s3 + $0x2dc] ss:$28 sps:$4 sm:$0xff]  }
  0xaf   :  { %541 = vmatprep.subr.bf16.mxu0 %v13182_v23  ;;  %v13239_v21 = vld [vmem:[%s17830_s3 + $0x8] ss:$28 sps:$4 sm:$0xff]   ;;  %v13259_v31 = vld [vmem:[%s17830_s3 + $0xb4] ss:$28 sps:$4 sm:$0xff]   ;;  %v13301_v53 = vld [vmem:[%s17830_s3 + $0x23c] ss:$28 sps:$4 sm:$0xff]  }
  0xb0   :  { %579 = vmatpush1.bf16.msra.mxu1 %v13211_v37  ;;  %v13247_v23 = vld [vmem:[%s17830_s3 + $0x44] ss:$28 sps:$4 sm:$0xff]   ;;  %v13257_v33 = vld [vmem:[%s17830_s3 + $0xb0] ss:$28 sps:$4 sm:$0xff]  }
  0xb1   :  { %580 = vmatprep.subr.bf16.mxu1 %v13213_v39  ;;  %v13265_v36 = vld [vmem:[%s17830_s3 + $0xec] ss:$28 sps:$4 sm:$0xff]   ;;  %v13310_v39 = vld [vmem:[%s17830_s3 + $0x2a4] ss:$28 sps:$4 sm:$0xff]   ;;  %v13322_v55 = vld [vmem:[%s17830_s3 + $0x314] ss:$28 sps:$4 sm:$0xff]  }
  0xb2   :  { %542 = vmatpush1.bf16.msra.mxu0 %v13184_v25  ;;  %v13245_v25 = vld [vmem:[%s17830_s3 + $0x40] ss:$28 sps:$4 sm:$0xff]   ;;  %v13302_v37 = vld [vmem:[%s17830_s3 + $0x268] ss:$28 sps:$4 sm:$0xff]  }
  0xb3   :  { %543 = vmatprep.subr.bf16.mxu0 %v13185_v27  ;;  %v13253_v27 = vld [vmem:[%s17830_s3 + $0x7c] ss:$28 sps:$4 sm:$0xff]   ;;  %v13263_v38 = vld [vmem:[%s17830_s3 + $0xe8] ss:$28 sps:$4 sm:$0xff]  }
  0xb4   :  { %581 = vmatpush1.bf16.msra.mxu1 %v13215_v41  ;;  %v13308_v41 = vld [vmem:[%s17830_s3 + $0x2a0] ss:$28 sps:$4 sm:$0xff]   ;;  %v13289_v49 = vld [vmem:[%s17830_s3 + $0x1cc] ss:$28 sps:$4 sm:$0xff]  }
  0xb5   :  { %582 = vmatprep.subr.bf16.mxu1 %v13217_v44  ;;  %v13277_v44 = vld [vmem:[%s17830_s3 + $0x15c] ss:$28 sps:$4 sm:$0xff]  }
  0xb6   :  { %544 = vmatpush1.bf16.msra.mxu0 %v13187_v28  ;;  %v13290_v28 = vld [vmem:[%s17830_s3 + $0x1f8] ss:$28 sps:$4 sm:$0xff]  }
  0xb7   :  { %545 = vmatprep.subr.bf16.mxu0 %v13188_v32  ;;  %v13296_v32 = vld [vmem:[%s17830_s3 + $0x230] ss:$28 sps:$4 sm:$0xff]  }
  0xb8   :  { %583 = vmatpush1.bf16.msra.mxu1 %v13219_v46  ;;  %v13275_v46 = vld [vmem:[%s17830_s3 + $0x158] ss:$28 sps:$4 sm:$0xff]  }
  0xb9   :  { %584 = vmatprep.subr.bf16.mxu1 %v13221_v48  ;;  %v13281_v48 = vld [vmem:[%s17830_s3 + $0x190] ss:$28 sps:$4 sm:$0xff]  }
  0xba   :  { %546 = vmatpush1.bf16.msra.mxu0 %v13190_v34  ;;  %v13304_v34 = vld [vmem:[%s17830_s3 + $0x26c] ss:$28 sps:$4 sm:$0xff]  }
  0xbb   :  { %547 = vmatprep.subr.bf16.mxu0 %v516_v40  ;;  %v13271_v40 = vld [vmem:[%s17830_s3 + $0x124] ss:$28 sps:$4 sm:$0xff]  }
  0xbc   :  { %585 = vmatpush1.bf16.msra.mxu1 %v13223_v50  ;;  %v13287_v50 = vld [vmem:[%s17830_s3 + $0x1c8] ss:$28 sps:$4 sm:$0xff]  }
  0xbd   :  { %586 = vmatprep.subr.bf16.mxu1 %v13225_v52  ;;  %v13293_v52 = vld [vmem:[%s17830_s3 + $0x200] ss:$28 sps:$4 sm:$0xff]  }
  0xbe   :  { %548 = vmatpush1.bf16.msra.mxu0 %v513_v42  ;;  %v13269_v42 = vld [vmem:[%s17830_s3 + $0x120] ss:$28 sps:$4 sm:$0xff]  }
  0xbf   :  { %609 = vmatprep.subr.bf16.mxu0 %v15380_v35 }
  0xc0   :  { %587 = vmatpush1.bf16.msra.mxu1 %v13227_v54  ;;  %v13299_v54 = vld [vmem:[%s17830_s3 + $0x238] ss:$28 sps:$4 sm:$0xff]  }
  0xc1   :  { %560 = vmatmul.mubr.bf16.vlgmr.msra.gmra.mrb[0].mxu0 %v15570_v45  ;;  %588 = vmatprep.subr.bf16.mxu1 %v522_v57  ;;  %v13320_v57 = vld [vmem:[%s17830_s3 + $0x310] ss:$28 sps:$4 sm:$0xff]  }
  0xc2   :  { %610 = vmatpush1.bf16.msra.mxu0 %v13208_v47  ;;  %11447 = vmatprep.mubr.msk.bf16.mxu0 %vm505_vm0, %v15556_v11  ;;  %v13268_v11 = vld [vmem:[%s17830_s3 + $0x11c] ss:$28 sps:$4 sm:$0xff]   ;;  %v13283_v47 = vld [vmem:[%s17830_s3 + $0x194] ss:$28 sps:$4 sm:$0xff]  }
  0xc3   :  { %611 = vmatprep.subr.bf16.mxu0 %v15380_v35 }
  0xc4   :  { %589 = vmatpush1.bf16.msra.mxu1 %v519_v58  ;;  %v13305_v58 = vld [vmem:[%s17830_s3 + $0x270] ss:$28 sps:$4 sm:$0xff]  }
  0xc5   :  { %2284 = vmatprep.subr.bf16.mxu1 %v13238_v60  ;;  %v13313_v60 = vld [vmem:[%s17830_s3 + $0x2ac] ss:$28 sps:$4 sm:$0xff]  }
  0xc6   :  { %612 = vmatpush1.bf16.msra.mxu0 %v13212_v51  ;;  %v13295_v51 = vld [vmem:[%s17830_s3 + $0x204] ss:$28 sps:$4 sm:$0xff]  }
  0xc7   :  { %613 = vmatprep.subr.bf16.mxu0 %v15380_v35  ;;  %601 = vmatmul.mubr.bf16.vlgmr.msra.gmra.mrb[0].mxu1 %v15570_v45 }
  0xc8   :  { %2285 = vmatpush1.bf16.msra.mxu1 %v13236_v61  ;;  %v13326_v61 = vld [vmem:[%s17830_s3 + $0x348] ss:$28 sps:$4 sm:$0xff]  }
  0xc9   :  { %2286 = vmatprep.subr.bf16.mxu1 %v13244_v63  ;;  %v13334_v63 = vld [vmem:[%s17830_s3 + $0x384] ss:$28 sps:$4 sm:$0xff]  }
  0xca   :  { %614 = vmatpush1.bf16.msra.mxu0 %v13216_v56  ;;  %v13307_v56 = vld [vmem:[%s17830_s3 + $0x274] ss:$28 sps:$4 sm:$0xff]  }
  0xcb   :  { %615 = vmatprep.subr.bf16.mxu0 %v15380_v35 }
  0xcc   :  { %2287 = vmatpush1.bf16.msra.mxu1 %v13242_v0  ;;  %v13319_v0 = vld [vmem:[%s17830_s3 + $0x2e4] ss:$28 sps:$4 sm:$0xff]  }
  0xcd   :  { %2288 = vmatprep.subr.bf16.mxu1 %v13250_v2  ;;  %v13325_v2 = vld [vmem:[%s17830_s3 + $0x31c] ss:$28 sps:$4 sm:$0xff]  }
  0xce   :  { %616 = vmatpush1.bf16.msra.mxu0 %v13220_v59  ;;  %v13328_v59 = vld [vmem:[%s17830_s3 + $0x34c] ss:$28 sps:$4 sm:$0xff]  }
  0xcf   :  { %617 = vmatprep.subr.bf16.mxu0 %v15380_v35 }
  0xd0   :  { %2289 = vmatpush1.bf16.msra.mxu1 %v13248_v3  ;;  %v13323_v3 = vld [vmem:[%s17830_s3 + $0x318] ss:$28 sps:$4 sm:$0xff]  }
  0xd1   :  { %2290 = vmatprep.subr.bf16.mxu1 %v13256_v5  ;;  %v13329_v5 = vld [vmem:[%s17830_s3 + $0x350] ss:$28 sps:$4 sm:$0xff]  }
  0xd2   :  { %618 = vmatpush1.bf16.msra.mxu0 %v13224_v62  ;;  %v13311_v62 = vld [vmem:[%s17830_s3 + $0x2a8] ss:$28 sps:$4 sm:$0xff]  }
  0xd3   :  { %619 = vmatprep.subr.bf16.mxu0 %v15380_v35 }
  0xd4   :  { %2291 = vmatpush1.bf16.msra.mxu1 %v13254_v6  ;;  %v13337_v6 = vld [vmem:[%s17830_s3 + $0x38c] ss:$28 sps:$4 sm:$0xff]  }
  0xd5   :  { %2292 = vmatprep.subr.bf16.mxu1 %v13262_v8 }
  0xd6   :  { %620 = vmatpush1.bf16.msra.mxu0 %v13228_v1  ;;  %v13317_v1 = vld [vmem:[%s17830_s3 + $0x2e0] ss:$28 sps:$4 sm:$0xff]  }
  0xd7   :  { %621 = vmatprep.subr.bf16.mxu0 %v15380_v35 }
  0xd8   :  { %2293 = vmatpush1.bf16.msra.mxu1 %v13260_v9  ;;  %v15791_v9 = vld [vmem:[#allocation4] sm:$0x1f] }
  0xd9   :  { %2294 = vmatprep.subr.bf16.mxu1 %v13268_v11 }
  0xda   :  { %622 = vmatpush1.bf16.msra.mxu0 %v13231_v4  ;;  %v13331_v4 = vld [vmem:[%s17830_s3 + $0x354] ss:$28 sps:$4 sm:$0xff]  }
  0xdb   :  { %623 = vmatprep.subr.bf16.mxu0 %v15380_v35 }
  0xdc   :  { %2295 = vmatpush1.bf16.msra.mxu1 %v13266_v12 }
  0xdd   :  { %2296 = vmatprep.subr.bf16.mxu1 %v13274_v15 }
  0xde   :  { %624 = vmatpush1.bf16.msra.mxu0 %v13232_v7  ;;  %v207_v7 = vlaneseq }
  0xdf   :  { %625 = vmatprep.subr.bf16.mxu0 %v15380_v35 }
  0xe0   :  { %2297 = vmatpush1.bf16.msra.mxu1 %v13272_v16  ;;  %v15789_v8 = vshrl.u32 %v207_v7, 7  ;;  %v13389_v7 = vld [vmem:[%s17830_s3 + $0x580] ss:$28 sps:$4 sm:$0xff]  }
  0xe1   :  { %2298 = vmatprep.subr.bf16.mxu1 %v13280_v17 }
  0xe2   :  { %626 = vmatpush1.bf16.msra.mxu0 %v13233_v10  ;;  %v15794_v10 = vsub.s32 0, %v15789_v8  ;;  %v15797_v11 = vsub.s32 1, %v15789_v8 }
  0xe3   :  { %627 = vmatprep.subr.bf16.mxu0 %v15380_v35 }
  0xe4   :  { %2299 = vmatpush1.bf16.msra.mxu1 %v13278_v20  ;;  %v210_v12 = vrot.slane %v15791_v9, %v15794_v10 }
  0xe5   :  { %2300 = vmatprep.subr.bf16.mxu1 %v13286_v22  ;;  %v13332_v22 = vld [vmem:[%s17830_s3 + $0x380] ss:$28 sps:$4 sm:$0xff]  }
  0xe6   :  { %628 = vmatpush1.bf16.msra.mxu0 %v13234_v13  ;;  %v214_v13 = vrot.slane %v15791_v9, %v15797_v11 }
  0xe7   :  { %629 = vmatprep.subr.bf16.mxu0 %v15380_v35 }
  0xe8   :  { %2301 = vmatpush1.bf16.msra.mxu1 %v13284_v24 }
  0xe9   :  { %2302 = vmatprep.subr.bf16.mxu1 %v13292_v26  ;;  %v13340_v26 = vld [vmem:[%s17830_s3 + $0x3bc] ss:$28 sps:$4 sm:$0xff]  }
  0xea   :  { %630 = vmatpush1.bf16.msra.mxu0 %v525_v19 }
  0xeb   :  { %2407 = vmatprep.subr.bf16.mxu0 %v13241_v18 }
  0xec   :  { %2303 = vmatpush1.bf16.msra.mxu1 %v13290_v28  ;;  %v13338_v28 = vld [vmem:[%s17830_s3 + $0x3b8] ss:$28 sps:$4 sm:$0xff]  }
  0xed   :  { %642 = vmatmul.mubr.bf16.vlgmr.msra.gmra.mrb[4].mxu0 %v15570_v45  ;;  %2304 = vmatprep.subr.bf16.mxu1 %v13298_v30  ;;  %v13314_v45 = vld [vmem:[%s17830_s3 + $0x2d8] ss:$28 sps:$4 sm:$0xff]   ;;  %v15830_v30 = vsub.s32 3, %v15789_v8 }
  0xee   :  { %2408 = vmatpush1.bf16.msra.mxu0 %v13239_v21 }
  0xef   :  { %2409 = vmatprep.subr.bf16.mxu0 %v13247_v23  ;;  %v13335_v23 = vld [vmem:[%s17830_s3 + $0x388] ss:$28 sps:$4 sm:$0xff]  }
  0xf0   :  { %2305 = vmatpush1.bf16.msra.mxu1 %v13296_v32  ;;  %v13349_v32 = vld [vmem:[%s17830_s3 + $0x3fc] ss:$28 sps:$4 sm:$0xff]  }
  0xf1   :  { %2306 = vmatprep.subr.bf16.mxu1 %v13304_v34  ;;  %v13347_v34 = vld [vmem:[%s17830_s3 + $0x3f8] ss:$28 sps:$4 sm:$0xff]  }
  0xf2   :  { %2410 = vmatpush1.bf16.msra.mxu0 %v13245_v25 }
  0xf3   :  { %2411 = vmatprep.subr.bf16.mxu0 %v13253_v27  ;;  %v13343_v27 = vld [vmem:[%s17830_s3 + $0x3c4] ss:$28 sps:$4 sm:$0xff]  }
  0xf4   :  { %2307 = vmatpush1.bf16.msra.mxu1 %v13302_v37  ;;  %v13352_v37 = vld [vmem:[%s17830_s3 + $0x42c] ss:$28 sps:$4 sm:$0xff]  }
  0xf5   :  { %2308 = vmatprep.subr.bf16.mxu1 %v13310_v39 }
  0xf6   :  { %2412 = vmatpush1.bf16.msra.mxu0 %v13251_v29  ;;  %v13341_v29 = vld [vmem:[%s17830_s3 + $0x3c0] ss:$28 sps:$4 sm:$0xff]  }
  0xf7   :  { %2413 = vmatprep.subr.bf16.mxu0 %v13259_v31  ;;  %v13346_v31 = vld [vmem:[%s17830_s3 + $0x3f4] ss:$28 sps:$4 sm:$0xff]  }
  0xf8   :  { %2309 = vmatpush1.bf16.msra.mxu1 %v13308_v41 }
  0xf9   :  { %2310 = vmatprep.subr.bf16.mxu1 %v13316_v43 }
  0xfa   :  { %2414 = vmatpush1.bf16.msra.mxu0 %v13257_v33  ;;  %v13344_v33 = vld [vmem:[%s17830_s3 + $0x3f0] ss:$28 sps:$4 sm:$0xff]  }
  0xfb   :  { %2415 = vmatprep.subr.bf16.mxu0 %v13265_v36  ;;  %v222_v36 = vrot.slane %v15791_v9, %v15830_v30 }
  0xfc   :  { %2311 = vmatpush1.bf16.msra.mxu1 %v13314_v45 }
  0xfd   :  { %2312 = vmatprep.subr.bf16.mxu1 %v13322_v55  ;;  %v13365_v55 = vld [vmem:[%s17830_s3 + $0x4a0] ss:$28 sps:$4 sm:$0xff]  }
  0xfe   :  { %2416 = vmatpush1.bf16.msra.mxu0 %v13263_v38  ;;  %v13355_v38 = vld [vmem:[%s17830_s3 + $0x434] ss:$28 sps:$4 sm:$0xff]  }
  0xff   :  { %2417 = vmatprep.subr.bf16.mxu0 %v13271_v40  ;;  %v13350_v40 = vld [vmem:[%s17830_s3 + $0x428] ss:$28 sps:$4 sm:$0xff]  }
 0x100   :  { %2313 = vmatpush1.bf16.msra.mxu1 %v13320_v57  ;;  %v13373_v57 = vld [vmem:[%s17830_s3 + $0x4dc] ss:$28 sps:$4 sm:$0xff]  }
 0x101   :  { %2314 = vmatprep.subr.bf16.mxu1 %v13328_v59  ;;  %v13371_v59 = vld [vmem:[%s17830_s3 + $0x4d8] ss:$28 sps:$4 sm:$0xff]  }
 0x102   :  { %2418 = vmatpush1.bf16.msra.mxu0 %v13269_v42  ;;  %v13353_v42 = vld [vmem:[%s17830_s3 + $0x430] ss:$28 sps:$4 sm:$0xff]  }
 0x103   :  { %2419 = vmatprep.subr.bf16.mxu0 %v13277_v44 }
 0x104   :  { %2315 = vmatpush1.bf16.msra.mxu1 %v13326_v61  ;;  %v13379_v61 = vld [vmem:[%s17830_s3 + $0x514] ss:$28 sps:$4 sm:$0xff]  }
 0x105   :  { %2325 = vmatprep.subr.bf16.mxu1 %v13334_v63  ;;  %v13377_v63 = vld [vmem:[%s17830_s3 + $0x510] ss:$28 sps:$4 sm:$0xff]  }
 0x106   :  { %2420 = vmatpush1.bf16.msra.mxu0 %v13275_v46  ;;  %v13358_v46 = vld [vmem:[%s17830_s3 + $0x464] ss:$28 sps:$4 sm:$0xff]  }
 0x107   :  { %2421 = vmatprep.subr.bf16.mxu0 %v13283_v47  ;;  %v13361_v47 = vld [vmem:[%s17830_s3 + $0x46c] ss:$28 sps:$4 sm:$0xff]  }
 0x10a   :  { %2422 = vmatpush1.bf16.msra.mxu0 %v13281_v48 }
 0x10b   :  { %2423 = vmatprep.subr.bf16.mxu0 %v13289_v49  ;;  %v13356_v49 = vld [vmem:[%s17830_s3 + $0x460] ss:$28 sps:$4 sm:$0xff]  }
 0x10e   :  { %2424 = vmatpush1.bf16.msra.mxu0 %v13287_v50  ;;  %v13359_v50 = vld [vmem:[%s17830_s3 + $0x468] ss:$28 sps:$4 sm:$0xff]  }
 0x10f   :  { %2425 = vmatprep.subr.bf16.mxu0 %v13295_v51  ;;  %v13364_v51 = vld [vmem:[%s17830_s3 + $0x49c] ss:$28 sps:$4 sm:$0xff]  }
 0x112   :  { %2426 = vmatpush1.bf16.msra.mxu0 %v13293_v52  ;;  %v13367_v52 = vld [vmem:[%s17830_s3 + $0x4a4] ss:$28 sps:$4 sm:$0xff]  }
 0x113   :  { %2427 = vmatprep.subr.bf16.mxu0 %v13301_v53 }
 0x116   :  { %2428 = vmatpush1.bf16.msra.mxu0 %v13299_v54  ;;  %v13362_v54 = vld [vmem:[%s17830_s3 + $0x498] ss:$28 sps:$4 sm:$0xff]  }
 0x117   :  { %2429 = vmatprep.subr.bf16.mxu0 %v13307_v56  ;;  %v13370_v56 = vld [vmem:[%s17830_s3 + $0x4d4] ss:$28 sps:$4 sm:$0xff]  }
 0x11a   :  { %2430 = vmatpush1.bf16.msra.mxu0 %v13305_v58  ;;  %v13368_v58 = vld [vmem:[%s17830_s3 + $0x4d0] ss:$28 sps:$4 sm:$0xff]  }
 0x11b   :  { %2431 = vmatprep.subr.bf16.mxu0 %v13313_v60  ;;  %v13376_v60 = vld [vmem:[%s17830_s3 + $0x50c] ss:$28 sps:$4 sm:$0xff]  }
 0x11e   :  { %2432 = vmatpush1.bf16.msra.mxu0 %v13311_v62  ;;  %v13374_v62 = vld [vmem:[%s17830_s3 + $0x508] ss:$28 sps:$4 sm:$0xff]  }
 0x11f   :  { %2433 = vmatprep.subr.bf16.mxu0 %v13319_v0  ;;  %v13382_v0 = vld [vmem:[%s17830_s3 + $0x544] ss:$28 sps:$4 sm:$0xff]  }
 0x122   :  { %2434 = vmatpush1.bf16.msra.mxu0 %v13317_v1  ;;  %v13385_v1 = vld [vmem:[%s17830_s3 + $0x54c] ss:$28 sps:$4 sm:$0xff]  }
 0x123   :  { %2435 = vmatprep.subr.bf16.mxu0 %v13325_v2  ;;  %v13380_v2 = vld [vmem:[%s17830_s3 + $0x540] ss:$28 sps:$4 sm:$0xff]  }
 0x126   :  { %2436 = vmatpush1.bf16.msra.mxu0 %v13323_v3  ;;  %v13383_v3 = vld [vmem:[%s17830_s3 + $0x548] ss:$28 sps:$4 sm:$0xff]  }
 0x127   :  { %2437 = vmatprep.subr.bf16.mxu0 %v13331_v4  ;;  %v13388_v4 = vld [vmem:[%s17830_s3 + $0x57c] ss:$28 sps:$4 sm:$0xff]  }
 0x12a   :  { %2438 = vmatpush1.bf16.msra.mxu0 %v13329_v5  ;;  %v13391_v5 = vld [vmem:[%s17830_s3 + $0x584] ss:$28 sps:$4 sm:$0xff]  }
 0x12b   :  { %2448 = vmatprep.subr.bf16.mxu0 %v13337_v6  ;;  %v13386_v6 = vld [vmem:[%s17830_s3 + $0x578] ss:$28 sps:$4 sm:$0xff]  }
 0x194   :  { %v561_v14 = vpop.f32.mrb[0].mxu0 }
 0x195   :  { %v562_v15 = vadd.f32 %v561_v14, %v210_v12  ;;  %v563_v16 = vpop.f32.mrb[1].mxu0  ;;  %v13394_v12 = vld [vmem:[%s17830_s3 + $0x5b4] ss:$28 sps:$4 sm:$0xff]  }
 0x196   :  { %v564_v17 = vadd.f32 %v563_v16, %v214_v13  ;;  %v565_v18 = vpop.f32.mrb[2].mxu0  ;;  %v13397_v13 = vld [vmem:[%s17830_s3 + $0x5bc] ss:$28 sps:$4 sm:$0xff]   ;;  %v13392_v14 = vld [vmem:[%s17830_s3 + $0x5b0] ss:$28 sps:$4 sm:$0xff]  }
 0x197   :  { %v649_v19 = vmax.f32 %v562_v15, 0.0  ;;  %v566_v20 = vpop.f32.mrb[3].mxu0  ;;  %v13395_v15 = vld [vmem:[%s17830_s3 + $0x5b8] ss:$28 sps:$4 sm:$0xff]   ;;  %v13400_v18 = vld [vmem:[%s17830_s3 + $0x5ec] ss:$28 sps:$4 sm:$0xff]  }
 0x198   :  { %v650_v21 = vmax.f32 %v564_v17, 0.0 }
 0x199   :  { %v15811_v25 = vpack.c.bf16 %v649_v19, %v649_v19  ;;  %v13403_v19 = vld [vmem:[%s17830_s3 + $0x5f4] ss:$28 sps:$4 sm:$0xff]  }
 0x19a   :  { %v15809_v24 = vpack.c.bf16 %v650_v21, %v650_v21  ;;  %v15852_v39 = vpop.f32.mrb[0].mxu1 }
 0x19b   :  { %v604_v41 = vpop.f32.mrb[1].mxu1 }
 0x19c   :  { %2316 = vmatprep.mubr.bf16.mxu1 %v15809_v24  ;;  %2439 = vmatprep.mubr.bf16.mxu0 %v15809_v24  ;;  %v605_v43 = vadd.f32 %v604_v41, %v222_v36  ;;  %v606_v44 = vpop.f32.mrb[2].mxu1  ;;  %v13413_v36 = vld [vmem:[%s17830_s3 + $0x660] ss:$28 sps:$4 sm:$0xff]   ;;  %v13416_v41 = vld [vmem:[%s17830_s3 + $0x690] ss:$28 sps:$4 sm:$0xff]  }
 0x19d   :  { %2317 = vmatmul.mubr.bf16.vlgmr.msra.gmra.mrb[4].mxu1 %v15811_v25  ;;  %2440 = vmatmul.mubr.bf16.vlgmr.msra.gmra.mrb[8].mxu0 %v15811_v25  ;;  %v607_v45 = vpop.f32.mrb[3].mxu1  ;;  %v13424_v44 = vld [vmem:[%s17830_s3 + $0x6cc] ss:$28 sps:$4 sm:$0xff]  }
 0x19e   :  { %2326 = vmatpush1.bf16.msra.mxu1 %v13332_v22  ;;  %2449 = vmatpush1.bf16.msra.mxu0 %v13335_v23  ;;  %v652_v48 = vmax.f32 %v605_v43, 0.0  ;;  %v13398_v22 = vld [vmem:[%s17830_s3 + $0x5e8] ss:$28 sps:$4 sm:$0xff]   ;;  %v13401_v23 = vld [vmem:[%s17830_s3 + $0x5f0] ss:$28 sps:$4 sm:$0xff]  }
 0x19f   :  { %2327 = vmatprep.subr.bf16.mxu1 %v13340_v26  ;;  %2450 = vmatprep.subr.bf16.mxu0 %v13343_v27  ;;  %v13406_v26 = vld [vmem:[%s17830_s3 + $0x624] ss:$28 sps:$4 sm:$0xff]   ;;  %v13409_v27 = vld [vmem:[%s17830_s3 + $0x62c] ss:$28 sps:$4 sm:$0xff]   ;;  %v13427_v45 = vld [vmem:[%s17830_s3 + $0x6d4] ss:$28 sps:$4 sm:$0xff]  }
 0x1a0   :  { %v15878_v53 = vpack.c.bf16 %v652_v48, %v652_v48  ;;  %v13430_v48 = vld [vmem:[%s17830_s3 + $0x704] ss:$28 sps:$4 sm:$0xff]  }
 0x1a2   :  { %2328 = vmatpush1.bf16.msra.mxu1 %v13338_v28  ;;  %2451 = vmatpush1.bf16.msra.mxu0 %v13341_v29  ;;  %v13404_v28 = vld [vmem:[%s17830_s3 + $0x620] ss:$28 sps:$4 sm:$0xff]   ;;  %v13407_v29 = vld [vmem:[%s17830_s3 + $0x628] ss:$28 sps:$4 sm:$0xff]  }
 0x1a3   :  { %2329 = vmatprep.subr.bf16.mxu1 %v13346_v31  ;;  %2452 = vmatprep.subr.bf16.mxu0 %v13349_v32  ;;  %v15975_v31 = vsub.s32 2, %v15789_v8  ;;  %v13412_v32 = vld [vmem:[%s17830_s3 + $0x65c] ss:$28 sps:$4 sm:$0xff]  }
 0x1a4   :  { %2357 = vmatprep.mubr.bf16.mxu1 %v15878_v53  ;;  %2480 = vmatprep.mubr.bf16.mxu0 %v15878_v53 }
 0x1a6   :  { %2330 = vmatpush1.bf16.msra.mxu1 %v13344_v33  ;;  %2453 = vmatpush1.bf16.msra.mxu0 %v13347_v34  ;;  %v13415_v33 = vld [vmem:[%s17830_s3 + $0x664] ss:$28 sps:$4 sm:$0xff]   ;;  %v13410_v34 = vld [vmem:[%s17830_s3 + $0x658] ss:$28 sps:$4 sm:$0xff]  }
 0x1a7   :  { %2331 = vmatprep.subr.bf16.mxu1 %v13352_v37  ;;  %2454 = vmatprep.subr.bf16.mxu0 %v13355_v38  ;;  %v218_v37 = vrot.slane %v15791_v9, %v15975_v31  ;;  %v13418_v38 = vld [vmem:[%s17830_s3 + $0x694] ss:$28 sps:$4 sm:$0xff]  }
 0x1a9   :  { %v603_v43 = vadd.f32 %v15852_v39, %v218_v37  ;;  %v13425_v39 = vld [vmem:[%s17830_s3 + $0x6d0] ss:$28 sps:$4 sm:$0xff]  }
 0x1aa   :  { %2332 = vmatpush1.bf16.msra.mxu1 %v13350_v40  ;;  %2455 = vmatpush1.bf16.msra.mxu0 %v13353_v42  ;;  %v13421_v40 = vld [vmem:[%s17830_s3 + $0x69c] ss:$28 sps:$4 sm:$0xff]   ;;  %v13481_v37 = vld [vmem:[%s17830_s3 + $0x130] ss:$28 sps:$4 sm:$0xff]  }
 0x1ab   :  { %2333 = vmatprep.subr.bf16.mxu1 %v13358_v46  ;;  %2456 = vmatprep.subr.bf16.mxu0 %v13361_v47  ;;  %v13419_v42 = vld [vmem:[%s17830_s3 + $0x698] ss:$28 sps:$4 sm:$0xff]   ;;  %v13422_v46 = vld [vmem:[%s17830_s3 + $0x6c8] ss:$28 sps:$4 sm:$0xff]   ;;  %v651_v47 = vmax.f32 %v603_v43, 0.0 }
 0x1ac   :  { %v13489_v43 = vld [vmem:[%s17830_s3 + $0x19c] ss:$28 sps:$4 sm:$0xff]  }
 0x1ae   :  { %2334 = vmatpush1.bf16.msra.mxu1 %v13356_v49  ;;  %2457 = vmatpush1.bf16.msra.mxu0 %v13359_v50  ;;  %v13433_v49 = vld [vmem:[%s17830_s3 + $0x70c] ss:$28 sps:$4 sm:$0xff]   ;;  %v13428_v50 = vld [vmem:[%s17830_s3 + $0x700] ss:$28 sps:$4 sm:$0xff]  }
 0x1af   :  { %2335 = vmatprep.subr.bf16.mxu1 %v13364_v51  ;;  %2458 = vmatprep.subr.bf16.mxu0 %v13367_v52  ;;  %v13431_v51 = vld [vmem:[%s17830_s3 + $0x708] ss:$28 sps:$4 sm:$0xff]   ;;  %v16028_v52 = vpack.c.bf16 %v651_v47, %v651_v47  ;;  %v13495_v47 = vld [vmem:[%s17830_s3 + $0x558] ss:$28 sps:$4 sm:$0xff]  }
 0x1b2   :  { %2336 = vmatpush1.bf16.msra.mxu1 %v13362_v54  ;;  %2459 = vmatpush1.bf16.msra.mxu0 %v13365_v55  ;;  %v16031_v54 = vsub.s32 4, %v15789_v8  ;;  %v13436_v55 = vld [vmem:[%s17830_s3 + $0x73c] ss:$28 sps:$4 sm:$0xff]  }
 0x1b3   :  { %2337 = vmatprep.subr.bf16.mxu1 %v13370_v56  ;;  %2460 = vmatprep.subr.bf16.mxu0 %v13373_v57  ;;  %v13439_v56 = vld [vmem:[%s17830_s3 + $0x744] ss:$28 sps:$4 sm:$0xff]   ;;  %v13434_v57 = vld [vmem:[%s17830_s3 + $0x738] ss:$28 sps:$4 sm:$0xff]  }
 0x1b6   :  { %2338 = vmatpush1.bf16.msra.mxu1 %v13368_v58  ;;  %2461 = vmatpush1.bf16.msra.mxu0 %v13371_v59  ;;  %v13437_v58 = vld [vmem:[%s17830_s3 + $0x740] ss:$28 sps:$4 sm:$0xff]   ;;  %v226_v59 = vrot.slane %v15791_v9, %v16031_v54  ;;  %v13443_v9 = vld [vmem:[%s17830_s3 + $0x778] ss:$28 sps:$4 sm:$0xff]  }
 0x1b7   :  { %2339 = vmatprep.subr.bf16.mxu1 %v13376_v60  ;;  %2462 = vmatprep.subr.bf16.mxu0 %v13379_v61  ;;  %v13442_v60 = vld [vmem:[%s17830_s3 + $0x774] ss:$28 sps:$4 sm:$0xff]   ;;  %v13445_v61 = vld [vmem:[%s17830_s3 + $0x77c] ss:$28 sps:$4 sm:$0xff]  }
 0x1ba   :  { %2340 = vmatpush1.bf16.msra.mxu1 %v13374_v62  ;;  %2463 = vmatpush1.bf16.msra.mxu0 %v13377_v63  ;;  %v13440_v62 = vld [vmem:[%s17830_s3 + $0x770] ss:$28 sps:$4 sm:$0xff]  }
 0x1bb   :  { %2341 = vmatprep.subr.bf16.mxu1 %v13382_v0  ;;  %2464 = vmatprep.subr.bf16.mxu0 %v13385_v1  ;;  %v13448_v0 = vld [vmem:[%s17830_s3 + $0x7ac] ss:$28 sps:$4 sm:$0xff]   ;;  %v13451_v1 = vld [vmem:[%s17830_s3 + $0x7b4] ss:$28 sps:$4 sm:$0xff]  }
 0x1be   :  { %2342 = vmatpush1.bf16.msra.mxu1 %v13380_v2  ;;  %2465 = vmatpush1.bf16.msra.mxu0 %v13383_v3  ;;  %v13446_v2 = vld [vmem:[%s17830_s3 + $0x7a8] ss:$28 sps:$4 sm:$0xff]   ;;  %v13449_v3 = vld [vmem:[%s17830_s3 + $0x7b0] ss:$28 sps:$4 sm:$0xff]  }
 0x1bf   :  { %2343 = vmatprep.subr.bf16.mxu1 %v13388_v4  ;;  %2466 = vmatprep.subr.bf16.mxu0 %v13391_v5  ;;  %v13454_v5 = vld [vmem:[%s17830_s3 + $0x14] ss:$28 sps:$4 sm:$0xff]  }
 0x1c0   :  { %v15948_v16 = vpop.f32.mrb[4].mxu0 }
 0x1c1   :  { %v645_v17 = vpop.f32.mrb[5].mxu0  ;;  %v644_v63 = vadd.f32 %v15948_v16, %v226_v59  ;;  %v13460_v16 = vld [vmem:[%s17830_s3 + $0x210] ss:$28 sps:$4 sm:$0xff]   ;;  %v13502_v59 = vld [vmem:[%s17830_s3 + $0x240] ss:$28 sps:$4 sm:$0xff]  }
 0x1c2   :  { %2344 = vmatpush1.bf16.msra.mxu1 %v13386_v6  ;;  %2467 = vmatpush1.bf16.msra.mxu0 %v13389_v7  ;;  %v646_v20 = vpop.f32.mrb[6].mxu0  ;;  %v13455_v6 = vld [vmem:[%s17830_s3 + $0x1d8] ss:$28 sps:$4 sm:$0xff]   ;;  %v13452_v7 = vld [vmem:[%s17830_s3 + $0x10] ss:$28 sps:$4 sm:$0xff]  }
 0x1c3   :  { %2345 = vmatprep.subr.bf16.mxu1 %v13394_v12  ;;  %2468 = vmatprep.subr.bf16.mxu0 %v13397_v13  ;;  %v647_v21 = vpop.f32.mrb[7].mxu0  ;;  %v653_v4 = vmax.f32 %v644_v63, 0.0  ;;  %v13456_v13 = vld [vmem:[%s17830_s3 + $0x18] ss:$28 sps:$4 sm:$0xff]   ;;  %v13461_v17 = vld [vmem:[%s17830_s3 + $0x50] ss:$28 sps:$4 sm:$0xff]  }
 0x1c4   :  { %v13462_v20 = vld [vmem:[%s17830_s3 + $0x80] ss:$28 sps:$4 sm:$0xff]   ;;  %v13466_v21 = vld [vmem:[%s17830_s3 + $0x88] ss:$28 sps:$4 sm:$0xff]  }
 0x1c5   :  { %v16085_v12 = vpack.c.bf16 %v653_v4, %v653_v4  ;;  %v13511_v63 = vld [vmem:[%s17830_s3 + $0x440] ss:$28 sps:$4 sm:$0xff]   ;;  %v13519_v4 = vld [vmem:[%s17830_s3 + $0x2ec] ss:$28 sps:$4 sm:$0xff]  }
 0x1c6   :  { %2346 = vmatpush1.bf16.msra.mxu1 %v13392_v14  ;;  %2469 = vmatpush1.bf16.msra.mxu0 %v13395_v15  ;;  %v13459_v14 = vld [vmem:[%s17830_s3 + $0x4c] ss:$28 sps:$4 sm:$0xff]  }
 0x1c7   :  { %2347 = vmatprep.subr.bf16.mxu1 %v13400_v18  ;;  %2470 = vmatprep.subr.bf16.mxu0 %v13403_v19  ;;  %v13457_v15 = vld [vmem:[%s17830_s3 + $0x48] ss:$28 sps:$4 sm:$0xff]  }
 0x1c8   :  { %v13464_v18 = vld [vmem:[%s17830_s3 + $0x84] ss:$28 sps:$4 sm:$0xff]  }
 0x1c9   :  { %v13465_v19 = vld [vmem:[%s17830_s3 + $0x248] ss:$28 sps:$4 sm:$0xff]  }
 0x1ca   :  { %2348 = vmatpush1.bf16.msra.mxu1 %v13398_v22  ;;  %2471 = vmatpush1.bf16.msra.mxu0 %v13401_v23  ;;  %v13469_v22 = vld [vmem:[%s17830_s3 + $0xbc] ss:$28 sps:$4 sm:$0xff]  }
 0x1cb   :  { %2349 = vmatprep.subr.bf16.mxu1 %v13406_v26  ;;  %2472 = vmatprep.subr.bf16.mxu0 %v13409_v27  ;;  %v13470_v23 = vld [vmem:[%s17830_s3 + $0x280] ss:$28 sps:$4 sm:$0xff]   ;;  %v13474_v27 = vld [vmem:[%s17830_s3 + $0xf4] ss:$28 sps:$4 sm:$0xff]  }
 0x1cc   :  { %v13471_v26 = vld [vmem:[%s17830_s3 + $0xc0] ss:$28 sps:$4 sm:$0xff]  }
 0x1ce   :  { %2350 = vmatpush1.bf16.msra.mxu1 %v13404_v28  ;;  %2473 = vmatpush1.bf16.msra.mxu0 %v13407_v29  ;;  %v13475_v28 = vld [vmem:[%s17830_s3 + $0x2b8] ss:$28 sps:$4 sm:$0xff]   ;;  %v13472_v29 = vld [vmem:[%s17830_s3 + $0xf0] ss:$28 sps:$4 sm:$0xff]  }
 0x1cf   :  { %2351 = vmatprep.subr.bf16.mxu1 %v13412_v32  ;;  %2474 = vmatprep.subr.bf16.mxu0 %v13415_v33  ;;  %v13476_v32 = vld [vmem:[%s17830_s3 + $0xf8] ss:$28 sps:$4 sm:$0xff]   ;;  %v13479_v33 = vld [vmem:[%s17830_s3 + $0x12c] ss:$28 sps:$4 sm:$0xff]  }
 0x1d2   :  { %2352 = vmatpush1.bf16.msra.mxu1 %v13410_v34  ;;  %2475 = vmatpush1.bf16.msra.mxu0 %v13413_v36  ;;  %v13480_v34 = vld [vmem:[%s17830_s3 + $0x2f0] ss:$28 sps:$4 sm:$0xff]   ;;  %v13477_v36 = vld [vmem:[%s17830_s3 + $0x128] ss:$28 sps:$4 sm:$0xff]  }
 0x1d3   :  { %2353 = vmatprep.subr.bf16.mxu1 %v13418_v38  ;;  %2476 = vmatprep.subr.bf16.mxu0 %v13421_v40  ;;  %v13484_v38 = vld [vmem:[%s17830_s3 + $0x164] ss:$28 sps:$4 sm:$0xff]  }
 0x1d4   :  { %v13485_v40 = vld [vmem:[%s17830_s3 + $0x328] ss:$28 sps:$4 sm:$0xff]  }
 0x1d6   :  { %2354 = vmatpush1.bf16.msra.mxu1 %v13416_v41  ;;  %2477 = vmatpush1.bf16.msra.mxu0 %v13419_v42  ;;  %v13482_v41 = vld [vmem:[%s17830_s3 + $0x160] ss:$28 sps:$4 sm:$0xff]   ;;  %v13486_v42 = vld [vmem:[%s17830_s3 + $0x168] ss:$28 sps:$4 sm:$0xff]  }
 0x1d7   :  { %2355 = vmatprep.subr.bf16.mxu1 %v13424_v44  ;;  %2478 = vmatprep.subr.bf16.mxu0 %v13427_v45  ;;  %v13490_v44 = vld [vmem:[%s17830_s3 + $0x360] ss:$28 sps:$4 sm:$0xff]   ;;  %v13487_v45 = vld [vmem:[%s17830_s3 + $0x198] ss:$28 sps:$4 sm:$0xff]  }
 0x1da   :  { %2356 = vmatpush1.bf16.msra.mxu1 %v13422_v46  ;;  %2479 = vmatpush1.bf16.msra.mxu0 %v13425_v39  ;;  %v13491_v46 = vld [vmem:[%s17830_s3 + $0x1a0] ss:$28 sps:$4 sm:$0xff]   ;;  %v13494_v39 = vld [vmem:[%s17830_s3 + $0x1d4] ss:$28 sps:$4 sm:$0xff]  }
 0x1db   :  { %2366 = vmatprep.subr.bf16.mxu1 %v13430_v48  ;;  %2489 = vmatprep.subr.bf16.mxu0 %v13433_v49  ;;  %v13492_v48 = vld [vmem:[%s17830_s3 + $0x1d0] ss:$28 sps:$4 sm:$0xff]   ;;  %v13496_v49 = vld [vmem:[%s17830_s3 + $0x398] ss:$28 sps:$4 sm:$0xff]  }
 0x1dd   :  { %2358 = vmatmul.mubr.bf16.vlgmr.msra.gmra.mrb[4].mxu1 %v16028_v52  ;;  %2481 = vmatmul.mubr.bf16.vlgmr.msra.gmra.mrb[8].mxu0 %v16028_v52 }
 0x1de   :  { %2367 = vmatpush1.bf16.msra.mxu1 %v13428_v50  ;;  %2490 = vmatpush1.bf16.msra.mxu0 %v13431_v51  ;;  %v13499_v50 = vld [vmem:[%s17830_s3 + $0x20c] ss:$28 sps:$4 sm:$0xff]  }
 0x1df   :  { %2368 = vmatprep.subr.bf16.mxu1 %v13436_v55  ;;  %2491 = vmatprep.subr.bf16.mxu0 %v13439_v56  ;;  %v13500_v51 = vld [vmem:[%s17830_s3 + $0x590] ss:$28 sps:$4 sm:$0xff]   ;;  %v13497_v55 = vld [vmem:[%s17830_s3 + $0x208] ss:$28 sps:$4 sm:$0xff]  }
 0x1e0   :  { %2398 = vmatprep.mubr.bf16.mxu1 %v15380_v35  ;;  %2521 = vmatprep.mubr.bf16.mxu0 %v15380_v35  ;;  %v13501_v56 = vld [vmem:[%s17830_s3 + $0x3d0] ss:$28 sps:$4 sm:$0xff]  }
 0x1e2   :  { %2369 = vmatpush1.bf16.msra.mxu1 %v13434_v57  ;;  %2492 = vmatpush1.bf16.msra.mxu0 %v13437_v58  ;;  %v13504_v57 = vld [vmem:[%s17830_s3 + $0x244] ss:$28 sps:$4 sm:$0xff]  }
 0x1e3   :  { %2370 = vmatprep.subr.bf16.mxu1 %v13442_v60  ;;  %2493 = vmatprep.subr.bf16.mxu0 %v13445_v61  ;;  %v13505_v58 = vld [vmem:[%s17830_s3 + $0x5c8] ss:$28 sps:$4 sm:$0xff]   ;;  %v13509_v61 = vld [vmem:[%s17830_s3 + $0x27c] ss:$28 sps:$4 sm:$0xff]  }
 0x1e4   :  { %v13506_v60 = vld [vmem:[%s17830_s3 + $0x408] ss:$28 sps:$4 sm:$0xff]  }
 0x1e6   :  { %2371 = vmatpush1.bf16.msra.mxu1 %v13440_v62  ;;  %2494 = vmatpush1.bf16.msra.mxu0 %v13443_v9  ;;  %v13510_v62 = vld [vmem:[%s17830_s3 + $0x600] ss:$28 sps:$4 sm:$0xff]   ;;  %v13507_v9 = vld [vmem:[%s17830_s3 + $0x278] ss:$28 sps:$4 sm:$0xff]  }
 0x1e7   :  { %2372 = vmatprep.subr.bf16.mxu1 %v13448_v0  ;;  %2495 = vmatprep.subr.bf16.mxu0 %v13451_v1  ;;  %v13514_v0 = vld [vmem:[%s17830_s3 + $0x2b4] ss:$28 sps:$4 sm:$0xff]  }
 0x1e8   :  { %v13515_v1 = vld [vmem:[%s17830_s3 + $0x638] ss:$28 sps:$4 sm:$0xff]  }
 0x1ea   :  { %2373 = vmatpush1.bf16.msra.mxu1 %v13446_v2  ;;  %2496 = vmatpush1.bf16.msra.mxu0 %v13449_v3  ;;  %v13512_v2 = vld [vmem:[%s17830_s3 + $0x2b0] ss:$28 sps:$4 sm:$0xff]   ;;  %v13516_v3 = vld [vmem:[%s17830_s3 + $0x478] ss:$28 sps:$4 sm:$0xff]  }
 0x1eb   :  { %2530 = vmatprep.subr.bf16.mxu1 %v13454_v5  ;;  %12796 = vmatprep.subr.bf16.mxu0 %v13455_v6  ;;  %v13520_v5 = vld [vmem:[%s17830_s3 + $0x670] ss:$28 sps:$4 sm:$0xff]   ;;  %v13517_v6 = vld [vmem:[%s17830_s3 + $0x2e8] ss:$28 sps:$4 sm:$0xff]  }
 0x1ed   :  { %11700 = vmatmul.mubr.msk.bf16.vlgmr.msra.gmra.mrb[4].mxu1 %vm2280_vm2, %v16085_v12  ;;  %11701 = vmatmul.mubr.msk.bf16.vlgmr.msra.gmra.mrb[8].mxu0 %vm2280_vm2, %v16085_v12 }
 0x1ee   :  { %2531 = vmatpush1.bf16.msra.mxu1 %v13452_v7  ;;  %2562 = vmatprep.mubr.bf16.mxu1 %v15809_v24  ;;  %v13521_v7 = vld [vmem:[%s17830_s3 + $0x4b0] ss:$28 sps:$4 sm:$0xff]  }
 0x1ef   :  { %12797 = vmatpush3.bf16.msra.mxu0 %v13456_v13  ;;  %2685 = vmatprep.mubr.bf16.mxu0 %v15809_v24  ;;  %v13467_v24 = vld [vmem:[%s17830_s3 + $0xb8] ss:$28 sps:$4 sm:$0xff]   ;;  %v13524_v13 = vld [vmem:[%s17830_s3 + $0x324] ss:$28 sps:$4 sm:$0xff]  }
 0x1f0   :  { %2532 = vmatprep.subr.bf16.mxu1 %v13459_v14  ;;  %12798 = vmatprep.subr.bf16.mxu0 %v13460_v16  ;;  %v13525_v14 = vld [vmem:[%s17830_s3 + $0x6a8] ss:$28 sps:$4 sm:$0xff]  }
 0x1f1   :  { %v13526_v16 = vld [vmem:[%s17830_s3 + $0x4e8] ss:$28 sps:$4 sm:$0xff]  }
 0x1f2   :  { %2533 = vmatpush1.bf16.msra.mxu1 %v13457_v15  ;;  %v13522_v15 = vld [vmem:[%s17830_s3 + $0x320] ss:$28 sps:$4 sm:$0xff]  }
 0x1f3   :  { %12799 = vmatpush3.bf16.msra.mxu0 %v13461_v17  ;;  %2534 = vmatprep.subr.bf16.mxu1 %v13464_v18  ;;  %v13529_v17 = vld [vmem:[%s17830_s3 + $0x35c] ss:$28 sps:$4 sm:$0xff]  }
 0x1f4   :  { %12800 = vmatprep.subr.bf16.mxu0 %v13465_v19  ;;  %v13530_v18 = vld [vmem:[%s17830_s3 + $0x6e0] ss:$28 sps:$4 sm:$0xff]   ;;  %v13527_v19 = vld [vmem:[%s17830_s3 + $0x358] ss:$28 sps:$4 sm:$0xff]  }
 0x1f6   :  { %2535 = vmatpush1.bf16.msra.mxu1 %v13462_v20  ;;  %v13531_v20 = vld [vmem:[%s17830_s3 + $0x520] ss:$28 sps:$4 sm:$0xff]  }
 0x1f7   :  { %12801 = vmatpush3.bf16.msra.mxu0 %v13466_v21  ;;  %2536 = vmatprep.subr.bf16.mxu1 %v13469_v22  ;;  %v13534_v21 = vld [vmem:[%s17830_s3 + $0x394] ss:$28 sps:$4 sm:$0xff]  }
 0x1f8   :  { %12802 = vmatprep.subr.bf16.mxu0 %v13470_v23  ;;  %v13532_v22 = vld [vmem:[%s17830_s3 + $0x390] ss:$28 sps:$4 sm:$0xff]   ;;  %v13535_v23 = vld [vmem:[%s17830_s3 + $0x718] ss:$28 sps:$4 sm:$0xff]  }
 0x1fa   :  { %2537 = vmatpush1.bf16.msra.mxu1 %v13467_v24  ;;  %v13538_v24 = vld [vmem:[%s17830_s3 + $0x3cc] ss:$28 sps:$4 sm:$0xff]  }
 0x1fb   :  { %12803 = vmatpush3.bf16.msra.mxu0 %v13471_v26  ;;  %2538 = vmatprep.subr.bf16.mxu1 %v13474_v27  ;;  %v15381_v26 = vmov 0.0   ;;  %v13536_v27 = vld [vmem:[%s17830_s3 + $0x3c8] ss:$28 sps:$4 sm:$0xff]  }
 0x1fc   :  { %12804 = vmatprep.subr.bf16.mxu0 %v13475_v28  ;;  %v13539_v28 = vld [vmem:[%s17830_s3 + $0x750] ss:$28 sps:$4 sm:$0xff]  }
 0x1fe   :  { %2539 = vmatpush1.bf16.msra.mxu1 %v13472_v29  ;;  %v13542_v29 = vld [vmem:[%s17830_s3 + $0x404] ss:$28 sps:$4 sm:$0xff]  }
 0x1ff   :  { %12805 = vmatpush3.bf16.msra.mxu0 %v13476_v32  ;;  %2540 = vmatprep.subr.bf16.mxu1 %v13479_v33  ;;  %v13543_v32 = vld [vmem:[%s17830_s3 + $0x788] ss:$28 sps:$4 sm:$0xff]   ;;  %v13544_v33 = vld [vmem:[%s17830_s3 + $0x438] ss:$28 sps:$4 sm:$0xff]  }
 0x200   :  { %12806 = vmatprep.subr.bf16.mxu0 %v13480_v34  ;;  %v13547_v34 = vld [vmem:[%s17830_s3 + $0x7c0] ss:$28 sps:$4 sm:$0xff]  }
 0x202   :  { %2541 = vmatpush1.bf16.msra.mxu1 %v13477_v36  ;;  %v13550_v36 = vld [vmem:[%s17830_s3 + $0x474] ss:$28 sps:$4 sm:$0xff]  }
 0x203   :  { %12807 = vmatpush3.bf16.msra.mxu0 %v13481_v37  ;;  %2542 = vmatprep.subr.bf16.mxu1 %v13484_v38  ;;  %v13598_v37 = vld [vmem:[#allocation7 + $0x4] ss:$52 sps:$4 sm:$0xff]  }
 0x204   :  { %12808 = vmatprep.subr.bf16.mxu0 %v13485_v40  ;;  %v13548_v38 = vld [vmem:[%s17830_s3 + $0x470] ss:$28 sps:$4 sm:$0xff]  }
 0x205   :  { %v13553_v40 = vld [vmem:[%s17830_s3 + $0x4ac] ss:$28 sps:$4 sm:$0xff]  }
 0x206   :  { %2543 = vmatpush1.bf16.msra.mxu1 %v13482_v41  ;;  %v13596_v41 = vld [vmem:[#allocation7] ss:$52 sps:$4 sm:$0xff]  }
 0x207   :  { %12809 = vmatpush3.bf16.msra.mxu0 %v13486_v42  ;;  %2544 = vmatprep.subr.bf16.mxu1 %v13489_v43  ;;  %v13604_v42 = vld [vmem:[#allocation7 + $0x6c] ss:$52 sps:$4 sm:$0xff]   ;;  %v13551_v43 = vld [vmem:[%s17830_s3 + $0x4a8] ss:$28 sps:$4 sm:$0xff]  }
 0x208   :  { %12810 = vmatprep.subr.bf16.mxu0 %v13490_v44  ;;  %v13556_v44 = vld [vmem:[%s17830_s3 + $0x4e4] ss:$28 sps:$4 sm:$0xff]  }
 0x20a   :  { %2545 = vmatpush1.bf16.msra.mxu1 %v13487_v45  ;;  %v13602_v45 = vld [vmem:[#allocation7 + $0x68] ss:$52 sps:$4 sm:$0xff]  }
 0x20b   :  { %12811 = vmatpush3.bf16.msra.mxu0 %v13491_v46  ;;  %2546 = vmatprep.subr.bf16.mxu1 %v13494_v39  ;;  %v13554_v46 = vld [vmem:[%s17830_s3 + $0x4e0] ss:$28 sps:$4 sm:$0xff]  }
 0x20c   :  { %12818 = vmatprep.subr.bf16.mxu0 %v13495_v47  ;;  %v13610_v39 = vld [vmem:[#allocation7 + $0xd4] ss:$52 sps:$4 sm:$0xff]  }
 0x20d   :  { %v13559_v47 = vld [vmem:[%s17830_s3 + $0x51c] ss:$28 sps:$4 sm:$0xff]  }
 0x20e   :  { %2686 = vmatmul.mubr.bf16.vlgmr.msra.gmra.mrb[12].mxu0 %v15811_v25  ;;  %2547 = vmatpush1.bf16.msra.mxu1 %v13492_v48  ;;  %v13608_v48 = vld [vmem:[#allocation7 + $0xd0] ss:$52 sps:$4 sm:$0xff]  }
 0x20f   :  { %12819 = vmatpush3.bf16.msra.mxu0 %v13496_v49  ;;  %2725 = vmatprep.mubr.bf16.mxu0 %v15878_v53  ;;  %v13557_v49 = vld [vmem:[%s17830_s3 + $0x518] ss:$28 sps:$4 sm:$0xff]  }
 0x210   :  { %2548 = vmatprep.subr.bf16.mxu1 %v13499_v50  ;;  %12820 = vmatprep.subr.bf16.mxu0 %v13500_v51  ;;  %v13616_v50 = vld [vmem:[#allocation7 + $0x13c] ss:$52 sps:$4 sm:$0xff]  }
 0x211   :  { %v13562_v51 = vld [vmem:[%s17830_s3 + $0x554] ss:$28 sps:$4 sm:$0xff]  }
 0x212   :  { %2549 = vmatpush1.bf16.msra.mxu1 %v13497_v55  ;;  %v13614_v55 = vld [vmem:[#allocation7 + $0x138] ss:$52 sps:$4 sm:$0xff]  }
 0x213   :  { %12821 = vmatpush3.bf16.msra.mxu0 %v13501_v56  ;;  %2550 = vmatprep.subr.bf16.mxu1 %v13504_v57  ;;  %v13560_v56 = vld [vmem:[%s17830_s3 + $0x550] ss:$28 sps:$4 sm:$0xff]  }
 0x214   :  { %12822 = vmatprep.subr.bf16.mxu0 %v13505_v58  ;;  %v13622_v57 = vld [vmem:[#allocation7 + $0x1a4] ss:$52 sps:$4 sm:$0xff]  }
 0x215   :  { %v13565_v58 = vld [vmem:[%s17830_s3 + $0x58c] ss:$28 sps:$4 sm:$0xff]  }
 0x216   :  { %2551 = vmatpush1.bf16.msra.mxu1 %v13502_v59  ;;  %v13620_v59 = vld [vmem:[#allocation7 + $0x1a0] ss:$52 sps:$4 sm:$0xff]  }
 0x217   :  { %12823 = vmatpush3.bf16.msra.mxu0 %v13506_v60  ;;  %2552 = vmatprep.subr.bf16.mxu1 %v13509_v61  ;;  %v13628_v60 = vld [vmem:[#allocation7 + $0x20c] ss:$52 sps:$4 sm:$0xff]   ;;  %v13563_v61 = vld [vmem:[%s17830_s3 + $0x588] ss:$28 sps:$4 sm:$0xff]  }
 0x218   :  { %12824 = vmatprep.subr.bf16.mxu0 %v13510_v62  ;;  %v13568_v62 = vld [vmem:[%s17830_s3 + $0x5c4] ss:$28 sps:$4 sm:$0xff]  }
 0x21a   :  { %2553 = vmatpush1.bf16.msra.mxu1 %v13507_v9  ;;  %v13626_v9 = vld [vmem:[#allocation7 + $0x208] ss:$52 sps:$4 sm:$0xff]  }
 0x21b   :  { %12825 = vmatpush3.bf16.msra.mxu0 %v13511_v63  ;;  %2554 = vmatprep.subr.bf16.mxu1 %v13514_v0  ;;  %v13634_v63 = vld [vmem:[#allocation7 + $0x274] ss:$52 sps:$4 sm:$0xff]  }
 0x21c   :  { %12826 = vmatprep.subr.bf16.mxu0 %v13515_v1  ;;  %v13566_v0 = vld [vmem:[%s17830_s3 + $0x5c0] ss:$28 sps:$4 sm:$0xff]  }
 0x21d   :  { %v13571_v1 = vld [vmem:[%s17830_s3 + $0x5fc] ss:$28 sps:$4 sm:$0xff]  }
 0x21e   :  { %2555 = vmatpush1.bf16.msra.mxu1 %v13512_v2  ;;  %v13632_v2 = vld [vmem:[#allocation7 + $0x270] ss:$52 sps:$4 sm:$0xff]  }
 0x21f   :  { %12827 = vmatpush3.bf16.msra.mxu0 %v13516_v3  ;;  %2556 = vmatprep.subr.bf16.mxu1 %v13519_v4  ;;  %v13640_v3 = vld [vmem:[#allocation7 + $0x2dc] ss:$52 sps:$4 sm:$0xff]   ;;  %v13569_v4 = vld [vmem:[%s17830_s3 + $0x5f8] ss:$28 sps:$4 sm:$0xff]  }
 0x220   :  { %12828 = vmatprep.subr.bf16.mxu0 %v13520_v5  ;;  %v13574_v5 = vld [vmem:[%s17830_s3 + $0x634] ss:$28 sps:$4 sm:$0xff]  }
 0x222   :  { %2557 = vmatpush1.bf16.msra.mxu1 %v13517_v6  ;;  %v13638_v6 = vld [vmem:[#allocation7 + $0x2d8] ss:$52 sps:$4 sm:$0xff]  }
 0x223   :  { %12829 = vmatpush3.bf16.msra.mxu0 %v13521_v7  ;;  %2558 = vmatprep.subr.bf16.mxu1 %v13524_v13  ;;  %v13646_v7 = vld [vmem:[#allocation7 + $0x344] ss:$52 sps:$4 sm:$0xff]  }
 0x224   :  { %12830 = vmatprep.subr.bf16.mxu0 %v13525_v14  ;;  %v13572_v13 = vld [vmem:[%s17830_s3 + $0x630] ss:$28 sps:$4 sm:$0xff]  }
 0x225   :  { %v13577_v14 = vld [vmem:[%s17830_s3 + $0x66c] ss:$28 sps:$4 sm:$0xff]  }
 0x226   :  { %2559 = vmatpush1.bf16.msra.mxu1 %v13522_v15  ;;  %v13644_v15 = vld [vmem:[#allocation7 + $0x340] ss:$52 sps:$4 sm:$0xff]  }
 0x227   :  { %12831 = vmatpush3.bf16.msra.mxu0 %v13526_v16  ;;  %2560 = vmatprep.subr.bf16.mxu1 %v13529_v17  ;;  %v13652_v16 = vld [vmem:[#allocation7 + $0x3ac] ss:$52 sps:$4 sm:$0xff]   ;;  %v13575_v17 = vld [vmem:[%s17830_s3 + $0x668] ss:$28 sps:$4 sm:$0xff]  }
 0x228   :  { %12832 = vmatprep.subr.bf16.mxu0 %v13530_v18  ;;  %v13580_v18 = vld [vmem:[%s17830_s3 + $0x6a4] ss:$28 sps:$4 sm:$0xff]  }
 0x22a   :  { %2561 = vmatpush1.bf16.msra.mxu1 %v13527_v19  ;;  %v13650_v19 = vld [vmem:[#allocation7 + $0x3a8] ss:$52 sps:$4 sm:$0xff]  }
 0x22b   :  { %12833 = vmatpush3.bf16.msra.mxu0 %v13531_v20  ;;  %2571 = vmatprep.subr.bf16.mxu1 %v13534_v21  ;;  %v13578_v20 = vld [vmem:[%s17830_s3 + $0x6a0] ss:$28 sps:$4 sm:$0xff]  }
 0x22c   :  { %12958 = vmatprep.subr.bf16.mxu0 %v15381_v26  ;;  %v13658_v21 = vld [vmem:[#allocation7 + $0x414] ss:$52 sps:$4 sm:$0xff]  }
 0x22d   :  { %2563 = vmatmul.mubr.bf16.vlgmr.msra.gmra.mrb[8].mxu1 %v15811_v25  ;;  %v13540_v25 = vld [vmem:[%s17830_s3 + $0x400] ss:$28 sps:$4 sm:$0xff]  }
 0x22e   :  { %2726 = vmatmul.mubr.bf16.vlgmr.msra.gmra.mrb[16].mxu0 %v16028_v52  ;;  %2572 = vmatpush1.bf16.msra.mxu1 %v13532_v22  ;;  %v13583_v22 = vld [vmem:[%s17830_s3 + $0x6dc] ss:$28 sps:$4 sm:$0xff]  }
 0x22f   :  { %2603 = vmatprep.mubr.bf16.mxu1 %v15878_v53  ;;  %12959 = vmatpush3.bf16.msra.mxu0 %v13535_v23  ;;  %v13546_v53 = vld [vmem:[%s17830_s3 + $0x43c] ss:$28 sps:$4 sm:$0xff]  }
 0x230   :  { %2573 = vmatprep.subr.bf16.mxu1 %v13538_v24  ;;  %12960 = vmatprep.subr.bf16.mxu0 %v15381_v26  ;;  %v13656_v23 = vld [vmem:[#allocation7 + $0x410] ss:$52 sps:$4 sm:$0xff]  }
 0x231   :  { %12966 = vmatprep.mubr.msk.bf16.mxu0 %vm15382_vm3, %v15381_v26  ;;  %v13664_v24 = vld [vmem:[#allocation7 + $0x47c] ss:$52 sps:$4 sm:$0xff]  }
 0x232   :  { %2574 = vmatpush1.bf16.msra.mxu1 %v13536_v27  ;;  %v13581_v27 = vld [vmem:[%s17830_s3 + $0x6d8] ss:$28 sps:$4 sm:$0xff]  }
 0x233   :  { %12961 = vmatpush3.bf16.msra.mxu0 %v13539_v28  ;;  %2575 = vmatprep.subr.bf16.mxu1 %v13542_v29  ;;  %v13586_v28 = vld [vmem:[%s17830_s3 + $0x714] ss:$28 sps:$4 sm:$0xff]   ;;  %v13662_v29 = vld [vmem:[#allocation7 + $0x478] ss:$52 sps:$4 sm:$0xff]  }
 0x234   :  { %12962 = vmatprep.subr.bf16.mxu0 %v15381_v26 }
 0x236   :  { %2576 = vmatpush1.bf16.msra.mxu1 %v13540_v25  ;;  %v13670_v25 = vld [vmem:[#allocation7 + $0x4e4] ss:$52 sps:$4 sm:$0xff]  }
 0x237   :  { %12963 = vmatpush3.bf16.msra.mxu0 %v13543_v32  ;;  %2577 = vmatprep.subr.bf16.mxu1 %v13546_v53  ;;  %v13584_v32 = vld [vmem:[%s17830_s3 + $0x710] ss:$28 sps:$4 sm:$0xff]  }
 0x238   :  { %12964 = vmatprep.subr.bf16.mxu0 %v15381_v26  ;;  %v13589_v53 = vld [vmem:[%s17830_s3 + $0x74c] ss:$28 sps:$4 sm:$0xff]  }
 0x23a   :  { %2578 = vmatpush1.bf16.msra.mxu1 %v13544_v33  ;;  %v13668_v33 = vld [vmem:[#allocation7 + $0x4e0] ss:$52 sps:$4 sm:$0xff]  }
 0x23b   :  { %12965 = vmatpush3.bf16.msra.mxu0 %v13547_v34  ;;  %2579 = vmatprep.subr.bf16.mxu1 %v13550_v36  ;;  %v13676_v34 = vld [vmem:[#allocation7 + $0x54c] ss:$52 sps:$4 sm:$0xff]   ;;  %v13587_v36 = vld [vmem:[%s17830_s3 + $0x748] ss:$28 sps:$4 sm:$0xff]  }
 0x23c   :  { %6860 = vmatprep.subr.bf16.mxu0 %v13598_v37  ;;  %v13592_v37 = vld [vmem:[%s17830_s3 + $0x784] ss:$28 sps:$4 sm:$0xff]  }
 0x23e   :  { %12967 = vmatmul.mubr.msk.bf16.vlgmr.msra.gmra.mrb[20].mxu0 %vm2280_vm2, %v16085_v12  ;;  %2580 = vmatpush1.bf16.msra.mxu1 %v13548_v38  ;;  %v13674_v38 = vld [vmem:[#allocation7 + $0x548] ss:$52 sps:$4 sm:$0xff]  }
 0x23f   :  { %2581 = vmatprep.subr.bf16.mxu1 %v13553_v40  ;;  %6861 = vmatpush1.bf16.msra.mxu0 %v13596_v41  ;;  %v13682_v40 = vld [vmem:[#allocation7 + $0x5b4] ss:$52 sps:$4 sm:$0xff]  }
 0x240   :  { %6862 = vmatprep.subr.bf16.mxu0 %v13604_v42  ;;  %v13595_v41 = vld [vmem:[%s17830_s3 + $0x7bc] ss:$28 sps:$4 sm:$0xff]  }
 0x241   :  { %v13680_v42 = vld [vmem:[#allocation7 + $0x5b0] ss:$52 sps:$4 sm:$0xff]  }
 0x242   :  { %2582 = vmatpush1.bf16.msra.mxu1 %v13551_v43  ;;  %v13688_v43 = vld [vmem:[#allocation7 + $0x61c] ss:$52 sps:$4 sm:$0xff]  }
 0x243   :  { %2583 = vmatprep.subr.bf16.mxu1 %v13556_v44  ;;  %6863 = vmatpush1.bf16.msra.mxu0 %v13602_v45  ;;  %v13593_v44 = vld [vmem:[%s17830_s3 + $0x7b8] ss:$28 sps:$4 sm:$0xff]  }
 0x244   :  { %6864 = vmatprep.subr.bf16.mxu0 %v13610_v39  ;;  %v13601_v45 = vld [vmem:[#allocation7 + $0xc] ss:$52 sps:$4 sm:$0xff]   ;;  %v13694_v39 = vld [vmem:[#allocation7 + $0x684] ss:$52 sps:$4 sm:$0xff]  }
 0x246   :  { %2584 = vmatpush1.bf16.msra.mxu1 %v13554_v46  ;;  %v13686_v46 = vld [vmem:[#allocation7 + $0x618] ss:$52 sps:$4 sm:$0xff]  }
 0x247   :  { %2585 = vmatprep.subr.bf16.mxu1 %v13559_v47  ;;  %6865 = vmatpush1.bf16.msra.mxu0 %v13608_v48  ;;  %v13599_v47 = vld [vmem:[#allocation7 + $0x8] ss:$52 sps:$4 sm:$0xff]  }
 0x248   :  { %6866 = vmatprep.subr.bf16.mxu0 %v13616_v50  ;;  %v13607_v48 = vld [vmem:[#allocation7 + $0x74] ss:$52 sps:$4 sm:$0xff]   ;;  %v13613_v50 = vld [vmem:[#allocation7 + $0xdc] ss:$52 sps:$4 sm:$0xff]  }
 0x24a   :  { %2586 = vmatpush1.bf16.msra.mxu1 %v13557_v49  ;;  %v13605_v49 = vld [vmem:[#allocation7 + $0x70] ss:$52 sps:$4 sm:$0xff]  }
 0x24b   :  { %2587 = vmatprep.subr.bf16.mxu1 %v13562_v51  ;;  %6867 = vmatpush1.bf16.msra.mxu0 %v13614_v55  ;;  %v13611_v51 = vld [vmem:[#allocation7 + $0xd8] ss:$52 sps:$4 sm:$0xff]  }
 0x24c   :  { %6868 = vmatprep.subr.bf16.mxu0 %v13622_v57  ;;  %v13619_v55 = vld [vmem:[#allocation7 + $0x144] ss:$52 sps:$4 sm:$0xff]   ;;  %v13625_v57 = vld [vmem:[#allocation7 + $0x1ac] ss:$52 sps:$4 sm:$0xff]  }
 0x24e   :  { %2588 = vmatpush1.bf16.msra.mxu1 %v13560_v56  ;;  %v13617_v56 = vld [vmem:[#allocation7 + $0x140] ss:$52 sps:$4 sm:$0xff]  }
 0x24f   :  { %2589 = vmatprep.subr.bf16.mxu1 %v13565_v58  ;;  %6869 = vmatpush1.bf16.msra.mxu0 %v13620_v59  ;;  %v13623_v58 = vld [vmem:[#allocation7 + $0x1a8] ss:$52 sps:$4 sm:$0xff]  }
 0x250   :  { %6870 = vmatprep.subr.bf16.mxu0 %v13628_v60  ;;  %v13631_v59 = vld [vmem:[#allocation7 + $0x214] ss:$52 sps:$4 sm:$0xff]   ;;  %v13629_v60 = vld [vmem:[#allocation7 + $0x210] ss:$52 sps:$4 sm:$0xff]  }
 0x252   :  { %2590 = vmatpush1.bf16.msra.mxu1 %v13563_v61  ;;  %v13637_v61 = vld [vmem:[#allocation7 + $0x27c] ss:$52 sps:$4 sm:$0xff]  }
 0x253   :  { %2591 = vmatprep.subr.bf16.mxu1 %v13568_v62  ;;  %6871 = vmatpush1.bf16.msra.mxu0 %v13626_v9  ;;  %v13643_v62 = vld [vmem:[#allocation7 + $0x2e4] ss:$52 sps:$4 sm:$0xff]   ;;  %v13641_v9 = vld [vmem:[#allocation7 + $0x2e0] ss:$52 sps:$4 sm:$0xff]  }
 0x254   :  { %6872 = vmatprep.subr.bf16.mxu0 %v13634_v63  ;;  %v13649_v63 = vld [vmem:[#allocation7 + $0x34c] ss:$52 sps:$4 sm:$0xff]  }
 0x256   :  { %2592 = vmatpush1.bf16.msra.mxu1 %v13566_v0  ;;  %v13647_v0 = vld [vmem:[#allocation7 + $0x348] ss:$52 sps:$4 sm:$0xff]  }
 0x257   :  { %2593 = vmatprep.subr.bf16.mxu1 %v13571_v1  ;;  %6873 = vmatpush1.bf16.msra.mxu0 %v13632_v2  ;;  %v13655_v1 = vld [vmem:[#allocation7 + $0x3b4] ss:$52 sps:$4 sm:$0xff]   ;;  %v13653_v2 = vld [vmem:[#allocation7 + $0x3b0] ss:$52 sps:$4 sm:$0xff]  }
 0x258   :  { %6874 = vmatprep.subr.bf16.mxu0 %v13640_v3  ;;  %v13661_v3 = vld [vmem:[#allocation7 + $0x41c] ss:$52 sps:$4 sm:$0xff]  }
 0x25a   :  { %2594 = vmatpush1.bf16.msra.mxu1 %v13569_v4  ;;  %v13659_v4 = vld [vmem:[#allocation7 + $0x418] ss:$52 sps:$4 sm:$0xff]  }
 0x25b   :  { %2595 = vmatprep.subr.bf16.mxu1 %v13574_v5  ;;  %6875 = vmatpush1.bf16.msra.mxu0 %v13638_v6  ;;  %v13667_v5 = vld [vmem:[#allocation7 + $0x484] ss:$52 sps:$4 sm:$0xff]   ;;  %v13665_v6 = vld [vmem:[#allocation7 + $0x480] ss:$52 sps:$4 sm:$0xff]  }
 0x25c   :  { %6876 = vmatprep.subr.bf16.mxu0 %v13646_v7  ;;  %v13673_v7 = vld [vmem:[#allocation7 + $0x4ec] ss:$52 sps:$4 sm:$0xff]  }
 0x25e   :  { %2596 = vmatpush1.bf16.msra.mxu1 %v13572_v13  ;;  %v13671_v13 = vld [vmem:[#allocation7 + $0x4e8] ss:$52 sps:$4 sm:$0xff]  }
 0x25f   :  { %2597 = vmatprep.subr.bf16.mxu1 %v13577_v14  ;;  %6877 = vmatpush1.bf16.msra.mxu0 %v13644_v15  ;;  %v13679_v14 = vld [vmem:[#allocation7 + $0x554] ss:$52 sps:$4 sm:$0xff]   ;;  %v13677_v15 = vld [vmem:[#allocation7 + $0x550] ss:$52 sps:$4 sm:$0xff]  }
 0x260   :  { %6878 = vmatprep.subr.bf16.mxu0 %v13652_v16  ;;  %v13685_v16 = vld [vmem:[#allocation7 + $0x5bc] ss:$52 sps:$4 sm:$0xff]  }
 0x262   :  { %2598 = vmatpush1.bf16.msra.mxu1 %v13575_v17  ;;  %v13683_v17 = vld [vmem:[#allocation7 + $0x5b8] ss:$52 sps:$4 sm:$0xff]  }
 0x263   :  { %2599 = vmatprep.subr.bf16.mxu1 %v13580_v18  ;;  %6879 = vmatpush1.bf16.msra.mxu0 %v13650_v19  ;;  %v13691_v18 = vld [vmem:[#allocation7 + $0x624] ss:$52 sps:$4 sm:$0xff]   ;;  %v13689_v19 = vld [vmem:[#allocation7 + $0x620] ss:$52 sps:$4 sm:$0xff]  }
 0x264   :  { %6880 = vmatprep.subr.bf16.mxu0 %v13658_v21  ;;  %v16425_v21 = vld [vmem:[#allocation6] sm:$0x7f] }
 0x266   :  { %2600 = vmatpush1.bf16.msra.mxu1 %v13578_v20  ;;  %v13697_v20 = vld [vmem:[#allocation7 + $0x68c] ss:$52 sps:$4 sm:$0xff]  }
 0x267   :  { %2601 = vmatprep.subr.bf16.mxu1 %v13583_v22  ;;  %6881 = vmatpush1.bf16.msra.mxu0 %v13656_v23  ;;  %v952_v22 = vrot.slane %v16425_v21, %v15794_v10  ;;  %v956_v23 = vrot.slane %v16425_v21, %v15797_v11 }
 0x268   :  { %6882 = vmatprep.subr.bf16.mxu0 %v13664_v24  ;;  %v964_v24 = vrot.slane %v16425_v21, %v15830_v30 }
 0x26a   :  { %2602 = vmatpush1.bf16.msra.mxu1 %v13581_v27 }
 0x26b   :  { %2612 = vmatprep.subr.bf16.mxu1 %v13586_v28  ;;  %6883 = vmatpush1.bf16.msra.mxu0 %v13662_v29 }
 0x26c   :  { %6884 = vmatprep.subr.bf16.mxu0 %v13670_v25 }
 0x26d   :  { %2604 = vmatmul.mubr.bf16.vlgmr.msra.gmra.mrb[8].mxu1 %v16028_v52  ;;  %v13590_v52 = vld [vmem:[%s17830_s3 + $0x780] ss:$28 sps:$4 sm:$0xff]  }
 0x26e   :  { %2613 = vmatpush1.bf16.msra.mxu1 %v13584_v32  ;;  %2644 = vmatprep.mubr.bf16.mxu1 %v15380_v35 }
 0x26f   :  { %2614 = vmatprep.subr.bf16.mxu1 %v13589_v53  ;;  %6885 = vmatpush1.bf16.msra.mxu0 %v13668_v33 }
 0x270   :  { %6886 = vmatprep.subr.bf16.mxu0 %v13676_v34 }
 0x272   :  { %2615 = vmatpush1.bf16.msra.mxu1 %v13587_v36 }
 0x273   :  { %2616 = vmatprep.subr.bf16.mxu1 %v13592_v37  ;;  %6887 = vmatpush1.bf16.msra.mxu0 %v13674_v38 }
 0x274   :  { %6888 = vmatprep.subr.bf16.mxu0 %v13682_v40 }
 0x276   :  { %2617 = vmatpush1.bf16.msra.mxu1 %v13590_v52 }
 0x277   :  { %2618 = vmatprep.subr.bf16.mxu1 %v13595_v41  ;;  %6889 = vmatpush1.bf16.msra.mxu0 %v13680_v42  ;;  %v13692_v41 = vld [vmem:[#allocation7 + $0x680] ss:$52 sps:$4 sm:$0xff]   ;;  %v13695_v42 = vld [vmem:[#allocation7 + $0x688] ss:$52 sps:$4 sm:$0xff]  }
 0x278   :  { %6890 = vmatprep.subr.bf16.mxu0 %v13688_v43 }
 0x27a   :  { %2619 = vmatpush1.bf16.msra.mxu1 %v13593_v44 }
 0x27b   :  { %7024 = vmatprep.subr.bf16.mxu1 %v13601_v45  ;;  %6891 = vmatpush1.bf16.msra.mxu0 %v13686_v46  ;;  %v13700_v45 = vld [vmem:[#allocation7 + $0x6ec] ss:$52 sps:$4 sm:$0xff]   ;;  %v13703_v46 = vld [vmem:[#allocation7 + $0x6f4] ss:$52 sps:$4 sm:$0xff]  }
 0x27c   :  { %6901 = vmatprep.subr.bf16.mxu0 %v13694_v39 }
 0x27d   :  { %11702 = vmatmul.mubr.msk.bf16.vlgmr.msra.gmra.mrb[8].mxu1 %vm2280_vm2, %v16085_v12  ;;  %v13635_v12 = vld [vmem:[#allocation7 + $0x278] ss:$52 sps:$4 sm:$0xff]  }
 0x27e   :  { %7025 = vmatpush1.bf16.msra.mxu1 %v13599_v47  ;;  %v13698_v47 = vld [vmem:[#allocation7 + $0x6e8] ss:$52 sps:$4 sm:$0xff]  }
 0x27f   :  { %7026 = vmatprep.subr.bf16.mxu1 %v13607_v48  ;;  %v13701_v48 = vld [vmem:[#allocation7 + $0x6f0] ss:$52 sps:$4 sm:$0xff]  }
 0x282   :  { %7027 = vmatpush1.bf16.msra.mxu1 %v13605_v49 }
 0x283   :  { %7028 = vmatprep.subr.bf16.mxu1 %v13613_v50  ;;  %v13706_v50 = vld [vmem:[#allocation7 + $0x754] ss:$52 sps:$4 sm:$0xff]  }
 0x286   :  { %7029 = vmatpush1.bf16.msra.mxu1 %v13611_v51  ;;  %v13709_v51 = vld [vmem:[#allocation7 + $0x75c] ss:$52 sps:$4 sm:$0xff]  }
 0x287   :  { %7030 = vmatprep.subr.bf16.mxu1 %v13619_v55  ;;  %v13704_v55 = vld [vmem:[#allocation7 + $0x750] ss:$52 sps:$4 sm:$0xff]  }
 0x28a   :  { %7031 = vmatpush1.bf16.msra.mxu1 %v13617_v56  ;;  %v13707_v56 = vld [vmem:[#allocation7 + $0x758] ss:$52 sps:$4 sm:$0xff]  }
 0x28b   :  { %7032 = vmatprep.subr.bf16.mxu1 %v13625_v57  ;;  %v13712_v57 = vld [vmem:[#allocation7 + $0x7bc] ss:$52 sps:$4 sm:$0xff]  }
 0x28e   :  { %7033 = vmatpush1.bf16.msra.mxu1 %v13623_v58  ;;  %v13715_v58 = vld [vmem:[#allocation7 + $0x7c4] ss:$52 sps:$4 sm:$0xff]  }
 0x28f   :  { %7034 = vmatprep.subr.bf16.mxu1 %v13631_v59  ;;  %v13710_v59 = vld [vmem:[#allocation7 + $0x7b8] ss:$52 sps:$4 sm:$0xff]  }
 0x292   :  { %7035 = vmatpush1.bf16.msra.mxu1 %v13629_v60  ;;  %v13713_v60 = vld [vmem:[#allocation7 + $0x7c0] ss:$52 sps:$4 sm:$0xff]  }
 0x293   :  { %7036 = vmatprep.subr.bf16.mxu1 %v13637_v61  ;;  %v13718_v61 = vld [vmem:[#allocation7 + $0x824] ss:$52 sps:$4 sm:$0xff]  }
 0x296   :  { %7037 = vmatpush1.bf16.msra.mxu1 %v13635_v12  ;;  %v13721_v12 = vld [vmem:[#allocation7 + $0x82c] ss:$52 sps:$4 sm:$0xff]  }
 0x297   :  { %7038 = vmatprep.subr.bf16.mxu1 %v13643_v62  ;;  %v13716_v62 = vld [vmem:[#allocation7 + $0x820] ss:$52 sps:$4 sm:$0xff]  }
 0x29a   :  { %7039 = vmatpush1.bf16.msra.mxu1 %v13641_v9  ;;  %v13719_v9 = vld [vmem:[#allocation7 + $0x828] ss:$52 sps:$4 sm:$0xff]  }
 0x29b   :  { %7040 = vmatprep.subr.bf16.mxu1 %v13649_v63  ;;  %v13724_v63 = vld [vmem:[#allocation7 + $0x88c] ss:$52 sps:$4 sm:$0xff]  }
 0x29e   :  { %7041 = vmatpush1.bf16.msra.mxu1 %v13647_v0  ;;  %v13727_v0 = vld [vmem:[#allocation7 + $0x894] ss:$52 sps:$4 sm:$0xff]  }
 0x29f   :  { %7042 = vmatprep.subr.bf16.mxu1 %v13655_v1  ;;  %v13722_v1 = vld [vmem:[#allocation7 + $0x888] ss:$52 sps:$4 sm:$0xff]  }
 0x2a2   :  { %7043 = vmatpush1.bf16.msra.mxu1 %v13653_v2  ;;  %v13725_v2 = vld [vmem:[#allocation7 + $0x890] ss:$52 sps:$4 sm:$0xff]  }
 0x2a3   :  { %7044 = vmatprep.subr.bf16.mxu1 %v13661_v3  ;;  %v13730_v3 = vld [vmem:[#allocation7 + $0x8f4] ss:$52 sps:$4 sm:$0xff]  }
 0x2a6   :  { %7045 = vmatpush1.bf16.msra.mxu1 %v13659_v4  ;;  %v13733_v4 = vld [vmem:[#allocation7 + $0x8fc] ss:$52 sps:$4 sm:$0xff]  }
 0x2a7   :  { %7046 = vmatprep.subr.bf16.mxu1 %v13667_v5  ;;  %v13728_v5 = vld [vmem:[#allocation7 + $0x8f0] ss:$52 sps:$4 sm:$0xff]  }
 0x2aa   :  { %7047 = vmatpush1.bf16.msra.mxu1 %v13665_v6  ;;  %v13731_v6 = vld [vmem:[#allocation7 + $0x8f8] ss:$52 sps:$4 sm:$0xff]  }
 0x2ab   :  { %7048 = vmatprep.subr.bf16.mxu1 %v13673_v7  ;;  %v13736_v7 = vld [vmem:[#allocation7 + $0x95c] ss:$52 sps:$4 sm:$0xff]  }
 0x2ae   :  { %7049 = vmatpush1.bf16.msra.mxu1 %v13671_v13  ;;  %v13739_v13 = vld [vmem:[#allocation7 + $0x964] ss:$52 sps:$4 sm:$0xff]  }
 0x2af   :  { %7050 = vmatprep.subr.bf16.mxu1 %v13679_v14  ;;  %v13734_v14 = vld [vmem:[#allocation7 + $0x958] ss:$52 sps:$4 sm:$0xff]  }
 0x2b2   :  { %7051 = vmatpush1.bf16.msra.mxu1 %v13677_v15  ;;  %v13737_v15 = vld [vmem:[#allocation7 + $0x960] ss:$52 sps:$4 sm:$0xff]  }
 0x2b3   :  { %7052 = vmatprep.subr.bf16.mxu1 %v13685_v16 }
 0x2b6   :  { %7053 = vmatpush1.bf16.msra.mxu1 %v13683_v17  ;;  %v13742_v17 = vld [vmem:[#allocation7 + $0x9c4] ss:$52 sps:$4 sm:$0xff]  }
 0x2b7   :  { %7054 = vmatprep.subr.bf16.mxu1 %v13691_v18  ;;  %v13745_v18 = vld [vmem:[#allocation7 + $0x9cc] ss:$52 sps:$4 sm:$0xff]  }
 0x2ba   :  { %7055 = vmatpush1.bf16.msra.mxu1 %v13689_v19 }
 0x2bb   :  { %7065 = vmatprep.subr.bf16.mxu1 %v13697_v20 }
 0x2c0   :  { %v2400_v27 = vpop.f32.mrb[4].mxu1  ;;  %v16433_v28 = vpop.f32.mrb[8].mxu0 }
 0x2c1   :  { %v12978_v29 = vadd.f32 %v2400_v27, %v952_v22  ;;  %v2402_v25 = vpop.f32.mrb[5].mxu1  ;;  %v2525_v32 = vpop.f32.mrb[9].mxu0  ;;  %v13743_v27 = vld [vmem:[#allocation7 + $0x9c8] ss:$52 sps:$4 sm:$0xff]  }
 0x2c2   :  { %v12979_v53 = vadd.f32 %v2402_v25, %v956_v23  ;;  %v12981_v33 = vadd.f32 %v2525_v32, %v964_v24  ;;  %v2404_v34 = vpop.f32.mrb[6].mxu1  ;;  %v2527_v36 = vpop.f32.mrb[10].mxu0  ;;  %v13740_v24 = vld [vmem:[#allocation7 + $0x9c0] ss:$52 sps:$4 sm:$0xff]   ;;  %v13746_v32 = vld [vmem:[#allocation7 + $0xa28] ss:$52 sps:$4 sm:$0xff]  }
 0x2c3   :  { %v2773_v37 = vmax.f32 %v12978_v29, 0.0  ;;  %v2405_v38 = vpop.f32.mrb[7].mxu1  ;;  %v2528_v40 = vpop.f32.mrb[11].mxu0  ;;  %v13748_v29 = vld [vmem:[#allocation7 + $0xa2c] ss:$52 sps:$4 sm:$0xff]  }
 0x2c4   :  { %v2774_v52 = vmax.f32 %v12979_v53, 0.0  ;;  %v2776_v43 = vmax.f32 %v12981_v33, 0.0  ;;  %v13751_v25 = vld [vmem:[#allocation7 + $0xa34] ss:$52 sps:$4 sm:$0xff]   ;;  %v13749_v53 = vld [vmem:[#allocation7 + $0xa30] ss:$52 sps:$4 sm:$0xff]  }
 0x2c5   :  { %v16437_v39 = vpack.c.bf16 %v2773_v37, %v2773_v37  ;;  %v13754_v33 = vld [vmem:[#allocation7 + $0xa94] ss:$52 sps:$4 sm:$0xff]   ;;  %v13757_v34 = vld [vmem:[#allocation7 + $0xa9c] ss:$52 sps:$4 sm:$0xff]   ;;  %v13755_v37 = vld [vmem:[#allocation7 + $0xa98] ss:$52 sps:$4 sm:$0xff]  }
 0x2c6   :  { %v16435_v44 = vpack.c.bf16 %v2774_v52, %v2774_v52  ;;  %v16441_v49 = vpack.c.bf16 %v2776_v43, %v2776_v43  ;;  %v13752_v36 = vld [vmem:[#allocation7 + $0xa90] ss:$52 sps:$4 sm:$0xff]   ;;  %v13758_v52 = vld [vmem:[#allocation7 + $0xaf8] ss:$52 sps:$4 sm:$0xff]  }
 0x2c7   :  { %v13760_v38 = vld [vmem:[#allocation7 + $0xafc] ss:$52 sps:$4 sm:$0xff]   ;;  %v13763_v40 = vld [vmem:[#allocation7 + $0xb04] ss:$52 sps:$4 sm:$0xff]   ;;  %v13769_v43 = vld [vmem:[#allocation7 + $0xb6c] ss:$52 sps:$4 sm:$0xff]  }
 0x2c8   :  { %6892 = vmatprep.mubr.bf16.mxu0 %v16435_v44  ;;  %7056 = vmatprep.mubr.bf16.mxu1 %v16435_v44 }
 0x2c9   :  { %6893 = vmatmul.mubr.bf16.vlgmr.msra.gmra.mrb[24].mxu0 %v16437_v39  ;;  %7057 = vmatmul.mubr.bf16.vlgmr.msra.gmra.mrb[12].mxu1 %v16437_v39 }
 0x2ca   :  { %6902 = vmatpush1.bf16.msra.mxu0 %v13692_v41  ;;  %7066 = vmatpush1.bf16.msra.mxu1 %v13695_v42  ;;  %v13761_v41 = vld [vmem:[#allocation7 + $0xb00] ss:$52 sps:$4 sm:$0xff]   ;;  %v13766_v42 = vld [vmem:[#allocation7 + $0xb64] ss:$52 sps:$4 sm:$0xff]  }
 0x2cb   :  { %6933 = vmatprep.mubr.bf16.mxu0 %v16441_v49  ;;  %7097 = vmatprep.mubr.bf16.mxu1 %v16441_v49 }
 0x2cc   :  { %6903 = vmatprep.subr.bf16.mxu0 %v13700_v45  ;;  %7067 = vmatprep.subr.bf16.mxu1 %v13703_v46  ;;  %v13764_v45 = vld [vmem:[#allocation7 + $0xb60] ss:$52 sps:$4 sm:$0xff]   ;;  %v13767_v46 = vld [vmem:[#allocation7 + $0xb68] ss:$52 sps:$4 sm:$0xff]  }
 0x2ce   :  { %6904 = vmatpush1.bf16.msra.mxu0 %v13698_v47  ;;  %7068 = vmatpush1.bf16.msra.mxu1 %v13701_v48  ;;  %v13772_v47 = vld [vmem:[#allocation7 + $0xbcc] ss:$52 sps:$4 sm:$0xff]   ;;  %v13775_v48 = vld [vmem:[#allocation7 + $0xbd4] ss:$52 sps:$4 sm:$0xff]  }
 0x2cf   :  { %6905 = vmatprep.subr.bf16.mxu0 %v13706_v50  ;;  %7069 = vmatprep.subr.bf16.mxu1 %v13709_v51  ;;  %v13770_v50 = vld [vmem:[#allocation7 + $0xbc8] ss:$52 sps:$4 sm:$0xff]   ;;  %v13773_v51 = vld [vmem:[#allocation7 + $0xbd0] ss:$52 sps:$4 sm:$0xff]  }
 0x2d2   :  { %6906 = vmatpush1.bf16.msra.mxu0 %v13704_v55  ;;  %7070 = vmatpush1.bf16.msra.mxu1 %v13707_v56  ;;  %v960_v55 = vrot.slane %v16425_v21, %v15975_v31  ;;  %v975_v56 = vsub.s32 6, %v15789_v8 }
 0x2d3   :  { %6907 = vmatprep.subr.bf16.mxu0 %v13712_v57  ;;  %7071 = vmatprep.subr.bf16.mxu1 %v13715_v58  ;;  %v13778_v57 = vld [vmem:[#allocation7 + $0xc34] ss:$52 sps:$4 sm:$0xff]   ;;  %v13781_v58 = vld [vmem:[#allocation7 + $0xc3c] ss:$52 sps:$4 sm:$0xff]  }
 0x2d6   :  { %6908 = vmatpush1.bf16.msra.mxu0 %v13710_v59  ;;  %7072 = vmatpush1.bf16.msra.mxu1 %v13713_v60  ;;  %v13776_v59 = vld [vmem:[#allocation7 + $0xc30] ss:$52 sps:$4 sm:$0xff]   ;;  %v13779_v60 = vld [vmem:[#allocation7 + $0xc38] ss:$52 sps:$4 sm:$0xff]  }
 0x2d7   :  { %6909 = vmatprep.subr.bf16.mxu0 %v13718_v61  ;;  %7073 = vmatprep.subr.bf16.mxu1 %v13721_v12  ;;  %v12980_v61 = vadd.f32 %v16433_v28, %v960_v55  ;;  %v976_v12 = vrot.slane %v16425_v21, %v975_v56  ;;  %v13827_v55 = vld [vmem:[#allocation7 + $0xf78] ss:$52 sps:$4 sm:$0xff]  }
 0x2da   :  { %6910 = vmatpush1.bf16.msra.mxu0 %v13716_v62  ;;  %7074 = vmatpush1.bf16.msra.mxu1 %v13719_v9  ;;  %v13784_v62 = vld [vmem:[#allocation7 + $0xc9c] ss:$52 sps:$4 sm:$0xff]   ;;  %v13787_v9 = vld [vmem:[#allocation7 + $0xca4] ss:$52 sps:$4 sm:$0xff]  }
 0x2db   :  { %6911 = vmatprep.subr.bf16.mxu0 %v13724_v63  ;;  %7075 = vmatprep.subr.bf16.mxu1 %v13727_v0  ;;  %v13782_v63 = vld [vmem:[#allocation7 + $0xc98] ss:$52 sps:$4 sm:$0xff]  }
 0x2de   :  { %6912 = vmatpush1.bf16.msra.mxu0 %v13722_v1  ;;  %7076 = vmatpush1.bf16.msra.mxu1 %v13725_v2  ;;  %v13785_v2 = vld [vmem:[#allocation7 + $0xca0] ss:$52 sps:$4 sm:$0xff]  }
 0x2df   :  { %6913 = vmatprep.subr.bf16.mxu0 %v13730_v3  ;;  %7077 = vmatprep.subr.bf16.mxu1 %v13733_v4  ;;  %v13790_v3 = vld [vmem:[#allocation7 + $0xd04] ss:$52 sps:$4 sm:$0xff]   ;;  %v2775_v4 = vmax.f32 %v12980_v61, 0.0 }
 0x2e0   :  { %v13838_v61 = vld [vmem:[#allocation7 + $0x1044] ss:$52 sps:$4 sm:$0xff]  }
 0x2e1   :  { %v12812_v16 = vpop.f32.mrb[12].mxu0 }
 0x2e2   :  { %v12813_v19 = vpop.f32.mrb[13].mxu0  ;;  %6914 = vmatpush1.bf16.msra.mxu0 %v13728_v5  ;;  %7078 = vmatpush1.bf16.msra.mxu1 %v13731_v6 }
 0x2e3   :  { %v16447_v20 = vadd.f32 %v12813_v19, %v12812_v16  ;;  %v12815_v22 = vpop.f32.mrb[14].mxu0  ;;  %6915 = vmatprep.subr.bf16.mxu0 %v13736_v7  ;;  %7079 = vmatprep.subr.bf16.mxu1 %v13739_v13  ;;  %v13793_v7 = vld [vmem:[#allocation7 + $0xd0c] ss:$52 sps:$4 sm:$0xff]   ;;  %v16457_v16 = vpack.c.bf16 %v2775_v4, %v2775_v4  ;;  %v13794_v19 = vld [vmem:[#allocation7 + $0xd68] ss:$52 sps:$4 sm:$0xff]  }
 0x2e4   :  { %v12816_v23 = vpop.f32.mrb[15].mxu0  ;;  %v13802_v22 = vld [vmem:[#allocation7 + $0xdd4] ss:$52 sps:$4 sm:$0xff]   ;;  %v13853_v4 = vld [vmem:[#allocation7 + $0x111c] ss:$52 sps:$4 sm:$0xff]  }
 0x2e5   :  { %v2688_v5 = vadd.f32 %v16447_v20, %v976_v12  ;;  %v13797_v20 = vld [vmem:[#allocation7 + $0xd70] ss:$52 sps:$4 sm:$0xff]   ;;  %v13841_v12 = vld [vmem:[#allocation7 + $0x104c] ss:$52 sps:$4 sm:$0xff]  }
 0x2e6   :  { %6916 = vmatpush1.bf16.msra.mxu0 %v13734_v14  ;;  %7080 = vmatpush1.bf16.msra.mxu1 %v13737_v15  ;;  %v13788_v14 = vld [vmem:[#allocation7 + $0xd00] ss:$52 sps:$4 sm:$0xff]   ;;  %v13791_v15 = vld [vmem:[#allocation7 + $0xd08] ss:$52 sps:$4 sm:$0xff]  }
 0x2e7   :  { %6917 = vmatprep.subr.bf16.mxu0 %v13742_v17  ;;  %7081 = vmatprep.subr.bf16.mxu1 %v13745_v18  ;;  %v13796_v17 = vld [vmem:[#allocation7 + $0xd6c] ss:$52 sps:$4 sm:$0xff]   ;;  %v13799_v18 = vld [vmem:[#allocation7 + $0xd74] ss:$52 sps:$4 sm:$0xff]   ;;  %v13805_v23 = vld [vmem:[#allocation7 + $0xddc] ss:$52 sps:$4 sm:$0xff]  }
 0x2ea   :  { %6918 = vmatpush1.bf16.msra.mxu0 %v13740_v24  ;;  %7082 = vmatpush1.bf16.msra.mxu1 %v13743_v27  ;;  %v13800_v24 = vld [vmem:[#allocation7 + $0xdd0] ss:$52 sps:$4 sm:$0xff]   ;;  %v13803_v27 = vld [vmem:[#allocation7 + $0xdd8] ss:$52 sps:$4 sm:$0xff]  }
 0x2eb   :  { %6919 = vmatprep.subr.bf16.mxu0 %v13748_v29  ;;  %7083 = vmatprep.subr.bf16.mxu1 %v13751_v25  ;;  %v13808_v29 = vld [vmem:[#allocation7 + $0xe3c] ss:$52 sps:$4 sm:$0xff]   ;;  %v13811_v25 = vld [vmem:[#allocation7 + $0xe44] ss:$52 sps:$4 sm:$0xff]  }
 0x2ee   :  { %6920 = vmatpush1.bf16.msra.mxu0 %v13746_v32  ;;  %7084 = vmatpush1.bf16.msra.mxu1 %v13749_v53 }
 0x2ef   :  { %6921 = vmatprep.subr.bf16.mxu0 %v13754_v33  ;;  %7085 = vmatprep.subr.bf16.mxu1 %v13757_v34  ;;  %v13806_v34 = vld [vmem:[#allocation7 + $0xe38] ss:$52 sps:$4 sm:$0xff]  }
 0x2f2   :  { %6922 = vmatpush1.bf16.msra.mxu0 %v13752_v36  ;;  %7086 = vmatpush1.bf16.msra.mxu1 %v13755_v37  ;;  %v13809_v36 = vld [vmem:[#allocation7 + $0xe40] ss:$52 sps:$4 sm:$0xff]  }
 0x2f3   :  { %6923 = vmatprep.subr.bf16.mxu0 %v13760_v38  ;;  %7087 = vmatprep.subr.bf16.mxu1 %v13763_v40  ;;  %v13814_v38 = vld [vmem:[#allocation7 + $0xea4] ss:$52 sps:$4 sm:$0xff]   ;;  %v13817_v40 = vld [vmem:[#allocation7 + $0xeac] ss:$52 sps:$4 sm:$0xff]  }
 0x2f6   :  { %6924 = vmatpush1.bf16.msra.mxu0 %v13758_v52  ;;  %7088 = vmatpush1.bf16.msra.mxu1 %v13761_v41  ;;  %v13812_v41 = vld [vmem:[#allocation7 + $0xea0] ss:$52 sps:$4 sm:$0xff]  }
 0x2f7   :  { %6925 = vmatprep.subr.bf16.mxu0 %v13766_v42  ;;  %7089 = vmatprep.subr.bf16.mxu1 %v13769_v43  ;;  %v13815_v42 = vld [vmem:[#allocation7 + $0xea8] ss:$52 sps:$4 sm:$0xff]   ;;  %v13820_v43 = vld [vmem:[#allocation7 + $0xf0c] ss:$52 sps:$4 sm:$0xff]  }
 0x2fa   :  { %6926 = vmatpush1.bf16.msra.mxu0 %v13764_v45  ;;  %7090 = vmatpush1.bf16.msra.mxu1 %v13767_v46  ;;  %v13823_v45 = vld [vmem:[#allocation7 + $0xf14] ss:$52 sps:$4 sm:$0xff]  }
 0x2fb   :  { %6927 = vmatprep.subr.bf16.mxu0 %v13772_v47  ;;  %7091 = vmatprep.subr.bf16.mxu1 %v13775_v48  ;;  %v13818_v46 = vld [vmem:[#allocation7 + $0xf08] ss:$52 sps:$4 sm:$0xff]   ;;  %v13821_v47 = vld [vmem:[#allocation7 + $0xf10] ss:$52 sps:$4 sm:$0xff]  }
 0x2fc   :  { %v13826_v48 = vld [vmem:[#allocation7 + $0xf74] ss:$52 sps:$4 sm:$0xff]  }
 0x2fe   :  { %6928 = vmatpush1.bf16.msra.mxu0 %v13770_v50  ;;  %7092 = vmatpush1.bf16.msra.mxu1 %v13773_v51  ;;  %v13829_v50 = vld [vmem:[#allocation7 + $0xf7c] ss:$52 sps:$4 sm:$0xff]  }
 0x2ff   :  { %6929 = vmatprep.subr.bf16.mxu0 %v13778_v57  ;;  %7093 = vmatprep.subr.bf16.mxu1 %v13781_v58  ;;  %v13824_v51 = vld [vmem:[#allocation7 + $0xf70] ss:$52 sps:$4 sm:$0xff]  }
 0x300   :  { %v13832_v57 = vld [vmem:[#allocation7 + $0xfdc] ss:$52 sps:$4 sm:$0xff]   ;;  %v13835_v58 = vld [vmem:[#allocation7 + $0xfe4] ss:$52 sps:$4 sm:$0xff]  }
 0x301   :  { %v12834_v0 = vpop.f32.mrb[16].mxu0 }
 0x302   :  { %v12835_v1 = vpop.f32.mrb[17].mxu0  ;;  %6930 = vmatpush1.bf16.msra.mxu0 %v13776_v59  ;;  %7094 = vmatpush1.bf16.msra.mxu1 %v13779_v60  ;;  %v13830_v59 = vld [vmem:[#allocation7 + $0xfd8] ss:$52 sps:$4 sm:$0xff]   ;;  %v13833_v60 = vld [vmem:[#allocation7 + $0xfe0] ss:$52 sps:$4 sm:$0xff]  }
 0x303   :  { %v12836_v6 = vadd.f32 %v12835_v1, %v12834_v0  ;;  %v12837_v28 = vpop.f32.mrb[18].mxu0  ;;  %6931 = vmatprep.subr.bf16.mxu0 %v13784_v62  ;;  %7095 = vmatprep.subr.bf16.mxu1 %v13787_v9  ;;  %v13836_v62 = vld [vmem:[#allocation7 + $0x1040] ss:$52 sps:$4 sm:$0xff]   ;;  %v13839_v9 = vld [vmem:[#allocation7 + $0x1048] ss:$52 sps:$4 sm:$0xff]  }
 0x304   :  { %v12838_v21 = vpop.f32.mrb[19].mxu0  ;;  %v13847_v0 = vld [vmem:[#allocation7 + $0x10b4] ss:$52 sps:$4 sm:$0xff]   ;;  %v13856_v28 = vld [vmem:[#allocation7 + $0x117c] ss:$52 sps:$4 sm:$0xff]  }
 0x305   :  { %v2728_v13 = vadd.f32 %v12836_v6, %v2688_v5  ;;  %v13842_v1 = vld [vmem:[#allocation7 + $0x10a8] ss:$52 sps:$4 sm:$0xff]   ;;  %v13848_v5 = vld [vmem:[#allocation7 + $0x1110] ss:$52 sps:$4 sm:$0xff]   ;;  %v13851_v6 = vld [vmem:[#allocation7 + $0x1118] ss:$52 sps:$4 sm:$0xff]  }
 0x306   :  { %6932 = vmatpush1.bf16.msra.mxu0 %v13782_v63  ;;  %7096 = vmatpush1.bf16.msra.mxu1 %v13785_v2  ;;  %v13844_v63 = vld [vmem:[#allocation7 + $0x10ac] ss:$52 sps:$4 sm:$0xff]   ;;  %v13845_v2 = vld [vmem:[#allocation7 + $0x10b0] ss:$52 sps:$4 sm:$0xff]  }
 0x307   :  { %6942 = vmatprep.subr.bf16.mxu0 %v13790_v3  ;;  %7106 = vmatprep.subr.bf16.mxu1 %v13793_v7  ;;  %v13850_v3 = vld [vmem:[#allocation7 + $0x1114] ss:$52 sps:$4 sm:$0xff]   ;;  %v13859_v7 = vld [vmem:[#allocation7 + $0x1184] ss:$52 sps:$4 sm:$0xff]  }
 0x308   :  { %v13854_v21 = vld [vmem:[#allocation7 + $0x1178] ss:$52 sps:$4 sm:$0xff]  }
 0x309   :  { %6934 = vmatmul.mubr.bf16.vlgmr.msra.gmra.mrb[24].mxu0 %v16457_v16  ;;  %7098 = vmatmul.mubr.bf16.vlgmr.msra.gmra.mrb[12].mxu1 %v16457_v16 }
 0x30a   :  { %6943 = vmatpush1.bf16.msra.mxu0 %v13788_v14  ;;  %7107 = vmatpush1.bf16.msra.mxu1 %v13791_v15  ;;  %v13862_v14 = vld [vmem:[#allocation7 + $0x11e4] ss:$52 sps:$4 sm:$0xff]   ;;  %v13865_v15 = vld [vmem:[#allocation7 + $0x11ec] ss:$52 sps:$4 sm:$0xff]  }
 0x30b   :  { %6944 = vmatprep.subr.bf16.mxu0 %v13796_v17  ;;  %7108 = vmatprep.subr.bf16.mxu1 %v13799_v18  ;;  %v13860_v17 = vld [vmem:[#allocation7 + $0x11e0] ss:$52 sps:$4 sm:$0xff]   ;;  %v13863_v18 = vld [vmem:[#allocation7 + $0x11e8] ss:$52 sps:$4 sm:$0xff]  }
 0x30e   :  { %6945 = vmatpush1.bf16.msra.mxu0 %v13794_v19  ;;  %7109 = vmatpush1.bf16.msra.mxu1 %v13797_v20  ;;  %v13868_v19 = vld [vmem:[#allocation7 + $0x124c] ss:$52 sps:$4 sm:$0xff]   ;;  %v13871_v20 = vld [vmem:[#allocation7 + $0x1254] ss:$52 sps:$4 sm:$0xff]  }
 0x30f   :  { %6946 = vmatprep.subr.bf16.mxu0 %v13802_v22  ;;  %7110 = vmatprep.subr.bf16.mxu1 %v13805_v23  ;;  %v13866_v22 = vld [vmem:[#allocation7 + $0x1248] ss:$52 sps:$4 sm:$0xff]   ;;  %v13869_v23 = vld [vmem:[#allocation7 + $0x1250] ss:$52 sps:$4 sm:$0xff]  }
 0x311   :  { %v2767_v32 = vpop.f32.mrb[20].mxu0 }
 0x312   :  { %v16461_v53 = vadd.f32 %v2767_v32, %v2728_v13  ;;  %v12968_v33 = vpop.f32.mrb[21].mxu0  ;;  %6947 = vmatpush1.bf16.msra.mxu0 %v13800_v24  ;;  %7111 = vmatpush1.bf16.msra.mxu1 %v13803_v27  ;;  %v13857_v13 = vld [vmem:[#allocation7 + $0x1180] ss:$52 sps:$4 sm:$0xff]   ;;  %v13877_v27 = vld [vmem:[#allocation7 + $0x12bc] ss:$52 sps:$4 sm:$0xff]  }
 0x313   :  { %v2770_v37 = vpop.f32.mrb[22].mxu0  ;;  %6948 = vmatprep.subr.bf16.mxu0 %v13808_v29  ;;  %7112 = vmatprep.subr.bf16.mxu1 %v13811_v25  ;;  %v13874_v24 = vld [vmem:[#allocation7 + $0x12b4] ss:$52 sps:$4 sm:$0xff]   ;;  %v13872_v29 = vld [vmem:[#allocation7 + $0x12b0] ss:$52 sps:$4 sm:$0xff]  }
 0x314   :  { %v12969_v52 = vpop.f32.mrb[23].mxu0  ;;  %v13875_v25 = vld [vmem:[#allocation7 + $0x12b8] ss:$52 sps:$4 sm:$0xff]   ;;  %v13880_v32 = vld [vmem:[#allocation7 + $0x131c] ss:$52 sps:$4 sm:$0xff]  }
 0x315   :  { %v13883_v33 = vld [vmem:[#allocation7 + $0x1324] ss:$52 sps:$4 sm:$0xff]  }
 0x316   :  { %6949 = vmatpush1.bf16.msra.mxu0 %v13806_v34  ;;  %7113 = vmatpush1.bf16.msra.mxu1 %v13809_v36  ;;  %v13878_v34 = vld [vmem:[#allocation7 + $0x1318] ss:$52 sps:$4 sm:$0xff]   ;;  %v13881_v36 = vld [vmem:[#allocation7 + $0x1320] ss:$52 sps:$4 sm:$0xff]  }
 0x317   :  { %6950 = vmatprep.subr.bf16.mxu0 %v13814_v38  ;;  %7114 = vmatprep.subr.bf16.mxu1 %v13817_v40  ;;  %v13886_v37 = vld [vmem:[#allocation7 + $0x1384] ss:$52 sps:$4 sm:$0xff]   ;;  %v13889_v38 = vld [vmem:[#allocation7 + $0x138c] ss:$52 sps:$4 sm:$0xff]   ;;  %v971_v40 = vsub.s32 5, %v15789_v8 }
 0x318   :  { %v15178_v52 = vld [vmem:[#allocation6] sm:$0x7f] }
 0x31a   :  { %6951 = vmatpush1.bf16.msra.mxu0 %v13812_v41  ;;  %7115 = vmatpush1.bf16.msra.mxu1 %v13815_v42  ;;  %v968_v41 = vrot.slane %v15178_v52, %v16031_v54  ;;  %v972_v42 = vrot.slane %v15178_v52, %v971_v40  ;;  %v13943_v52 = vld [vmem:[#allocation7 + $0x2f4] ss:$52 sps:$4 sm:$0xff]  }
 0x31b   :  { %6952 = vmatprep.subr.bf16.mxu0 %v13820_v43  ;;  %7116 = vmatprep.subr.bf16.mxu1 %v13823_v45 }
 0x31e   :  { %6953 = vmatpush1.bf16.msra.mxu0 %v13818_v46  ;;  %7117 = vmatpush1.bf16.msra.mxu1 %v13821_v47 }
 0x31f   :  { %6954 = vmatprep.subr.bf16.mxu0 %v13826_v48  ;;  %7118 = vmatprep.subr.bf16.mxu1 %v13829_v50 }
 0x322   :  { %6955 = vmatpush1.bf16.msra.mxu0 %v13824_v51  ;;  %7119 = vmatpush1.bf16.msra.mxu1 %v13827_v55 }
 0x323   :  { %6956 = vmatprep.subr.bf16.mxu0 %v13832_v57  ;;  %7120 = vmatprep.subr.bf16.mxu1 %v13835_v58  ;;  %v13884_v57 = vld [vmem:[#allocation7 + $0x1380] ss:$52 sps:$4 sm:$0xff]   ;;  %v13887_v58 = vld [vmem:[#allocation7 + $0x1388] ss:$52 sps:$4 sm:$0xff]  }
 0x326   :  { %6957 = vmatpush1.bf16.msra.mxu0 %v13830_v59  ;;  %7121 = vmatpush1.bf16.msra.mxu1 %v13833_v60 }
 0x327   :  { %6958 = vmatprep.subr.bf16.mxu0 %v13838_v61  ;;  %7122 = vmatprep.subr.bf16.mxu1 %v13841_v12  ;;  %v13892_v61 = vld [vmem:[#allocation7 + $0x13ec] ss:$52 sps:$4 sm:$0xff]   ;;  %v13895_v12 = vld [vmem:[#allocation7 + $0x13f4] ss:$52 sps:$4 sm:$0xff]  }
 0x32a   :  { %6959 = vmatpush1.bf16.msra.mxu0 %v13836_v62  ;;  %7123 = vmatpush1.bf16.msra.mxu1 %v13839_v9  ;;  %v13890_v62 = vld [vmem:[#allocation7 + $0x13e8] ss:$52 sps:$4 sm:$0xff]   ;;  %v13893_v9 = vld [vmem:[#allocation7 + $0x13f0] ss:$52 sps:$4 sm:$0xff]  }
 0x32b   :  { %6960 = vmatprep.subr.bf16.mxu0 %v13844_v63  ;;  %7124 = vmatprep.subr.bf16.mxu1 %v13847_v0  ;;  %v13898_v63 = vld [vmem:[#allocation7 + $0x14] ss:$52 sps:$4 sm:$0xff]   ;;  %v13901_v0 = vld [vmem:[#allocation7 + $0x1c] ss:$52 sps:$4 sm:$0xff]  }
 0x32e   :  { %6961 = vmatpush1.bf16.msra.mxu0 %v13842_v1  ;;  %7125 = vmatpush1.bf16.msra.mxu1 %v13845_v2  ;;  %v2779_v1 = vmax.f32 %v16461_v53, 0.0  ;;  %v13896_v2 = vld [vmem:[#allocation7 + $0x10] ss:$52 sps:$4 sm:$0xff]  }
 0x32f   :  { %6962 = vmatprep.subr.bf16.mxu0 %v13850_v3  ;;  %7126 = vmatprep.subr.bf16.mxu1 %v13853_v4  ;;  %v13899_v3 = vld [vmem:[#allocation7 + $0x18] ss:$52 sps:$4 sm:$0xff]  }
 0x330   :  { %v16478_v4 = vpack.c.bf16 %v2779_v1, %v2779_v1  ;;  %v13910_v53 = vld [vmem:[#allocation7 + $0xe4] ss:$52 sps:$4 sm:$0xff]   ;;  %v13970_v1 = vld [vmem:[#allocation7 + $0x4f4] ss:$52 sps:$4 sm:$0xff]  }
 0x332   :  { %6963 = vmatpush1.bf16.msra.mxu0 %v13848_v5  ;;  %7127 = vmatpush1.bf16.msra.mxu1 %v13851_v6  ;;  %v13904_v5 = vld [vmem:[#allocation7 + $0x7c] ss:$52 sps:$4 sm:$0xff]   ;;  %v13907_v6 = vld [vmem:[#allocation7 + $0x84] ss:$52 sps:$4 sm:$0xff]  }
 0x333   :  { %6964 = vmatprep.subr.bf16.mxu0 %v13856_v28  ;;  %7128 = vmatprep.subr.bf16.mxu1 %v13859_v7  ;;  %v13902_v28 = vld [vmem:[#allocation7 + $0x78] ss:$52 sps:$4 sm:$0xff]   ;;  %v13905_v7 = vld [vmem:[#allocation7 + $0x80] ss:$52 sps:$4 sm:$0xff]  }
 0x336   :  { %6965 = vmatpush1.bf16.msra.mxu0 %v13854_v21  ;;  %7129 = vmatpush1.bf16.msra.mxu1 %v13857_v13  ;;  %v13913_v21 = vld [vmem:[#allocation7 + $0xec] ss:$52 sps:$4 sm:$0xff]  }
 0x337   :  { %6966 = vmatprep.subr.bf16.mxu0 %v13862_v14  ;;  %7130 = vmatprep.subr.bf16.mxu1 %v13865_v15  ;;  %v13908_v13 = vld [vmem:[#allocation7 + $0xe0] ss:$52 sps:$4 sm:$0xff]   ;;  %v13911_v14 = vld [vmem:[#allocation7 + $0xe8] ss:$52 sps:$4 sm:$0xff]  }
 0x338   :  { %v13916_v15 = vld [vmem:[#allocation7 + $0x14c] ss:$52 sps:$4 sm:$0xff]  }
 0x33a   :  { %6967 = vmatpush1.bf16.msra.mxu0 %v13860_v17  ;;  %7131 = vmatpush1.bf16.msra.mxu1 %v13863_v18  ;;  %v13919_v17 = vld [vmem:[#allocation7 + $0x154] ss:$52 sps:$4 sm:$0xff]  }
 0x33b   :  { %6968 = vmatprep.subr.bf16.mxu0 %v13868_v19  ;;  %7132 = vmatprep.subr.bf16.mxu1 %v13871_v20  ;;  %v13914_v18 = vld [vmem:[#allocation7 + $0x148] ss:$52 sps:$4 sm:$0xff]   ;;  %v13917_v19 = vld [vmem:[#allocation7 + $0x150] ss:$52 sps:$4 sm:$0xff]  }
 0x33c   :  { %v13922_v20 = vld [vmem:[#allocation7 + $0x1b4] ss:$52 sps:$4 sm:$0xff]  }
 0x33e   :  { %6969 = vmatpush1.bf16.msra.mxu0 %v13866_v22  ;;  %7133 = vmatpush1.bf16.msra.mxu1 %v13869_v23  ;;  %v13925_v22 = vld [vmem:[#allocation7 + $0x1bc] ss:$52 sps:$4 sm:$0xff]  }
 0x33f   :  { %6970 = vmatprep.subr.bf16.mxu0 %v13874_v24  ;;  %7134 = vmatprep.subr.bf16.mxu1 %v13877_v27  ;;  %v13920_v23 = vld [vmem:[#allocation7 + $0x1b0] ss:$52 sps:$4 sm:$0xff]   ;;  %v13923_v24 = vld [vmem:[#allocation7 + $0x1b8] ss:$52 sps:$4 sm:$0xff]  }
 0x340   :  { %v13928_v27 = vld [vmem:[#allocation7 + $0x21c] ss:$52 sps:$4 sm:$0xff]  }
 0x342   :  { %6971 = vmatpush1.bf16.msra.mxu0 %v13872_v29  ;;  %7135 = vmatpush1.bf16.msra.mxu1 %v13875_v25  ;;  %v13931_v29 = vld [vmem:[#allocation7 + $0x224] ss:$52 sps:$4 sm:$0xff]  }
 0x343   :  { %6972 = vmatprep.subr.bf16.mxu0 %v13880_v32  ;;  %7136 = vmatprep.subr.bf16.mxu1 %v13883_v33  ;;  %v13926_v25 = vld [vmem:[#allocation7 + $0x218] ss:$52 sps:$4 sm:$0xff]   ;;  %v13929_v32 = vld [vmem:[#allocation7 + $0x220] ss:$52 sps:$4 sm:$0xff]  }
 0x344   :  { %v13934_v33 = vld [vmem:[#allocation7 + $0x284] ss:$52 sps:$4 sm:$0xff]  }
 0x346   :  { %6973 = vmatpush1.bf16.msra.mxu0 %v13878_v34  ;;  %7137 = vmatpush1.bf16.msra.mxu1 %v13881_v36  ;;  %v13937_v34 = vld [vmem:[#allocation7 + $0x28c] ss:$52 sps:$4 sm:$0xff]  }
 0x347   :  { %6983 = vmatprep.subr.bf16.mxu0 %v13886_v37  ;;  %7147 = vmatprep.subr.bf16.mxu1 %v13889_v38  ;;  %v13932_v36 = vld [vmem:[#allocation7 + $0x280] ss:$52 sps:$4 sm:$0xff]   ;;  %v13935_v37 = vld [vmem:[#allocation7 + $0x288] ss:$52 sps:$4 sm:$0xff]  }
 0x348   :  { %v13940_v38 = vld [vmem:[#allocation7 + $0x2ec] ss:$52 sps:$4 sm:$0xff]  }
 0x350   :  { %v2646_v43 = vpop.f32.mrb[8].mxu1 }
 0x351   :  { %v12982_v45 = vadd.f32 %v2646_v43, %v968_v41  ;;  %v2648_v46 = vpop.f32.mrb[9].mxu1  ;;  %v13938_v41 = vld [vmem:[#allocation7 + $0x2e8] ss:$52 sps:$4 sm:$0xff]  }
 0x352   :  { %v12983_v47 = vadd.f32 %v2648_v46, %v972_v42  ;;  %v2650_v48 = vpop.f32.mrb[10].mxu1  ;;  %v13941_v42 = vld [vmem:[#allocation7 + $0x2f0] ss:$52 sps:$4 sm:$0xff]   ;;  %v13946_v43 = vld [vmem:[#allocation7 + $0x354] ss:$52 sps:$4 sm:$0xff]  }
 0x353   :  { %v2777_v50 = vmax.f32 %v12982_v45, 0.0  ;;  %v2651_v51 = vpop.f32.mrb[11].mxu1  ;;  %v13949_v45 = vld [vmem:[#allocation7 + $0x35c] ss:$52 sps:$4 sm:$0xff]  }
 0x354   :  { %v2778_v55 = vmax.f32 %v12983_v47, 0.0  ;;  %v13944_v46 = vld [vmem:[#allocation7 + $0x350] ss:$52 sps:$4 sm:$0xff]   ;;  %v13947_v47 = vld [vmem:[#allocation7 + $0x358] ss:$52 sps:$4 sm:$0xff]  }
 0x355   :  { %v16469_v60 = vpack.c.bf16 %v2777_v50, %v2777_v50  ;;  %v13952_v48 = vld [vmem:[#allocation7 + $0x3bc] ss:$52 sps:$4 sm:$0xff]   ;;  %v13955_v50 = vld [vmem:[#allocation7 + $0x3c4] ss:$52 sps:$4 sm:$0xff]  }
 0x356   :  { %v16467_v59 = vpack.c.bf16 %v2778_v55, %v2778_v55  ;;  %v13950_v51 = vld [vmem:[#allocation7 + $0x3b8] ss:$52 sps:$4 sm:$0xff]   ;;  %v13953_v55 = vld [vmem:[#allocation7 + $0x3c0] ss:$52 sps:$4 sm:$0xff]  }
 0x358   :  { %6974 = vmatprep.mubr.bf16.mxu0 %v16467_v59  ;;  %7138 = vmatprep.mubr.bf16.mxu1 %v16467_v59 }
 0x359   :  { %6975 = vmatmul.mubr.bf16.vlgmr.msra.gmra.mrb[24].mxu0 %v16469_v60  ;;  %7139 = vmatmul.mubr.bf16.vlgmr.msra.gmra.mrb[12].mxu1 %v16469_v60 }
 0x35a   :  { %6984 = vmatpush1.bf16.msra.mxu0 %v13884_v57  ;;  %7148 = vmatpush1.bf16.msra.mxu1 %v13887_v58  ;;  %v13958_v57 = vld [vmem:[#allocation7 + $0x424] ss:$52 sps:$4 sm:$0xff]   ;;  %v13961_v58 = vld [vmem:[#allocation7 + $0x42c] ss:$52 sps:$4 sm:$0xff]  }
 0x35b   :  { %6985 = vmatprep.subr.bf16.mxu0 %v13892_v61  ;;  %7149 = vmatprep.subr.bf16.mxu1 %v13895_v12  ;;  %v13956_v61 = vld [vmem:[#allocation7 + $0x420] ss:$52 sps:$4 sm:$0xff]   ;;  %v13959_v12 = vld [vmem:[#allocation7 + $0x428] ss:$52 sps:$4 sm:$0xff]  }
 0x35c   :  { %7015 = vmatprep.mubr.bf16.mxu0 %v15380_v35  ;;  %7179 = vmatprep.mubr.bf16.mxu1 %v15380_v35 }
 0x35e   :  { %6986 = vmatpush1.bf16.msra.mxu0 %v13890_v62  ;;  %7150 = vmatpush1.bf16.msra.mxu1 %v13893_v9  ;;  %v13964_v62 = vld [vmem:[#allocation7 + $0x48c] ss:$52 sps:$4 sm:$0xff]   ;;  %v13967_v9 = vld [vmem:[#allocation7 + $0x494] ss:$52 sps:$4 sm:$0xff]  }
 0x35f   :  { %7188 = vmatprep.subr.bf16.mxu0 %v13898_v63  ;;  %7352 = vmatprep.subr.bf16.mxu1 %v13901_v0  ;;  %v13962_v63 = vld [vmem:[#allocation7 + $0x488] ss:$52 sps:$4 sm:$0xff]   ;;  %v13965_v0 = vld [vmem:[#allocation7 + $0x490] ss:$52 sps:$4 sm:$0xff]  }
 0x365   :  { %12354 = vmatmul.mubr.msk.bf16.vlgmr.msra.gmra.mrb[24].mxu0 %vm6856_vm4, %v16478_v4  ;;  %12355 = vmatmul.mubr.msk.bf16.vlgmr.msra.gmra.mrb[12].mxu1 %vm6856_vm4, %v16478_v4 }
 0x366   :  { %7189 = vmatpush1.bf16.msra.mxu0 %v13896_v2  ;;  %7353 = vmatpush1.bf16.msra.mxu1 %v13899_v3  ;;  %v13973_v2 = vld [vmem:[#allocation7 + $0x4fc] ss:$52 sps:$4 sm:$0xff]  }
 0x367   :  { %7220 = vmatprep.mubr.bf16.mxu0 %v16435_v44  ;;  %7384 = vmatprep.mubr.bf16.mxu1 %v16435_v44  ;;  %v13968_v3 = vld [vmem:[#allocation7 + $0x4f0] ss:$52 sps:$4 sm:$0xff]  }
 0x368   :  { %7190 = vmatprep.subr.bf16.mxu0 %v13904_v5  ;;  %7354 = vmatprep.subr.bf16.mxu1 %v13907_v6  ;;  %v13971_v5 = vld [vmem:[#allocation7 + $0x4f8] ss:$52 sps:$4 sm:$0xff]   ;;  %v13976_v6 = vld [vmem:[#allocation7 + $0x55c] ss:$52 sps:$4 sm:$0xff]  }
 0x36a   :  { %7191 = vmatpush1.bf16.msra.mxu0 %v13902_v28  ;;  %7355 = vmatpush1.bf16.msra.mxu1 %v13905_v7  ;;  %v13979_v28 = vld [vmem:[#allocation7 + $0x564] ss:$52 sps:$4 sm:$0xff]  }
 0x36b   :  { %7192 = vmatprep.subr.bf16.mxu0 %v13910_v53  ;;  %7356 = vmatprep.subr.bf16.mxu1 %v13913_v21  ;;  %v13974_v7 = vld [vmem:[#allocation7 + $0x558] ss:$52 sps:$4 sm:$0xff]   ;;  %v13977_v53 = vld [vmem:[#allocation7 + $0x560] ss:$52 sps:$4 sm:$0xff]  }
 0x36c   :  { %v13982_v21 = vld [vmem:[#allocation7 + $0x5c4] ss:$52 sps:$4 sm:$0xff]  }
 0x36e   :  { %7193 = vmatpush1.bf16.msra.mxu0 %v13908_v13  ;;  %7357 = vmatpush1.bf16.msra.mxu1 %v13911_v14  ;;  %v13985_v13 = vld [vmem:[#allocation7 + $0x5cc] ss:$52 sps:$4 sm:$0xff]  }
 0x36f   :  { %7194 = vmatprep.subr.bf16.mxu0 %v13916_v15  ;;  %7358 = vmatprep.subr.bf16.mxu1 %v13919_v17  ;;  %v13980_v14 = vld [vmem:[#allocation7 + $0x5c0] ss:$52 sps:$4 sm:$0xff]   ;;  %v13983_v15 = vld [vmem:[#allocation7 + $0x5c8] ss:$52 sps:$4 sm:$0xff]  }
 0x370   :  { %v13988_v17 = vld [vmem:[#allocation7 + $0x62c] ss:$52 sps:$4 sm:$0xff]  }
 0x372   :  { %7195 = vmatpush1.bf16.msra.mxu0 %v13914_v18  ;;  %7359 = vmatpush1.bf16.msra.mxu1 %v13917_v19  ;;  %v13991_v18 = vld [vmem:[#allocation7 + $0x634] ss:$52 sps:$4 sm:$0xff]  }
 0x373   :  { %7196 = vmatprep.subr.bf16.mxu0 %v13922_v20  ;;  %7360 = vmatprep.subr.bf16.mxu1 %v13925_v22  ;;  %v13986_v19 = vld [vmem:[#allocation7 + $0x628] ss:$52 sps:$4 sm:$0xff]   ;;  %v13989_v20 = vld [vmem:[#allocation7 + $0x630] ss:$52 sps:$4 sm:$0xff]  }
 0x374   :  { %v13994_v22 = vld [vmem:[#allocation7 + $0x694] ss:$52 sps:$4 sm:$0xff]  }
 0x376   :  { %7197 = vmatpush1.bf16.msra.mxu0 %v13920_v23  ;;  %7361 = vmatpush1.bf16.msra.mxu1 %v13923_v24  ;;  %v13997_v23 = vld [vmem:[#allocation7 + $0x69c] ss:$52 sps:$4 sm:$0xff]  }
 0x377   :  { %7198 = vmatprep.subr.bf16.mxu0 %v13928_v27  ;;  %7362 = vmatprep.subr.bf16.mxu1 %v13931_v29  ;;  %v13992_v24 = vld [vmem:[#allocation7 + $0x690] ss:$52 sps:$4 sm:$0xff]   ;;  %v13995_v27 = vld [vmem:[#allocation7 + $0x698] ss:$52 sps:$4 sm:$0xff]  }
 0x378   :  { %v14000_v29 = vld [vmem:[#allocation7 + $0x6fc] ss:$52 sps:$4 sm:$0xff]  }
 0x37a   :  { %7199 = vmatpush1.bf16.msra.mxu0 %v13926_v25  ;;  %7363 = vmatpush1.bf16.msra.mxu1 %v13929_v32  ;;  %v14003_v25 = vld [vmem:[#allocation7 + $0x704] ss:$52 sps:$4 sm:$0xff]  }
 0x37b   :  { %7200 = vmatprep.subr.bf16.mxu0 %v13934_v33  ;;  %7364 = vmatprep.subr.bf16.mxu1 %v13937_v34  ;;  %v13998_v32 = vld [vmem:[#allocation7 + $0x6f8] ss:$52 sps:$4 sm:$0xff]   ;;  %v14001_v33 = vld [vmem:[#allocation7 + $0x700] ss:$52 sps:$4 sm:$0xff]  }
 0x37c   :  { %v14006_v34 = vld [vmem:[#allocation7 + $0x764] ss:$52 sps:$4 sm:$0xff]  }
 0x37e   :  { %7201 = vmatpush1.bf16.msra.mxu0 %v13932_v36  ;;  %7365 = vmatpush1.bf16.msra.mxu1 %v13935_v37  ;;  %v14009_v36 = vld [vmem:[#allocation7 + $0x76c] ss:$52 sps:$4 sm:$0xff]  }
 0x37f   :  { %7202 = vmatprep.subr.bf16.mxu0 %v13940_v38  ;;  %7366 = vmatprep.subr.bf16.mxu1 %v13943_v52  ;;  %v14004_v37 = vld [vmem:[#allocation7 + $0x760] ss:$52 sps:$4 sm:$0xff]   ;;  %v14007_v38 = vld [vmem:[#allocation7 + $0x768] ss:$52 sps:$4 sm:$0xff]  }
 0x380   :  { %v14012_v52 = vld [vmem:[#allocation7 + $0x7cc] ss:$52 sps:$4 sm:$0xff]  }
 0x382   :  { %7203 = vmatpush1.bf16.msra.mxu0 %v13938_v41  ;;  %7367 = vmatpush1.bf16.msra.mxu1 %v13941_v42  ;;  %v14015_v41 = vld [vmem:[#allocation7 + $0x7d4] ss:$52 sps:$4 sm:$0xff]  }
 0x383   :  { %7204 = vmatprep.subr.bf16.mxu0 %v13946_v43  ;;  %7368 = vmatprep.subr.bf16.mxu1 %v13949_v45  ;;  %v14010_v42 = vld [vmem:[#allocation7 + $0x7c8] ss:$52 sps:$4 sm:$0xff]   ;;  %v14013_v43 = vld [vmem:[#allocation7 + $0x7d0] ss:$52 sps:$4 sm:$0xff]  }
 0x384   :  { %v14018_v45 = vld [vmem:[#allocation7 + $0x834] ss:$52 sps:$4 sm:$0xff]  }
 0x386   :  { %7205 = vmatpush1.bf16.msra.mxu0 %v13944_v46  ;;  %7369 = vmatpush1.bf16.msra.mxu1 %v13947_v47  ;;  %v14021_v46 = vld [vmem:[#allocation7 + $0x83c] ss:$52 sps:$4 sm:$0xff]  }
 0x387   :  { %7206 = vmatprep.subr.bf16.mxu0 %v13952_v48  ;;  %7370 = vmatprep.subr.bf16.mxu1 %v13955_v50  ;;  %v14016_v47 = vld [vmem:[#allocation7 + $0x830] ss:$52 sps:$4 sm:$0xff]   ;;  %v14019_v48 = vld [vmem:[#allocation7 + $0x838] ss:$52 sps:$4 sm:$0xff]  }
 0x388   :  { %v14024_v50 = vld [vmem:[#allocation7 + $0x89c] ss:$52 sps:$4 sm:$0xff]  }
 0x38a   :  { %7207 = vmatpush1.bf16.msra.mxu0 %v13950_v51  ;;  %7371 = vmatpush1.bf16.msra.mxu1 %v13953_v55  ;;  %v14027_v51 = vld [vmem:[#allocation7 + $0x8a4] ss:$52 sps:$4 sm:$0xff]  }
 0x38b   :  { %7208 = vmatprep.subr.bf16.mxu0 %v13958_v57  ;;  %7372 = vmatprep.subr.bf16.mxu1 %v13961_v58  ;;  %v14022_v55 = vld [vmem:[#allocation7 + $0x898] ss:$52 sps:$4 sm:$0xff]   ;;  %v14025_v57 = vld [vmem:[#allocation7 + $0x8a0] ss:$52 sps:$4 sm:$0xff]  }
 0x38c   :  { %v14030_v58 = vld [vmem:[#allocation7 + $0x904] ss:$52 sps:$4 sm:$0xff]  }
 0x38e   :  { %7209 = vmatpush1.bf16.msra.mxu0 %v13956_v61  ;;  %7373 = vmatpush1.bf16.msra.mxu1 %v13959_v12  ;;  %v14033_v61 = vld [vmem:[#allocation7 + $0x90c] ss:$52 sps:$4 sm:$0xff]  }
 0x38f   :  { %7210 = vmatprep.subr.bf16.mxu0 %v13964_v62  ;;  %7374 = vmatprep.subr.bf16.mxu1 %v13967_v9  ;;  %v14028_v12 = vld [vmem:[#allocation7 + $0x900] ss:$52 sps:$4 sm:$0xff]   ;;  %v14031_v62 = vld [vmem:[#allocation7 + $0x908] ss:$52 sps:$4 sm:$0xff]  }
 0x390   :  { %v14036_v9 = vld [vmem:[#allocation7 + $0x96c] ss:$52 sps:$4 sm:$0xff]  }
 0x392   :  { %7211 = vmatpush1.bf16.msra.mxu0 %v13962_v63  ;;  %7375 = vmatpush1.bf16.msra.mxu1 %v13965_v0  ;;  %v14039_v63 = vld [vmem:[#allocation7 + $0x974] ss:$52 sps:$4 sm:$0xff]  }
 0x393   :  { %7212 = vmatprep.subr.bf16.mxu0 %v13970_v1  ;;  %7376 = vmatprep.subr.bf16.mxu1 %v13973_v2  ;;  %v14034_v0 = vld [vmem:[#allocation7 + $0x968] ss:$52 sps:$4 sm:$0xff]   ;;  %v14037_v1 = vld [vmem:[#allocation7 + $0x970] ss:$52 sps:$4 sm:$0xff]  }
 0x394   :  { %v14042_v2 = vld [vmem:[#allocation7 + $0x9d4] ss:$52 sps:$4 sm:$0xff]  }
 0x396   :  { %7213 = vmatpush1.bf16.msra.mxu0 %v13968_v3  ;;  %7377 = vmatpush1.bf16.msra.mxu1 %v13971_v5  ;;  %v14045_v3 = vld [vmem:[#allocation7 + $0x9dc] ss:$52 sps:$4 sm:$0xff]  }
 0x397   :  { %7214 = vmatprep.subr.bf16.mxu0 %v13976_v6  ;;  %7378 = vmatprep.subr.bf16.mxu1 %v13979_v28  ;;  %v14040_v5 = vld [vmem:[#allocation7 + $0x9d0] ss:$52 sps:$4 sm:$0xff]   ;;  %v14043_v6 = vld [vmem:[#allocation7 + $0x9d8] ss:$52 sps:$4 sm:$0xff]  }
 0x398   :  { %v14048_v28 = vld [vmem:[#allocation7 + $0xa3c] ss:$52 sps:$4 sm:$0xff]  }
 0x39a   :  { %7215 = vmatpush1.bf16.msra.mxu0 %v13974_v7  ;;  %7379 = vmatpush1.bf16.msra.mxu1 %v13977_v53  ;;  %v14051_v7 = vld [vmem:[#allocation7 + $0xa44] ss:$52 sps:$4 sm:$0xff]  }
 0x39b   :  { %7216 = vmatprep.subr.bf16.mxu0 %v13982_v21  ;;  %7380 = vmatprep.subr.bf16.mxu1 %v13985_v13  ;;  %v14046_v53 = vld [vmem:[#allocation7 + $0xa38] ss:$52 sps:$4 sm:$0xff]   ;;  %v14049_v21 = vld [vmem:[#allocation7 + $0xa40] ss:$52 sps:$4 sm:$0xff]  }
 0x39c   :  { %v14054_v13 = vld [vmem:[#allocation7 + $0xaa4] ss:$52 sps:$4 sm:$0xff]  }
 0x39e   :  { %7217 = vmatpush1.bf16.msra.mxu0 %v13980_v14  ;;  %7381 = vmatpush1.bf16.msra.mxu1 %v13983_v15  ;;  %v14057_v14 = vld [vmem:[#allocation7 + $0xaac] ss:$52 sps:$4 sm:$0xff]  }
 0x39f   :  { %7218 = vmatprep.subr.bf16.mxu0 %v13988_v17  ;;  %7382 = vmatprep.subr.bf16.mxu1 %v13991_v18  ;;  %v14052_v15 = vld [vmem:[#allocation7 + $0xaa0] ss:$52 sps:$4 sm:$0xff]   ;;  %v14055_v17 = vld [vmem:[#allocation7 + $0xaa8] ss:$52 sps:$4 sm:$0xff]  }
 0x3a0   :  { %v14060_v18 = vld [vmem:[#allocation7 + $0xb0c] ss:$52 sps:$4 sm:$0xff]  }
 0x3a2   :  { %7219 = vmatpush1.bf16.msra.mxu0 %v13986_v19  ;;  %7383 = vmatpush1.bf16.msra.mxu1 %v13989_v20  ;;  %v14063_v19 = vld [vmem:[#allocation7 + $0xb14] ss:$52 sps:$4 sm:$0xff]  }
 0x3a3   :  { %7229 = vmatprep.subr.bf16.mxu0 %v13994_v22  ;;  %7393 = vmatprep.subr.bf16.mxu1 %v13997_v23  ;;  %v14058_v20 = vld [vmem:[#allocation7 + $0xb08] ss:$52 sps:$4 sm:$0xff]   ;;  %v14061_v22 = vld [vmem:[#allocation7 + $0xb10] ss:$52 sps:$4 sm:$0xff]  }
 0x3a4   :  { %v14066_v23 = vld [vmem:[#allocation7 + $0xb74] ss:$52 sps:$4 sm:$0xff]  }
 0x3a5   :  { %7221 = vmatmul.mubr.bf16.vlgmr.msra.gmra.mrb[28].mxu0 %v16437_v39  ;;  %7385 = vmatmul.mubr.bf16.vlgmr.msra.gmra.mrb[16].mxu1 %v16437_v39 }
 0x3a6   :  { %7230 = vmatpush1.bf16.msra.mxu0 %v13992_v24  ;;  %7261 = vmatprep.mubr.bf16.mxu0 %v16441_v49  ;;  %v14069_v24 = vld [vmem:[#allocation7 + $0xb7c] ss:$52 sps:$4 sm:$0xff]  }
 0x3a7   :  { %7394 = vmatpush1.bf16.msra.mxu1 %v13995_v27  ;;  %7425 = vmatprep.mubr.bf16.mxu1 %v16441_v49  ;;  %v14064_v27 = vld [vmem:[#allocation7 + $0xb70] ss:$52 sps:$4 sm:$0xff]  }
 0x3a8   :  { %7231 = vmatprep.subr.bf16.mxu0 %v14000_v29  ;;  %7395 = vmatprep.subr.bf16.mxu1 %v14003_v25  ;;  %v14067_v29 = vld [vmem:[#allocation7 + $0xb78] ss:$52 sps:$4 sm:$0xff]   ;;  %v14072_v25 = vld [vmem:[#allocation7 + $0xbdc] ss:$52 sps:$4 sm:$0xff]  }
 0x3aa   :  { %7232 = vmatpush1.bf16.msra.mxu0 %v13998_v32  ;;  %v14075_v32 = vld [vmem:[#allocation7 + $0xbe4] ss:$52 sps:$4 sm:$0xff]  }
 0x3ab   :  { %7396 = vmatpush1.bf16.msra.mxu1 %v14001_v33  ;;  %7233 = vmatprep.subr.bf16.mxu0 %v14006_v34  ;;  %v14070_v33 = vld [vmem:[#allocation7 + $0xbd8] ss:$52 sps:$4 sm:$0xff]   ;;  %v14073_v34 = vld [vmem:[#allocation7 + $0xbe0] ss:$52 sps:$4 sm:$0xff]  }
 0x3ac   :  { %7397 = vmatprep.subr.bf16.mxu1 %v14009_v36  ;;  %v14078_v36 = vld [vmem:[#allocation7 + $0xc44] ss:$52 sps:$4 sm:$0xff]  }
 0x3ae   :  { %7234 = vmatpush1.bf16.msra.mxu0 %v14004_v37  ;;  %v14081_v37 = vld [vmem:[#allocation7 + $0xc4c] ss:$52 sps:$4 sm:$0xff]  }
 0x3af   :  { %7398 = vmatpush1.bf16.msra.mxu1 %v14007_v38  ;;  %7235 = vmatprep.subr.bf16.mxu0 %v14012_v52  ;;  %v14076_v38 = vld [vmem:[#allocation7 + $0xc40] ss:$52 sps:$4 sm:$0xff]   ;;  %v14079_v52 = vld [vmem:[#allocation7 + $0xc48] ss:$52 sps:$4 sm:$0xff]  }
 0x3b0   :  { %7399 = vmatprep.subr.bf16.mxu1 %v14015_v41  ;;  %v14084_v41 = vld [vmem:[#allocation7 + $0xcac] ss:$52 sps:$4 sm:$0xff]  }
 0x3b2   :  { %7236 = vmatpush1.bf16.msra.mxu0 %v14010_v42  ;;  %v14087_v42 = vld [vmem:[#allocation7 + $0xcb4] ss:$52 sps:$4 sm:$0xff]  }
 0x3b3   :  { %7400 = vmatpush1.bf16.msra.mxu1 %v14013_v43  ;;  %7237 = vmatprep.subr.bf16.mxu0 %v14018_v45  ;;  %v14082_v43 = vld [vmem:[#allocation7 + $0xca8] ss:$52 sps:$4 sm:$0xff]   ;;  %v14085_v45 = vld [vmem:[#allocation7 + $0xcb0] ss:$52 sps:$4 sm:$0xff]  }
 0x3b4   :  { %7401 = vmatprep.subr.bf16.mxu1 %v14021_v46  ;;  %v14090_v46 = vld [vmem:[#allocation7 + $0xd14] ss:$52 sps:$4 sm:$0xff]  }
 0x3b6   :  { %7238 = vmatpush1.bf16.msra.mxu0 %v14016_v47  ;;  %v14093_v47 = vld [vmem:[#allocation7 + $0xd1c] ss:$52 sps:$4 sm:$0xff]  }
 0x3b7   :  { %7402 = vmatpush1.bf16.msra.mxu1 %v14019_v48  ;;  %7239 = vmatprep.subr.bf16.mxu0 %v14024_v50  ;;  %v14088_v48 = vld [vmem:[#allocation7 + $0xd10] ss:$52 sps:$4 sm:$0xff]   ;;  %v14091_v50 = vld [vmem:[#allocation7 + $0xd18] ss:$52 sps:$4 sm:$0xff]  }
 0x3b8   :  { %7403 = vmatprep.subr.bf16.mxu1 %v14027_v51  ;;  %v14096_v51 = vld [vmem:[#allocation7 + $0xd7c] ss:$52 sps:$4 sm:$0xff]  }
 0x3ba   :  { %7240 = vmatpush1.bf16.msra.mxu0 %v14022_v55  ;;  %v14099_v55 = vld [vmem:[#allocation7 + $0xd84] ss:$52 sps:$4 sm:$0xff]  }
 0x3bb   :  { %7404 = vmatpush1.bf16.msra.mxu1 %v14025_v57  ;;  %7241 = vmatprep.subr.bf16.mxu0 %v14030_v58  ;;  %v14094_v57 = vld [vmem:[#allocation7 + $0xd78] ss:$52 sps:$4 sm:$0xff]   ;;  %v14097_v58 = vld [vmem:[#allocation7 + $0xd80] ss:$52 sps:$4 sm:$0xff]  }
 0x3bc   :  { %7405 = vmatprep.subr.bf16.mxu1 %v14033_v61  ;;  %v14102_v61 = vld [vmem:[#allocation7 + $0xde4] ss:$52 sps:$4 sm:$0xff]  }
 0x3be   :  { %7242 = vmatpush1.bf16.msra.mxu0 %v14028_v12  ;;  %v14105_v12 = vld [vmem:[#allocation7 + $0xdec] ss:$52 sps:$4 sm:$0xff]  }
 0x3bf   :  { %7406 = vmatpush1.bf16.msra.mxu1 %v14031_v62  ;;  %7243 = vmatprep.subr.bf16.mxu0 %v14036_v9  ;;  %v14100_v62 = vld [vmem:[#allocation7 + $0xde0] ss:$52 sps:$4 sm:$0xff]   ;;  %v14103_v9 = vld [vmem:[#allocation7 + $0xde8] ss:$52 sps:$4 sm:$0xff]  }
 0x3c0   :  { %7407 = vmatprep.subr.bf16.mxu1 %v14039_v63  ;;  %v14108_v63 = vld [vmem:[#allocation7 + $0xe4c] ss:$52 sps:$4 sm:$0xff]  }
 0x3c2   :  { %7244 = vmatpush1.bf16.msra.mxu0 %v14034_v0  ;;  %v14111_v0 = vld [vmem:[#allocation7 + $0xe54] ss:$52 sps:$4 sm:$0xff]  }
 0x3c3   :  { %7408 = vmatpush1.bf16.msra.mxu1 %v14037_v1  ;;  %7245 = vmatprep.subr.bf16.mxu0 %v14042_v2  ;;  %v14106_v1 = vld [vmem:[#allocation7 + $0xe48] ss:$52 sps:$4 sm:$0xff]   ;;  %v14109_v2 = vld [vmem:[#allocation7 + $0xe50] ss:$52 sps:$4 sm:$0xff]  }
 0x3c4   :  { %7409 = vmatprep.subr.bf16.mxu1 %v14045_v3  ;;  %v14114_v3 = vld [vmem:[#allocation7 + $0xeb4] ss:$52 sps:$4 sm:$0xff]  }
 0x3c6   :  { %7246 = vmatpush1.bf16.msra.mxu0 %v14040_v5  ;;  %v14117_v5 = vld [vmem:[#allocation7 + $0xebc] ss:$52 sps:$4 sm:$0xff]  }
 0x3c7   :  { %7410 = vmatpush1.bf16.msra.mxu1 %v14043_v6  ;;  %7247 = vmatprep.subr.bf16.mxu0 %v14048_v28  ;;  %v14112_v6 = vld [vmem:[#allocation7 + $0xeb0] ss:$52 sps:$4 sm:$0xff]   ;;  %v14115_v28 = vld [vmem:[#allocation7 + $0xeb8] ss:$52 sps:$4 sm:$0xff]  }
 0x3c8   :  { %7411 = vmatprep.subr.bf16.mxu1 %v14051_v7  ;;  %v14120_v7 = vld [vmem:[#allocation7 + $0xf1c] ss:$52 sps:$4 sm:$0xff]  }
 0x3ca   :  { %7248 = vmatpush1.bf16.msra.mxu0 %v14046_v53  ;;  %v14123_v53 = vld [vmem:[#allocation7 + $0xf24] ss:$52 sps:$4 sm:$0xff]  }
 0x3cb   :  { %7412 = vmatpush1.bf16.msra.mxu1 %v14049_v21  ;;  %7249 = vmatprep.subr.bf16.mxu0 %v14054_v13  ;;  %v14118_v21 = vld [vmem:[#allocation7 + $0xf18] ss:$52 sps:$4 sm:$0xff]   ;;  %v14121_v13 = vld [vmem:[#allocation7 + $0xf20] ss:$52 sps:$4 sm:$0xff]  }
 0x3cc   :  { %7413 = vmatprep.subr.bf16.mxu1 %v14057_v14  ;;  %v14126_v14 = vld [vmem:[#allocation7 + $0xf84] ss:$52 sps:$4 sm:$0xff]  }
 0x3ce   :  { %7250 = vmatpush1.bf16.msra.mxu0 %v14052_v15  ;;  %v14129_v15 = vld [vmem:[#allocation7 + $0xf8c] ss:$52 sps:$4 sm:$0xff]  }
 0x3cf   :  { %7414 = vmatpush1.bf16.msra.mxu1 %v14055_v17  ;;  %7251 = vmatprep.subr.bf16.mxu0 %v14060_v18  ;;  %v14124_v17 = vld [vmem:[#allocation7 + $0xf80] ss:$52 sps:$4 sm:$0xff]   ;;  %v14127_v18 = vld [vmem:[#allocation7 + $0xf88] ss:$52 sps:$4 sm:$0xff]  }
 0x3d0   :  { %7415 = vmatprep.subr.bf16.mxu1 %v14063_v19  ;;  %v14132_v19 = vld [vmem:[#allocation7 + $0xfec] ss:$52 sps:$4 sm:$0xff]  }
 0x3d2   :  { %7252 = vmatpush1.bf16.msra.mxu0 %v14058_v20  ;;  %v14135_v20 = vld [vmem:[#allocation7 + $0xff4] ss:$52 sps:$4 sm:$0xff]  }
 0x3d3   :  { %7416 = vmatpush1.bf16.msra.mxu1 %v14061_v22  ;;  %7253 = vmatprep.subr.bf16.mxu0 %v14066_v23  ;;  %v14130_v22 = vld [vmem:[#allocation7 + $0xfe8] ss:$52 sps:$4 sm:$0xff]   ;;  %v14133_v23 = vld [vmem:[#allocation7 + $0xff0] ss:$52 sps:$4 sm:$0xff]  }
 0x3d4   :  { %7417 = vmatprep.subr.bf16.mxu1 %v14069_v24  ;;  %v14138_v24 = vld [vmem:[#allocation7 + $0x1054] ss:$52 sps:$4 sm:$0xff]  }
 0x3d6   :  { %7254 = vmatpush1.bf16.msra.mxu0 %v14064_v27  ;;  %v14141_v27 = vld [vmem:[#allocation7 + $0x105c] ss:$52 sps:$4 sm:$0xff]  }
 0x3d7   :  { %7418 = vmatpush1.bf16.msra.mxu1 %v14067_v29  ;;  %7255 = vmatprep.subr.bf16.mxu0 %v14072_v25  ;;  %v14136_v29 = vld [vmem:[#allocation7 + $0x1050] ss:$52 sps:$4 sm:$0xff]   ;;  %v14139_v25 = vld [vmem:[#allocation7 + $0x1058] ss:$52 sps:$4 sm:$0xff]  }
 0x3d8   :  { %7419 = vmatprep.subr.bf16.mxu1 %v14075_v32  ;;  %v14144_v32 = vld [vmem:[#allocation7 + $0x10bc] ss:$52 sps:$4 sm:$0xff]  }
 0x3da   :  { %7256 = vmatpush1.bf16.msra.mxu0 %v14070_v33  ;;  %v14147_v33 = vld [vmem:[#allocation7 + $0x10c4] ss:$52 sps:$4 sm:$0xff]  }
 0x3db   :  { %7420 = vmatpush1.bf16.msra.mxu1 %v14073_v34  ;;  %7257 = vmatprep.subr.bf16.mxu0 %v14078_v36  ;;  %v14142_v34 = vld [vmem:[#allocation7 + $0x10b8] ss:$52 sps:$4 sm:$0xff]   ;;  %v14145_v36 = vld [vmem:[#allocation7 + $0x10c0] ss:$52 sps:$4 sm:$0xff]  }
 0x3dc   :  { %7421 = vmatprep.subr.bf16.mxu1 %v14081_v37  ;;  %v14150_v37 = vld [vmem:[#allocation7 + $0x1124] ss:$52 sps:$4 sm:$0xff]  }
 0x3de   :  { %7258 = vmatpush1.bf16.msra.mxu0 %v14076_v38  ;;  %v14153_v38 = vld [vmem:[#allocation7 + $0x112c] ss:$52 sps:$4 sm:$0xff]  }
 0x3df   :  { %7422 = vmatpush1.bf16.msra.mxu1 %v14079_v52  ;;  %7259 = vmatprep.subr.bf16.mxu0 %v14084_v41  ;;  %v14148_v52 = vld [vmem:[#allocation7 + $0x1120] ss:$52 sps:$4 sm:$0xff]   ;;  %v14151_v41 = vld [vmem:[#allocation7 + $0x1128] ss:$52 sps:$4 sm:$0xff]  }
 0x3e0   :  { %7423 = vmatprep.subr.bf16.mxu1 %v14087_v42  ;;  %v14156_v42 = vld [vmem:[#allocation7 + $0x118c] ss:$52 sps:$4 sm:$0xff]  }
 0x3e2   :  { %7260 = vmatpush1.bf16.msra.mxu0 %v14082_v43  ;;  %v14159_v43 = vld [vmem:[#allocation7 + $0x1194] ss:$52 sps:$4 sm:$0xff]  }
 0x3e3   :  { %7424 = vmatpush1.bf16.msra.mxu1 %v14085_v45  ;;  %7270 = vmatprep.subr.bf16.mxu0 %v14090_v46  ;;  %v14154_v45 = vld [vmem:[#allocation7 + $0x1188] ss:$52 sps:$4 sm:$0xff]   ;;  %v14157_v46 = vld [vmem:[#allocation7 + $0x1190] ss:$52 sps:$4 sm:$0xff]  }
 0x3e4   :  { %7434 = vmatprep.subr.bf16.mxu1 %v14093_v47  ;;  %v14162_v47 = vld [vmem:[#allocation7 + $0x11f4] ss:$52 sps:$4 sm:$0xff]  }
 0x3e5   :  { %7262 = vmatmul.mubr.bf16.vlgmr.msra.gmra.mrb[28].mxu0 %v16457_v16 }
 0x3e6   :  { %7426 = vmatmul.mubr.bf16.vlgmr.msra.gmra.mrb[16].mxu1 %v16457_v16  ;;  %7271 = vmatpush1.bf16.msra.mxu0 %v14088_v48  ;;  %v14165_v48 = vld [vmem:[#allocation7 + $0x11fc] ss:$52 sps:$4 sm:$0xff]  }
 0x3e7   :  { %7302 = vmatprep.mubr.bf16.mxu0 %v16467_v59  ;;  %7435 = vmatpush1.bf16.msra.mxu1 %v14091_v50  ;;  %v14160_v50 = vld [vmem:[#allocation7 + $0x11f0] ss:$52 sps:$4 sm:$0xff]  }
 0x3e8   :  { %7466 = vmatprep.mubr.bf16.mxu1 %v16467_v59  ;;  %7272 = vmatprep.subr.bf16.mxu0 %v14096_v51  ;;  %v14163_v51 = vld [vmem:[#allocation7 + $0x11f8] ss:$52 sps:$4 sm:$0xff]  }
 0x3e9   :  { %7436 = vmatprep.subr.bf16.mxu1 %v14099_v55  ;;  %v14168_v55 = vld [vmem:[#allocation7 + $0x125c] ss:$52 sps:$4 sm:$0xff]  }
 0x3ea   :  { %7273 = vmatpush1.bf16.msra.mxu0 %v14094_v57  ;;  %v14171_v57 = vld [vmem:[#allocation7 + $0x1264] ss:$52 sps:$4 sm:$0xff]  }
 0x3eb   :  { %7437 = vmatpush1.bf16.msra.mxu1 %v14097_v58  ;;  %7274 = vmatprep.subr.bf16.mxu0 %v14102_v61  ;;  %v14166_v58 = vld [vmem:[#allocation7 + $0x1258] ss:$52 sps:$4 sm:$0xff]   ;;  %v14169_v61 = vld [vmem:[#allocation7 + $0x1260] ss:$52 sps:$4 sm:$0xff]  }
 0x3ec   :  { %7438 = vmatprep.subr.bf16.mxu1 %v14105_v12  ;;  %v14174_v12 = vld [vmem:[#allocation7 + $0x12c4] ss:$52 sps:$4 sm:$0xff]  }
 0x3ee   :  { %7275 = vmatpush1.bf16.msra.mxu0 %v14100_v62  ;;  %v14177_v62 = vld [vmem:[#allocation7 + $0x12cc] ss:$52 sps:$4 sm:$0xff]  }
 0x3ef   :  { %7439 = vmatpush1.bf16.msra.mxu1 %v14103_v9  ;;  %7276 = vmatprep.subr.bf16.mxu0 %v14108_v63  ;;  %v14172_v9 = vld [vmem:[#allocation7 + $0x12c0] ss:$52 sps:$4 sm:$0xff]   ;;  %v14175_v63 = vld [vmem:[#allocation7 + $0x12c8] ss:$52 sps:$4 sm:$0xff]  }
 0x3f0   :  { %7440 = vmatprep.subr.bf16.mxu1 %v14111_v0  ;;  %v14180_v0 = vld [vmem:[#allocation7 + $0x132c] ss:$52 sps:$4 sm:$0xff]  }
 0x3f2   :  { %7277 = vmatpush1.bf16.msra.mxu0 %v14106_v1  ;;  %v14183_v1 = vld [vmem:[#allocation7 + $0x1334] ss:$52 sps:$4 sm:$0xff]  }
 0x3f3   :  { %7441 = vmatpush1.bf16.msra.mxu1 %v14109_v2  ;;  %7278 = vmatprep.subr.bf16.mxu0 %v14114_v3  ;;  %v14178_v2 = vld [vmem:[#allocation7 + $0x1328] ss:$52 sps:$4 sm:$0xff]   ;;  %v14181_v3 = vld [vmem:[#allocation7 + $0x1330] ss:$52 sps:$4 sm:$0xff]  }
 0x3f4   :  { %7442 = vmatprep.subr.bf16.mxu1 %v14117_v5  ;;  %v14186_v5 = vld [vmem:[#allocation7 + $0x1394] ss:$52 sps:$4 sm:$0xff]  }
 0x3f6   :  { %7279 = vmatpush1.bf16.msra.mxu0 %v14112_v6  ;;  %v14189_v6 = vld [vmem:[#allocation7 + $0x139c] ss:$52 sps:$4 sm:$0xff]  }
 0x3f7   :  { %7443 = vmatpush1.bf16.msra.mxu1 %v14115_v28  ;;  %7280 = vmatprep.subr.bf16.mxu0 %v14120_v7  ;;  %v14184_v28 = vld [vmem:[#allocation7 + $0x1390] ss:$52 sps:$4 sm:$0xff]   ;;  %v14187_v7 = vld [vmem:[#allocation7 + $0x1398] ss:$52 sps:$4 sm:$0xff]  }
 0x3f8   :  { %7444 = vmatprep.subr.bf16.mxu1 %v14123_v53  ;;  %v14192_v53 = vld [vmem:[#allocation7 + $0x13fc] ss:$52 sps:$4 sm:$0xff]  }
 0x3fa   :  { %7281 = vmatpush1.bf16.msra.mxu0 %v14118_v21  ;;  %v14195_v21 = vld [vmem:[#allocation7 + $0x1404] ss:$52 sps:$4 sm:$0xff]  }
 0x3fb   :  { %7445 = vmatpush1.bf16.msra.mxu1 %v14121_v13  ;;  %7282 = vmatprep.subr.bf16.mxu0 %v14126_v14  ;;  %v14190_v13 = vld [vmem:[#allocation7 + $0x13f8] ss:$52 sps:$4 sm:$0xff]   ;;  %v14193_v14 = vld [vmem:[#allocation7 + $0x1400] ss:$52 sps:$4 sm:$0xff]  }
 0x3fc   :  { %7446 = vmatprep.subr.bf16.mxu1 %v14129_v15  ;;  %v14198_v15 = vld [vmem:[#allocation7 + $0x24] ss:$52 sps:$4 sm:$0xff]  }
 0x3fe   :  { %7283 = vmatpush1.bf16.msra.mxu0 %v14124_v17  ;;  %v14201_v17 = vld [vmem:[#allocation7 + $0x2c] ss:$52 sps:$4 sm:$0xff]  }
 0x3ff   :  { %7447 = vmatpush1.bf16.msra.mxu1 %v14127_v18  ;;  %7284 = vmatprep.subr.bf16.mxu0 %v14132_v19  ;;  %v14196_v18 = vld [vmem:[#allocation7 + $0x20] ss:$52 sps:$4 sm:$0xff]   ;;  %v14199_v19 = vld [vmem:[#allocation7 + $0x28] ss:$52 sps:$4 sm:$0xff]  }
 0x400   :  { %7448 = vmatprep.subr.bf16.mxu1 %v14135_v20  ;;  %v14204_v20 = vld [vmem:[#allocation7 + $0x8c] ss:$52 sps:$4 sm:$0xff]  }
 0x402   :  { %7285 = vmatpush1.bf16.msra.mxu0 %v14130_v22  ;;  %v14207_v22 = vld [vmem:[#allocation7 + $0x94] ss:$52 sps:$4 sm:$0xff]  }
 0x403   :  { %7449 = vmatpush1.bf16.msra.mxu1 %v14133_v23  ;;  %7286 = vmatprep.subr.bf16.mxu0 %v14138_v24  ;;  %v14202_v23 = vld [vmem:[#allocation7 + $0x88] ss:$52 sps:$4 sm:$0xff]   ;;  %v14205_v24 = vld [vmem:[#allocation7 + $0x90] ss:$52 sps:$4 sm:$0xff]  }
 0x404   :  { %7450 = vmatprep.subr.bf16.mxu1 %v14141_v27  ;;  %v14210_v27 = vld [vmem:[#allocation7 + $0xf4] ss:$52 sps:$4 sm:$0xff]  }
 0x406   :  { %7287 = vmatpush1.bf16.msra.mxu0 %v14136_v29  ;;  %v14213_v29 = vld [vmem:[#allocation7 + $0xfc] ss:$52 sps:$4 sm:$0xff]  }
 0x407   :  { %7451 = vmatpush1.bf16.msra.mxu1 %v14139_v25  ;;  %7288 = vmatprep.subr.bf16.mxu0 %v14144_v32  ;;  %v14208_v25 = vld [vmem:[#allocation7 + $0xf0] ss:$52 sps:$4 sm:$0xff]   ;;  %v14211_v32 = vld [vmem:[#allocation7 + $0xf8] ss:$52 sps:$4 sm:$0xff]  }
 0x408   :  { %7452 = vmatprep.subr.bf16.mxu1 %v14147_v33  ;;  %v14216_v33 = vld [vmem:[#allocation7 + $0x15c] ss:$52 sps:$4 sm:$0xff]  }
 0x40a   :  { %7289 = vmatpush1.bf16.msra.mxu0 %v14142_v34 }
 0x40b   :  { %7453 = vmatpush1.bf16.msra.mxu1 %v14145_v36  ;;  %7290 = vmatprep.subr.bf16.mxu0 %v14150_v37  ;;  %v14219_v37 = vld [vmem:[#allocation7 + $0x164] ss:$52 sps:$4 sm:$0xff]  }
 0x40c   :  { %7454 = vmatprep.subr.bf16.mxu1 %v14153_v38 }
 0x40e   :  { %7291 = vmatpush1.bf16.msra.mxu0 %v14148_v52 }
 0x40f   :  { %7455 = vmatpush1.bf16.msra.mxu1 %v14151_v41  ;;  %7292 = vmatprep.subr.bf16.mxu0 %v14156_v42 }
 0x410   :  { %7456 = vmatprep.subr.bf16.mxu1 %v14159_v43  ;;  %v14214_v43 = vld [vmem:[#allocation7 + $0x158] ss:$52 sps:$4 sm:$0xff]  }
 0x412   :  { %7293 = vmatpush1.bf16.msra.mxu0 %v14154_v45 }
 0x413   :  { %7457 = vmatpush1.bf16.msra.mxu1 %v14157_v46  ;;  %7294 = vmatprep.subr.bf16.mxu0 %v14162_v47  ;;  %v14217_v47 = vld [vmem:[#allocation7 + $0x160] ss:$52 sps:$4 sm:$0xff]  }
 0x414   :  { %7458 = vmatprep.subr.bf16.mxu1 %v14165_v48  ;;  %v14222_v48 = vld [vmem:[#allocation7 + $0x1c4] ss:$52 sps:$4 sm:$0xff]  }
 0x416   :  { %7295 = vmatpush1.bf16.msra.mxu0 %v14160_v50  ;;  %v14225_v50 = vld [vmem:[#allocation7 + $0x1cc] ss:$52 sps:$4 sm:$0xff]  }
 0x417   :  { %7459 = vmatpush1.bf16.msra.mxu1 %v14163_v51  ;;  %7296 = vmatprep.subr.bf16.mxu0 %v14168_v55  ;;  %v14220_v51 = vld [vmem:[#allocation7 + $0x1c0] ss:$52 sps:$4 sm:$0xff]   ;;  %v14223_v55 = vld [vmem:[#allocation7 + $0x1c8] ss:$52 sps:$4 sm:$0xff]  }
 0x418   :  { %7460 = vmatprep.subr.bf16.mxu1 %v14171_v57  ;;  %v14228_v57 = vld [vmem:[#allocation7 + $0x22c] ss:$52 sps:$4 sm:$0xff]  }
 0x41a   :  { %7297 = vmatpush1.bf16.msra.mxu0 %v14166_v58  ;;  %v14231_v58 = vld [vmem:[#allocation7 + $0x234] ss:$52 sps:$4 sm:$0xff]  }
 0x41b   :  { %7461 = vmatpush1.bf16.msra.mxu1 %v14169_v61  ;;  %7298 = vmatprep.subr.bf16.mxu0 %v14174_v12  ;;  %v14226_v61 = vld [vmem:[#allocation7 + $0x228] ss:$52 sps:$4 sm:$0xff]   ;;  %v14229_v12 = vld [vmem:[#allocation7 + $0x230] ss:$52 sps:$4 sm:$0xff]  }
 0x41c   :  { %7462 = vmatprep.subr.bf16.mxu1 %v14177_v62  ;;  %v14234_v62 = vld [vmem:[#allocation7 + $0x294] ss:$52 sps:$4 sm:$0xff]  }
 0x41e   :  { %7299 = vmatpush1.bf16.msra.mxu0 %v14172_v9  ;;  %v14237_v9 = vld [vmem:[#allocation7 + $0x29c] ss:$52 sps:$4 sm:$0xff]  }
 0x41f   :  { %7463 = vmatpush1.bf16.msra.mxu1 %v14175_v63  ;;  %7300 = vmatprep.subr.bf16.mxu0 %v14180_v0  ;;  %v14232_v63 = vld [vmem:[#allocation7 + $0x290] ss:$52 sps:$4 sm:$0xff]   ;;  %v14235_v0 = vld [vmem:[#allocation7 + $0x298] ss:$52 sps:$4 sm:$0xff]  }
 0x420   :  { %7464 = vmatprep.subr.bf16.mxu1 %v14183_v1  ;;  %v14240_v1 = vld [vmem:[#allocation7 + $0x2fc] ss:$52 sps:$4 sm:$0xff]  }
 0x422   :  { %7301 = vmatpush1.bf16.msra.mxu0 %v14178_v2  ;;  %v14243_v2 = vld [vmem:[#allocation7 + $0x304] ss:$52 sps:$4 sm:$0xff]  }
 0x423   :  { %7465 = vmatpush1.bf16.msra.mxu1 %v14181_v3  ;;  %7311 = vmatprep.subr.bf16.mxu0 %v14186_v5  ;;  %v14238_v3 = vld [vmem:[#allocation7 + $0x2f8] ss:$52 sps:$4 sm:$0xff]   ;;  %v14241_v5 = vld [vmem:[#allocation7 + $0x300] ss:$52 sps:$4 sm:$0xff]  }
 0x424   :  { %7475 = vmatprep.subr.bf16.mxu1 %v14189_v6  ;;  %v14246_v6 = vld [vmem:[#allocation7 + $0x364] ss:$52 sps:$4 sm:$0xff]  }
 0x425   :  { %7303 = vmatmul.mubr.bf16.vlgmr.msra.gmra.mrb[28].mxu0 %v16469_v60 }
 0x426   :  { %7467 = vmatmul.mubr.bf16.vlgmr.msra.gmra.mrb[16].mxu1 %v16469_v60  ;;  %7312 = vmatpush1.bf16.msra.mxu0 %v14184_v28  ;;  %v14249_v28 = vld [vmem:[#allocation7 + $0x36c] ss:$52 sps:$4 sm:$0xff]  }
 0x427   :  { %7476 = vmatpush1.bf16.msra.mxu1 %v14187_v7  ;;  %7313 = vmatprep.subr.bf16.mxu0 %v14192_v53  ;;  %v14244_v7 = vld [vmem:[#allocation7 + $0x360] ss:$52 sps:$4 sm:$0xff]   ;;  %v14247_v53 = vld [vmem:[#allocation7 + $0x368] ss:$52 sps:$4 sm:$0xff]  }
 0x428   :  { %7477 = vmatprep.subr.bf16.mxu1 %v14195_v21  ;;  %7343 = vmatprep.mubr.bf16.mxu0 %v15380_v35  ;;  %v14252_v21 = vld [vmem:[#allocation7 + $0x3cc] ss:$52 sps:$4 sm:$0xff]  }
 0x429   :  { %7507 = vmatprep.mubr.bf16.mxu1 %v15380_v35 }
 0x42a   :  { %7314 = vmatpush1.bf16.msra.mxu0 %v14190_v13  ;;  %v14255_v13 = vld [vmem:[#allocation7 + $0x3d4] ss:$52 sps:$4 sm:$0xff]  }
 0x42b   :  { %7478 = vmatpush1.bf16.msra.mxu1 %v14193_v14  ;;  %7516 = vmatprep.subr.bf16.mxu0 %v14198_v15  ;;  %v14250_v14 = vld [vmem:[#allocation7 + $0x3c8] ss:$52 sps:$4 sm:$0xff]   ;;  %v14253_v15 = vld [vmem:[#allocation7 + $0x3d0] ss:$52 sps:$4 sm:$0xff]  }
 0x42c   :  { %7680 = vmatprep.subr.bf16.mxu1 %v14201_v17  ;;  %v14258_v17 = vld [vmem:[#allocation7 + $0x434] ss:$52 sps:$4 sm:$0xff]  }
 0x431   :  { %12356 = vmatmul.mubr.msk.bf16.vlgmr.msra.gmra.mrb[28].mxu0 %vm6856_vm4, %v16478_v4 }
 0x432   :  { %12357 = vmatmul.mubr.msk.bf16.vlgmr.msra.gmra.mrb[16].mxu1 %vm6856_vm4, %v16478_v4  ;;  %7517 = vmatpush1.bf16.msra.mxu0 %v14196_v18  ;;  %v14261_v18 = vld [vmem:[#allocation7 + $0x43c] ss:$52 sps:$4 sm:$0xff]  }
 0x433   :  { %7681 = vmatpush1.bf16.msra.mxu1 %v14199_v19  ;;  %7548 = vmatprep.mubr.bf16.mxu0 %v16435_v44  ;;  %v14256_v19 = vld [vmem:[#allocation7 + $0x430] ss:$52 sps:$4 sm:$0xff]  }
 0x434   :  { %7712 = vmatprep.mubr.bf16.mxu1 %v16435_v44  ;;  %7518 = vmatprep.subr.bf16.mxu0 %v14204_v20  ;;  %v14259_v20 = vld [vmem:[#allocation7 + $0x438] ss:$52 sps:$4 sm:$0xff]  }
 0x435   :  { %7682 = vmatprep.subr.bf16.mxu1 %v14207_v22  ;;  %v14264_v22 = vld [vmem:[#allocation7 + $0x49c] ss:$52 sps:$4 sm:$0xff]  }
 0x436   :  { %7519 = vmatpush1.bf16.msra.mxu0 %v14202_v23  ;;  %v14267_v23 = vld [vmem:[#allocation7 + $0x4a4] ss:$52 sps:$4 sm:$0xff]  }
 0x437   :  { %7683 = vmatpush1.bf16.msra.mxu1 %v14205_v24  ;;  %7520 = vmatprep.subr.bf16.mxu0 %v14210_v27  ;;  %v14262_v24 = vld [vmem:[#allocation7 + $0x498] ss:$52 sps:$4 sm:$0xff]   ;;  %v14265_v27 = vld [vmem:[#allocation7 + $0x4a0] ss:$52 sps:$4 sm:$0xff]  }
 0x438   :  { %7684 = vmatprep.subr.bf16.mxu1 %v14213_v29  ;;  %v16504_v34 = vpop.f32.mrb[24].mxu0  ;;  %v16506_v36 = vpop.f32.mrb[12].mxu1  ;;  %v14270_v29 = vld [vmem:[#allocation7 + $0x504] ss:$52 sps:$4 sm:$0xff]  }
 0x439   :  { %v16508_v38 = vpop.f32.mrb[25].mxu0  ;;  %v16510_v52 = vpop.f32.mrb[13].mxu1 }
 0x43a   :  { %7521 = vmatpush1.bf16.msra.mxu0 %v14208_v25  ;;  %v7021_v41 = vpop.f32.mrb[26].mxu0  ;;  %v7185_v42 = vpop.f32.mrb[14].mxu1  ;;  %v14273_v25 = vld [vmem:[#allocation7 + $0x50c] ss:$52 sps:$4 sm:$0xff]  }
 0x43b   :  { %7685 = vmatpush1.bf16.msra.mxu1 %v14211_v32  ;;  %v7022_v45 = vpop.f32.mrb[27].mxu0  ;;  %v7186_v46 = vpop.f32.mrb[15].mxu1  ;;  %7522 = vmatprep.subr.bf16.mxu0 %v14216_v33  ;;  %v14268_v32 = vld [vmem:[#allocation7 + $0x500] ss:$52 sps:$4 sm:$0xff]   ;;  %v14271_v33 = vld [vmem:[#allocation7 + $0x508] ss:$52 sps:$4 sm:$0xff]  }
 0x43c   :  { %7686 = vmatprep.subr.bf16.mxu1 %v14219_v37  ;;  %v14276_v37 = vld [vmem:[#allocation7 + $0x56c] ss:$52 sps:$4 sm:$0xff]   ;;  %v14279_v41 = vld [vmem:[#allocation7 + $0x574] ss:$52 sps:$4 sm:$0xff]   ;;  %v14285_v46 = vld [vmem:[#allocation7 + $0x5dc] ss:$52 sps:$4 sm:$0xff]  }
 0x43d   :  { %v14274_v42 = vld [vmem:[#allocation7 + $0x568] ss:$52 sps:$4 sm:$0xff]  }
 0x43e   :  { %7523 = vmatpush1.bf16.msra.mxu0 %v14214_v43  ;;  %v14277_v43 = vld [vmem:[#allocation7 + $0x570] ss:$52 sps:$4 sm:$0xff]   ;;  %v14282_v45 = vld [vmem:[#allocation7 + $0x5d4] ss:$52 sps:$4 sm:$0xff]  }
 0x43f   :  { %7687 = vmatpush1.bf16.msra.mxu1 %v14217_v47  ;;  %7524 = vmatprep.subr.bf16.mxu0 %v14222_v48  ;;  %v14280_v47 = vld [vmem:[#allocation7 + $0x5d0] ss:$52 sps:$4 sm:$0xff]   ;;  %v14283_v48 = vld [vmem:[#allocation7 + $0x5d8] ss:$52 sps:$4 sm:$0xff]  }
 0x440   :  { %7688 = vmatprep.subr.bf16.mxu1 %v14225_v50  ;;  %v14288_v50 = vld [vmem:[#allocation7 + $0x63c] ss:$52 sps:$4 sm:$0xff]  }
 0x442   :  { %7525 = vmatpush1.bf16.msra.mxu0 %v14220_v51  ;;  %v14291_v51 = vld [vmem:[#allocation7 + $0x644] ss:$52 sps:$4 sm:$0xff]  }
 0x443   :  { %7689 = vmatpush1.bf16.msra.mxu1 %v14223_v55  ;;  %7526 = vmatprep.subr.bf16.mxu0 %v14228_v57  ;;  %v14286_v55 = vld [vmem:[#allocation7 + $0x638] ss:$52 sps:$4 sm:$0xff]   ;;  %v14289_v57 = vld [vmem:[#allocation7 + $0x640] ss:$52 sps:$4 sm:$0xff]  }
 0x444   :  { %7690 = vmatprep.subr.bf16.mxu1 %v14231_v58  ;;  %v14294_v58 = vld [vmem:[#allocation7 + $0x6a4] ss:$52 sps:$4 sm:$0xff]  }
 0x446   :  { %7527 = vmatpush1.bf16.msra.mxu0 %v14226_v61  ;;  %v14297_v61 = vld [vmem:[#allocation7 + $0x6ac] ss:$52 sps:$4 sm:$0xff]  }
 0x447   :  { %7691 = vmatpush1.bf16.msra.mxu1 %v14229_v12  ;;  %7528 = vmatprep.subr.bf16.mxu0 %v14234_v62  ;;  %v14292_v12 = vld [vmem:[#allocation7 + $0x6a0] ss:$52 sps:$4 sm:$0xff]   ;;  %v14295_v62 = vld [vmem:[#allocation7 + $0x6a8] ss:$52 sps:$4 sm:$0xff]  }
 0x448   :  { %7692 = vmatprep.subr.bf16.mxu1 %v14237_v9  ;;  %v14300_v9 = vld [vmem:[#allocation7 + $0x70c] ss:$52 sps:$4 sm:$0xff]  }
 0x44a   :  { %7529 = vmatpush1.bf16.msra.mxu0 %v14232_v63  ;;  %v14303_v63 = vld [vmem:[#allocation7 + $0x714] ss:$52 sps:$4 sm:$0xff]  }
 0x44b   :  { %7693 = vmatpush1.bf16.msra.mxu1 %v14235_v0  ;;  %7530 = vmatprep.subr.bf16.mxu0 %v14240_v1  ;;  %v14298_v0 = vld [vmem:[#allocation7 + $0x708] ss:$52 sps:$4 sm:$0xff]   ;;  %v14301_v1 = vld [vmem:[#allocation7 + $0x710] ss:$52 sps:$4 sm:$0xff]  }
 0x44c   :  { %7694 = vmatprep.subr.bf16.mxu1 %v14243_v2  ;;  %v14306_v2 = vld [vmem:[#allocation7 + $0x774] ss:$52 sps:$4 sm:$0xff]  }
 0x44e   :  { %7531 = vmatpush1.bf16.msra.mxu0 %v14238_v3  ;;  %v14309_v3 = vld [vmem:[#allocation7 + $0x77c] ss:$52 sps:$4 sm:$0xff]  }
 0x44f   :  { %7695 = vmatpush1.bf16.msra.mxu1 %v14241_v5  ;;  %7532 = vmatprep.subr.bf16.mxu0 %v14246_v6  ;;  %v14304_v5 = vld [vmem:[#allocation7 + $0x770] ss:$52 sps:$4 sm:$0xff]   ;;  %v14307_v6 = vld [vmem:[#allocation7 + $0x778] ss:$52 sps:$4 sm:$0xff]  }
 0x450   :  { %7696 = vmatprep.subr.bf16.mxu1 %v14249_v28  ;;  %v14312_v28 = vld [vmem:[#allocation7 + $0x7dc] ss:$52 sps:$4 sm:$0xff]  }
 0x452   :  { %7533 = vmatpush1.bf16.msra.mxu0 %v14244_v7  ;;  %v14315_v7 = vld [vmem:[#allocation7 + $0x7e4] ss:$52 sps:$4 sm:$0xff]  }
 0x453   :  { %7697 = vmatpush1.bf16.msra.mxu1 %v14247_v53  ;;  %7534 = vmatprep.subr.bf16.mxu0 %v14252_v21  ;;  %v14310_v53 = vld [vmem:[#allocation7 + $0x7d8] ss:$52 sps:$4 sm:$0xff]   ;;  %v14313_v21 = vld [vmem:[#allocation7 + $0x7e0] ss:$52 sps:$4 sm:$0xff]  }
 0x454   :  { %7698 = vmatprep.subr.bf16.mxu1 %v14255_v13  ;;  %v14318_v13 = vld [vmem:[#allocation7 + $0x844] ss:$52 sps:$4 sm:$0xff]  }
 0x456   :  { %7535 = vmatpush1.bf16.msra.mxu0 %v14250_v14  ;;  %v14321_v14 = vld [vmem:[#allocation7 + $0x84c] ss:$52 sps:$4 sm:$0xff]  }
 0x457   :  { %7699 = vmatpush1.bf16.msra.mxu1 %v14253_v15  ;;  %7536 = vmatprep.subr.bf16.mxu0 %v14258_v17  ;;  %v14316_v15 = vld [vmem:[#allocation7 + $0x840] ss:$52 sps:$4 sm:$0xff]   ;;  %v14319_v17 = vld [vmem:[#allocation7 + $0x848] ss:$52 sps:$4 sm:$0xff]  }
 0x458   :  { %7700 = vmatprep.subr.bf16.mxu1 %v14261_v18  ;;  %v14324_v18 = vld [vmem:[#allocation7 + $0x8ac] ss:$52 sps:$4 sm:$0xff]  }
 0x45a   :  { %7537 = vmatpush1.bf16.msra.mxu0 %v14256_v19  ;;  %v14327_v19 = vld [vmem:[#allocation7 + $0x8b4] ss:$52 sps:$4 sm:$0xff]  }
 0x45b   :  { %7701 = vmatpush1.bf16.msra.mxu1 %v14259_v20  ;;  %7538 = vmatprep.subr.bf16.mxu0 %v14264_v22  ;;  %v14322_v20 = vld [vmem:[#allocation7 + $0x8a8] ss:$52 sps:$4 sm:$0xff]   ;;  %v14325_v22 = vld [vmem:[#allocation7 + $0x8b0] ss:$52 sps:$4 sm:$0xff]  }
 0x45c   :  { %7702 = vmatprep.subr.bf16.mxu1 %v14267_v23  ;;  %v14330_v23 = vld [vmem:[#allocation7 + $0x914] ss:$52 sps:$4 sm:$0xff]  }
 0x45e   :  { %7539 = vmatpush1.bf16.msra.mxu0 %v14262_v24  ;;  %v14333_v24 = vld [vmem:[#allocation7 + $0x91c] ss:$52 sps:$4 sm:$0xff]  }
 0x45f   :  { %7703 = vmatpush1.bf16.msra.mxu1 %v14265_v27  ;;  %7540 = vmatprep.subr.bf16.mxu0 %v14270_v29  ;;  %v14328_v27 = vld [vmem:[#allocation7 + $0x910] ss:$52 sps:$4 sm:$0xff]   ;;  %v14331_v29 = vld [vmem:[#allocation7 + $0x918] ss:$52 sps:$4 sm:$0xff]  }
 0x460   :  { %7704 = vmatprep.subr.bf16.mxu1 %v14273_v25  ;;  %v14336_v25 = vld [vmem:[#allocation7 + $0x97c] ss:$52 sps:$4 sm:$0xff]  }
 0x462   :  { %7541 = vmatpush1.bf16.msra.mxu0 %v14268_v32  ;;  %v14339_v32 = vld [vmem:[#allocation7 + $0x984] ss:$52 sps:$4 sm:$0xff]  }
 0x463   :  { %7705 = vmatpush1.bf16.msra.mxu1 %v14271_v33  ;;  %7542 = vmatprep.subr.bf16.mxu0 %v14276_v37  ;;  %v14334_v33 = vld [vmem:[#allocation7 + $0x978] ss:$52 sps:$4 sm:$0xff]   ;;  %v14337_v37 = vld [vmem:[#allocation7 + $0x980] ss:$52 sps:$4 sm:$0xff]  }
 0x464   :  { %7706 = vmatprep.subr.bf16.mxu1 %v14279_v41  ;;  %v14342_v41 = vld [vmem:[#allocation7 + $0x9e4] ss:$52 sps:$4 sm:$0xff]  }
 0x466   :  { %7543 = vmatpush1.bf16.msra.mxu0 %v14274_v42  ;;  %v14345_v42 = vld [vmem:[#allocation7 + $0x9ec] ss:$52 sps:$4 sm:$0xff]  }
 0x467   :  { %7707 = vmatpush1.bf16.msra.mxu1 %v14277_v43  ;;  %7544 = vmatprep.subr.bf16.mxu0 %v14282_v45  ;;  %v14340_v43 = vld [vmem:[#allocation7 + $0x9e0] ss:$52 sps:$4 sm:$0xff]   ;;  %v14343_v45 = vld [vmem:[#allocation7 + $0x9e8] ss:$52 sps:$4 sm:$0xff]  }
 0x468   :  { %7708 = vmatprep.subr.bf16.mxu1 %v14285_v46  ;;  %v14348_v46 = vld [vmem:[#allocation7 + $0xa4c] ss:$52 sps:$4 sm:$0xff]  }
 0x46a   :  { %7545 = vmatpush1.bf16.msra.mxu0 %v14280_v47  ;;  %v14351_v47 = vld [vmem:[#allocation7 + $0xa54] ss:$52 sps:$4 sm:$0xff]  }
 0x46b   :  { %7709 = vmatpush1.bf16.msra.mxu1 %v14283_v48  ;;  %7546 = vmatprep.subr.bf16.mxu0 %v14288_v50  ;;  %v14346_v48 = vld [vmem:[#allocation7 + $0xa48] ss:$52 sps:$4 sm:$0xff]   ;;  %v14349_v50 = vld [vmem:[#allocation7 + $0xa50] ss:$52 sps:$4 sm:$0xff]  }
 0x46c   :  { %7710 = vmatprep.subr.bf16.mxu1 %v14291_v51  ;;  %v14354_v51 = vld [vmem:[#allocation7 + $0xab4] ss:$52 sps:$4 sm:$0xff]  }
 0x46e   :  { %7547 = vmatpush1.bf16.msra.mxu0 %v14286_v55  ;;  %v14357_v55 = vld [vmem:[#allocation7 + $0xabc] ss:$52 sps:$4 sm:$0xff]  }
 0x46f   :  { %7711 = vmatpush1.bf16.msra.mxu1 %v14289_v57  ;;  %7557 = vmatprep.subr.bf16.mxu0 %v14294_v58  ;;  %v14352_v57 = vld [vmem:[#allocation7 + $0xab0] ss:$52 sps:$4 sm:$0xff]   ;;  %v14355_v58 = vld [vmem:[#allocation7 + $0xab8] ss:$52 sps:$4 sm:$0xff]  }
 0x470   :  { %7721 = vmatprep.subr.bf16.mxu1 %v14297_v61  ;;  %v14360_v61 = vld [vmem:[#allocation7 + $0xb1c] ss:$52 sps:$4 sm:$0xff]  }
 0x471   :  { %7549 = vmatmul.mubr.bf16.vlgmr.msra.gmra.mrb[32].mxu0 %v16437_v39 }
 0x472   :  { %7713 = vmatmul.mubr.bf16.vlgmr.msra.gmra.mrb[20].mxu1 %v16437_v39  ;;  %7558 = vmatpush1.bf16.msra.mxu0 %v14292_v12  ;;  %v14363_v12 = vld [vmem:[#allocation7 + $0xb24] ss:$52 sps:$4 sm:$0xff]  }
 0x473   :  { %7589 = vmatprep.mubr.bf16.mxu0 %v16441_v49  ;;  %7722 = vmatpush1.bf16.msra.mxu1 %v14295_v62  ;;  %v14358_v62 = vld [vmem:[#allocation7 + $0xb18] ss:$52 sps:$4 sm:$0xff]  }
 0x474   :  { %7753 = vmatprep.mubr.bf16.mxu1 %v16441_v49  ;;  %7559 = vmatprep.subr.bf16.mxu0 %v14300_v9  ;;  %v14361_v9 = vld [vmem:[#allocation7 + $0xb20] ss:$52 sps:$4 sm:$0xff]  }
 0x475   :  { %7723 = vmatprep.subr.bf16.mxu1 %v14303_v63  ;;  %v14366_v63 = vld [vmem:[#allocation7 + $0xb84] ss:$52 sps:$4 sm:$0xff]  }
 0x476   :  { %7560 = vmatpush1.bf16.msra.mxu0 %v14298_v0  ;;  %v14369_v0 = vld [vmem:[#allocation7 + $0xb8c] ss:$52 sps:$4 sm:$0xff]  }
 0x477   :  { %7724 = vmatpush1.bf16.msra.mxu1 %v14301_v1  ;;  %7561 = vmatprep.subr.bf16.mxu0 %v14306_v2  ;;  %v14364_v1 = vld [vmem:[#allocation7 + $0xb80] ss:$52 sps:$4 sm:$0xff]   ;;  %v14367_v2 = vld [vmem:[#allocation7 + $0xb88] ss:$52 sps:$4 sm:$0xff]  }
 0x478   :  { %7725 = vmatprep.subr.bf16.mxu1 %v14309_v3  ;;  %v14372_v3 = vld [vmem:[#allocation7 + $0xbec] ss:$52 sps:$4 sm:$0xff]  }
 0x47a   :  { %7562 = vmatpush1.bf16.msra.mxu0 %v14304_v5  ;;  %v14375_v5 = vld [vmem:[#allocation7 + $0xbf4] ss:$52 sps:$4 sm:$0xff]  }
 0x47b   :  { %7726 = vmatpush1.bf16.msra.mxu1 %v14307_v6  ;;  %7563 = vmatprep.subr.bf16.mxu0 %v14312_v28  ;;  %v14370_v6 = vld [vmem:[#allocation7 + $0xbe8] ss:$52 sps:$4 sm:$0xff]   ;;  %v14373_v28 = vld [vmem:[#allocation7 + $0xbf0] ss:$52 sps:$4 sm:$0xff]  }
 0x47c   :  { %7727 = vmatprep.subr.bf16.mxu1 %v14315_v7  ;;  %v14378_v7 = vld [vmem:[#allocation7 + $0xc54] ss:$52 sps:$4 sm:$0xff]  }
 0x47e   :  { %7564 = vmatpush1.bf16.msra.mxu0 %v14310_v53  ;;  %v14381_v53 = vld [vmem:[#allocation7 + $0xc5c] ss:$52 sps:$4 sm:$0xff]  }
 0x47f   :  { %7728 = vmatpush1.bf16.msra.mxu1 %v14313_v21  ;;  %7565 = vmatprep.subr.bf16.mxu0 %v14318_v13  ;;  %v14376_v21 = vld [vmem:[#allocation7 + $0xc50] ss:$52 sps:$4 sm:$0xff]   ;;  %v14379_v13 = vld [vmem:[#allocation7 + $0xc58] ss:$52 sps:$4 sm:$0xff]  }
 0x480   :  { %7729 = vmatprep.subr.bf16.mxu1 %v14321_v14  ;;  %v14384_v14 = vld [vmem:[#allocation7 + $0xcbc] ss:$52 sps:$4 sm:$0xff]  }
 0x482   :  { %7566 = vmatpush1.bf16.msra.mxu0 %v14316_v15  ;;  %v14387_v15 = vld [vmem:[#allocation7 + $0xcc4] ss:$52 sps:$4 sm:$0xff]  }
 0x483   :  { %7730 = vmatpush1.bf16.msra.mxu1 %v14319_v17  ;;  %7567 = vmatprep.subr.bf16.mxu0 %v14324_v18  ;;  %v14382_v17 = vld [vmem:[#allocation7 + $0xcb8] ss:$52 sps:$4 sm:$0xff]   ;;  %v14385_v18 = vld [vmem:[#allocation7 + $0xcc0] ss:$52 sps:$4 sm:$0xff]  }
 0x484   :  { %7731 = vmatprep.subr.bf16.mxu1 %v14327_v19  ;;  %v14390_v19 = vld [vmem:[#allocation7 + $0xd24] ss:$52 sps:$4 sm:$0xff]  }
 0x486   :  { %7568 = vmatpush1.bf16.msra.mxu0 %v14322_v20  ;;  %v14393_v20 = vld [vmem:[#allocation7 + $0xd2c] ss:$52 sps:$4 sm:$0xff]  }
 0x487   :  { %7732 = vmatpush1.bf16.msra.mxu1 %v14325_v22  ;;  %7569 = vmatprep.subr.bf16.mxu0 %v14330_v23  ;;  %v14388_v22 = vld [vmem:[#allocation7 + $0xd20] ss:$52 sps:$4 sm:$0xff]   ;;  %v14391_v23 = vld [vmem:[#allocation7 + $0xd28] ss:$52 sps:$4 sm:$0xff]  }
 0x488   :  { %7733 = vmatprep.subr.bf16.mxu1 %v14333_v24  ;;  %v14396_v24 = vld [vmem:[#allocation7 + $0xd8c] ss:$52 sps:$4 sm:$0xff]  }
 0x48a   :  { %7570 = vmatpush1.bf16.msra.mxu0 %v14328_v27  ;;  %v14399_v27 = vld [vmem:[#allocation7 + $0xd94] ss:$52 sps:$4 sm:$0xff]  }
 0x48b   :  { %7734 = vmatpush1.bf16.msra.mxu1 %v14331_v29  ;;  %7571 = vmatprep.subr.bf16.mxu0 %v14336_v25  ;;  %v14394_v29 = vld [vmem:[#allocation7 + $0xd88] ss:$52 sps:$4 sm:$0xff]   ;;  %v14397_v25 = vld [vmem:[#allocation7 + $0xd90] ss:$52 sps:$4 sm:$0xff]  }
 0x48c   :  { %7735 = vmatprep.subr.bf16.mxu1 %v14339_v32  ;;  %v14402_v32 = vld [vmem:[#allocation7 + $0xdf4] ss:$52 sps:$4 sm:$0xff]  }
 0x48e   :  { %7572 = vmatpush1.bf16.msra.mxu0 %v14334_v33  ;;  %v14405_v33 = vld [vmem:[#allocation7 + $0xdfc] ss:$52 sps:$4 sm:$0xff]  }
 0x48f   :  { %7736 = vmatpush1.bf16.msra.mxu1 %v14337_v37  ;;  %7573 = vmatprep.subr.bf16.mxu0 %v14342_v41  ;;  %v14400_v37 = vld [vmem:[#allocation7 + $0xdf0] ss:$52 sps:$4 sm:$0xff]   ;;  %v14403_v41 = vld [vmem:[#allocation7 + $0xdf8] ss:$52 sps:$4 sm:$0xff]  }
 0x490   :  { %7737 = vmatprep.subr.bf16.mxu1 %v14345_v42  ;;  %v14408_v42 = vld [vmem:[#allocation7 + $0xe5c] ss:$52 sps:$4 sm:$0xff]  }
 0x492   :  { %7574 = vmatpush1.bf16.msra.mxu0 %v14340_v43  ;;  %v14411_v43 = vld [vmem:[#allocation7 + $0xe64] ss:$52 sps:$4 sm:$0xff]  }
 0x493   :  { %7738 = vmatpush1.bf16.msra.mxu1 %v14343_v45  ;;  %7575 = vmatprep.subr.bf16.mxu0 %v14348_v46  ;;  %v14406_v45 = vld [vmem:[#allocation7 + $0xe58] ss:$52 sps:$4 sm:$0xff]   ;;  %v14409_v46 = vld [vmem:[#allocation7 + $0xe60] ss:$52 sps:$4 sm:$0xff]  }
 0x494   :  { %7739 = vmatprep.subr.bf16.mxu1 %v14351_v47  ;;  %v14414_v47 = vld [vmem:[#allocation7 + $0xec4] ss:$52 sps:$4 sm:$0xff]  }
 0x496   :  { %7576 = vmatpush1.bf16.msra.mxu0 %v14346_v48  ;;  %v14417_v48 = vld [vmem:[#allocation7 + $0xecc] ss:$52 sps:$4 sm:$0xff]  }
 0x497   :  { %7740 = vmatpush1.bf16.msra.mxu1 %v14349_v50  ;;  %7577 = vmatprep.subr.bf16.mxu0 %v14354_v51  ;;  %v14412_v50 = vld [vmem:[#allocation7 + $0xec0] ss:$52 sps:$4 sm:$0xff]   ;;  %v14415_v51 = vld [vmem:[#allocation7 + $0xec8] ss:$52 sps:$4 sm:$0xff]  }
 0x498   :  { %7741 = vmatprep.subr.bf16.mxu1 %v14357_v55  ;;  %v14420_v55 = vld [vmem:[#allocation7 + $0xf2c] ss:$52 sps:$4 sm:$0xff]  }
 0x49a   :  { %7578 = vmatpush1.bf16.msra.mxu0 %v14352_v57  ;;  %v14423_v57 = vld [vmem:[#allocation7 + $0xf34] ss:$52 sps:$4 sm:$0xff]  }
 0x49b   :  { %7742 = vmatpush1.bf16.msra.mxu1 %v14355_v58  ;;  %7579 = vmatprep.subr.bf16.mxu0 %v14360_v61  ;;  %v14418_v58 = vld [vmem:[#allocation7 + $0xf28] ss:$52 sps:$4 sm:$0xff]   ;;  %v14421_v61 = vld [vmem:[#allocation7 + $0xf30] ss:$52 sps:$4 sm:$0xff]  }
 0x49c   :  { %7743 = vmatprep.subr.bf16.mxu1 %v14363_v12  ;;  %v14426_v12 = vld [vmem:[#allocation7 + $0xf94] ss:$52 sps:$4 sm:$0xff]  }
 0x49e   :  { %7580 = vmatpush1.bf16.msra.mxu0 %v14358_v62  ;;  %v14429_v62 = vld [vmem:[#allocation7 + $0xf9c] ss:$52 sps:$4 sm:$0xff]  }
 0x49f   :  { %7744 = vmatpush1.bf16.msra.mxu1 %v14361_v9  ;;  %7581 = vmatprep.subr.bf16.mxu0 %v14366_v63  ;;  %v14424_v9 = vld [vmem:[#allocation7 + $0xf90] ss:$52 sps:$4 sm:$0xff]   ;;  %v14427_v63 = vld [vmem:[#allocation7 + $0xf98] ss:$52 sps:$4 sm:$0xff]  }
 0x4a0   :  { %7745 = vmatprep.subr.bf16.mxu1 %v14369_v0  ;;  %v14432_v0 = vld [vmem:[#allocation7 + $0xffc] ss:$52 sps:$4 sm:$0xff]  }
 0x4a2   :  { %7582 = vmatpush1.bf16.msra.mxu0 %v14364_v1  ;;  %v14435_v1 = vld [vmem:[#allocation7 + $0x1004] ss:$52 sps:$4 sm:$0xff]  }
 0x4a3   :  { %7746 = vmatpush1.bf16.msra.mxu1 %v14367_v2  ;;  %7583 = vmatprep.subr.bf16.mxu0 %v14372_v3  ;;  %v14430_v2 = vld [vmem:[#allocation7 + $0xff8] ss:$52 sps:$4 sm:$0xff]   ;;  %v14433_v3 = vld [vmem:[#allocation7 + $0x1000] ss:$52 sps:$4 sm:$0xff]  }
 0x4a4   :  { %7747 = vmatprep.subr.bf16.mxu1 %v14375_v5  ;;  %v14438_v5 = vld [vmem:[#allocation7 + $0x1064] ss:$52 sps:$4 sm:$0xff]  }
 0x4a6   :  { %7584 = vmatpush1.bf16.msra.mxu0 %v14370_v6  ;;  %v14441_v6 = vld [vmem:[#allocation7 + $0x106c] ss:$52 sps:$4 sm:$0xff]  }
 0x4a7   :  { %7748 = vmatpush1.bf16.msra.mxu1 %v14373_v28  ;;  %7585 = vmatprep.subr.bf16.mxu0 %v14378_v7  ;;  %v14436_v28 = vld [vmem:[#allocation7 + $0x1060] ss:$52 sps:$4 sm:$0xff]   ;;  %v14439_v7 = vld [vmem:[#allocation7 + $0x1068] ss:$52 sps:$4 sm:$0xff]  }
 0x4a8   :  { %7749 = vmatprep.subr.bf16.mxu1 %v14381_v53  ;;  %v14444_v53 = vld [vmem:[#allocation7 + $0x10cc] ss:$52 sps:$4 sm:$0xff]  }
 0x4aa   :  { %7586 = vmatpush1.bf16.msra.mxu0 %v14376_v21  ;;  %v14447_v21 = vld [vmem:[#allocation7 + $0x10d4] ss:$52 sps:$4 sm:$0xff]  }
 0x4ab   :  { %7750 = vmatpush1.bf16.msra.mxu1 %v14379_v13  ;;  %7587 = vmatprep.subr.bf16.mxu0 %v14384_v14  ;;  %v14442_v13 = vld [vmem:[#allocation7 + $0x10c8] ss:$52 sps:$4 sm:$0xff]   ;;  %v14445_v14 = vld [vmem:[#allocation7 + $0x10d0] ss:$52 sps:$4 sm:$0xff]  }
 0x4ac   :  { %7751 = vmatprep.subr.bf16.mxu1 %v14387_v15  ;;  %v14450_v15 = vld [vmem:[#allocation7 + $0x1134] ss:$52 sps:$4 sm:$0xff]  }
 0x4ae   :  { %7588 = vmatpush1.bf16.msra.mxu0 %v14382_v17  ;;  %v14453_v17 = vld [vmem:[#allocation7 + $0x113c] ss:$52 sps:$4 sm:$0xff]  }
 0x4af   :  { %7752 = vmatpush1.bf16.msra.mxu1 %v14385_v18  ;;  %7598 = vmatprep.subr.bf16.mxu0 %v14390_v19  ;;  %v14448_v18 = vld [vmem:[#allocation7 + $0x1130] ss:$52 sps:$4 sm:$0xff]   ;;  %v14451_v19 = vld [vmem:[#allocation7 + $0x1138] ss:$52 sps:$4 sm:$0xff]  }
 0x4b0   :  { %7762 = vmatprep.subr.bf16.mxu1 %v14393_v20  ;;  %v14456_v20 = vld [vmem:[#allocation7 + $0x119c] ss:$52 sps:$4 sm:$0xff]  }
 0x4b1   :  { %7590 = vmatmul.mubr.bf16.vlgmr.msra.gmra.mrb[32].mxu0 %v16457_v16 }
 0x4b2   :  { %7754 = vmatmul.mubr.bf16.vlgmr.msra.gmra.mrb[20].mxu1 %v16457_v16  ;;  %7599 = vmatpush1.bf16.msra.mxu0 %v14388_v22  ;;  %v14459_v22 = vld [vmem:[#allocation7 + $0x11a4] ss:$52 sps:$4 sm:$0xff]  }
 0x4b3   :  { %7630 = vmatprep.mubr.bf16.mxu0 %v16467_v59  ;;  %7763 = vmatpush1.bf16.msra.mxu1 %v14391_v23  ;;  %v14454_v23 = vld [vmem:[#allocation7 + $0x1198] ss:$52 sps:$4 sm:$0xff]  }
 0x4b4   :  { %7794 = vmatprep.mubr.bf16.mxu1 %v16467_v59  ;;  %7600 = vmatprep.subr.bf16.mxu0 %v14396_v24  ;;  %v14457_v24 = vld [vmem:[#allocation7 + $0x11a0] ss:$52 sps:$4 sm:$0xff]  }
 0x4b5   :  { %7764 = vmatprep.subr.bf16.mxu1 %v14399_v27  ;;  %v14462_v27 = vld [vmem:[#allocation7 + $0x1204] ss:$52 sps:$4 sm:$0xff]  }
 0x4b6   :  { %7601 = vmatpush1.bf16.msra.mxu0 %v14394_v29  ;;  %v14465_v29 = vld [vmem:[#allocation7 + $0x120c] ss:$52 sps:$4 sm:$0xff]  }
 0x4b7   :  { %7765 = vmatpush1.bf16.msra.mxu1 %v14397_v25  ;;  %7602 = vmatprep.subr.bf16.mxu0 %v14402_v32  ;;  %v14460_v25 = vld [vmem:[#allocation7 + $0x1200] ss:$52 sps:$4 sm:$0xff]   ;;  %v14463_v32 = vld [vmem:[#allocation7 + $0x1208] ss:$52 sps:$4 sm:$0xff]  }
 0x4b8   :  { %7766 = vmatprep.subr.bf16.mxu1 %v14405_v33  ;;  %v14468_v33 = vld [vmem:[#allocation7 + $0x126c] ss:$52 sps:$4 sm:$0xff]  }
 0x4ba   :  { %7603 = vmatpush1.bf16.msra.mxu0 %v14400_v37  ;;  %v14471_v37 = vld [vmem:[#allocation7 + $0x1274] ss:$52 sps:$4 sm:$0xff]  }
 0x4bb   :  { %7767 = vmatpush1.bf16.msra.mxu1 %v14403_v41  ;;  %7604 = vmatprep.subr.bf16.mxu0 %v14408_v42  ;;  %v14466_v41 = vld [vmem:[#allocation7 + $0x1268] ss:$52 sps:$4 sm:$0xff]   ;;  %v14469_v42 = vld [vmem:[#allocation7 + $0x1270] ss:$52 sps:$4 sm:$0xff]  }
 0x4bc   :  { %7768 = vmatprep.subr.bf16.mxu1 %v14411_v43  ;;  %v14474_v43 = vld [vmem:[#allocation7 + $0x12d4] ss:$52 sps:$4 sm:$0xff]  }
 0x4be   :  { %7605 = vmatpush1.bf16.msra.mxu0 %v14406_v45  ;;  %v14477_v45 = vld [vmem:[#allocation7 + $0x12dc] ss:$52 sps:$4 sm:$0xff]  }
 0x4bf   :  { %7769 = vmatpush1.bf16.msra.mxu1 %v14409_v46  ;;  %7606 = vmatprep.subr.bf16.mxu0 %v14414_v47  ;;  %v14472_v46 = vld [vmem:[#allocation7 + $0x12d0] ss:$52 sps:$4 sm:$0xff]   ;;  %v14475_v47 = vld [vmem:[#allocation7 + $0x12d8] ss:$52 sps:$4 sm:$0xff]  }
 0x4c0   :  { %7770 = vmatprep.subr.bf16.mxu1 %v14417_v48  ;;  %v14480_v48 = vld [vmem:[#allocation7 + $0x133c] ss:$52 sps:$4 sm:$0xff]  }
 0x4c2   :  { %7607 = vmatpush1.bf16.msra.mxu0 %v14412_v50  ;;  %v14483_v50 = vld [vmem:[#allocation7 + $0x1344] ss:$52 sps:$4 sm:$0xff]  }
 0x4c3   :  { %7771 = vmatpush1.bf16.msra.mxu1 %v14415_v51  ;;  %7608 = vmatprep.subr.bf16.mxu0 %v14420_v55  ;;  %v14478_v51 = vld [vmem:[#allocation7 + $0x1338] ss:$52 sps:$4 sm:$0xff]   ;;  %v14481_v55 = vld [vmem:[#allocation7 + $0x1340] ss:$52 sps:$4 sm:$0xff]  }
 0x4c4   :  { %7772 = vmatprep.subr.bf16.mxu1 %v14423_v57  ;;  %v14486_v57 = vld [vmem:[#allocation7 + $0x13a4] ss:$52 sps:$4 sm:$0xff]  }
 0x4c6   :  { %7609 = vmatpush1.bf16.msra.mxu0 %v14418_v58  ;;  %v14489_v58 = vld [vmem:[#allocation7 + $0x13ac] ss:$52 sps:$4 sm:$0xff]  }
 0x4c7   :  { %7773 = vmatpush1.bf16.msra.mxu1 %v14421_v61  ;;  %7610 = vmatprep.subr.bf16.mxu0 %v14426_v12  ;;  %v14484_v61 = vld [vmem:[#allocation7 + $0x13a0] ss:$52 sps:$4 sm:$0xff]   ;;  %v14487_v12 = vld [vmem:[#allocation7 + $0x13a8] ss:$52 sps:$4 sm:$0xff]  }
 0x4c8   :  { %7774 = vmatprep.subr.bf16.mxu1 %v14429_v62  ;;  %v14492_v62 = vld [vmem:[#allocation7 + $0x140c] ss:$52 sps:$4 sm:$0xff]  }
 0x4ca   :  { %7611 = vmatpush1.bf16.msra.mxu0 %v14424_v9  ;;  %v14495_v9 = vld [vmem:[#allocation7 + $0x1414] ss:$52 sps:$4 sm:$0xff]  }
 0x4cb   :  { %7775 = vmatpush1.bf16.msra.mxu1 %v14427_v63  ;;  %7612 = vmatprep.subr.bf16.mxu0 %v14432_v0  ;;  %v14490_v63 = vld [vmem:[#allocation7 + $0x1408] ss:$52 sps:$4 sm:$0xff]   ;;  %v14493_v0 = vld [vmem:[#allocation7 + $0x1410] ss:$52 sps:$4 sm:$0xff]  }
 0x4cc   :  { %7776 = vmatprep.subr.bf16.mxu1 %v14435_v1  ;;  %v14496_v1 = vld [vmem:[#allocation7 + $0x370] ss:$52 sps:$4 sm:$0xff]  }
 0x4ce   :  { %7613 = vmatpush1.bf16.msra.mxu0 %v14430_v2  ;;  %v14497_v2 = vld [vmem:[#allocation7 + $0x9f0] ss:$52 sps:$4 sm:$0xff]  }
 0x4cf   :  { %7777 = vmatpush1.bf16.msra.mxu1 %v14433_v3  ;;  %7614 = vmatprep.subr.bf16.mxu0 %v14438_v5  ;;  %v14498_v3 = vld [vmem:[#allocation7 + $0x30] ss:$52 sps:$4 sm:$0xff]  }
 0x4d0   :  { %7778 = vmatprep.subr.bf16.mxu1 %v14441_v6  ;;  %v14499_v5 = vld [vmem:[#allocation7 + $0x6b0] ss:$52 sps:$4 sm:$0xff]   ;;  %v14500_v6 = vld [vmem:[#allocation7 + $0x3d8] ss:$52 sps:$4 sm:$0xff]  }
 0x4d2   :  { %7615 = vmatpush1.bf16.msra.mxu0 %v14436_v28  ;;  %v14501_v28 = vld [vmem:[#allocation7 + $0xa58] ss:$52 sps:$4 sm:$0xff]  }
 0x4d3   :  { %7779 = vmatpush1.bf16.msra.mxu1 %v14439_v7  ;;  %7616 = vmatprep.subr.bf16.mxu0 %v14444_v53  ;;  %v14502_v7 = vld [vmem:[#allocation7 + $0x98] ss:$52 sps:$4 sm:$0xff]  }
 0x4d4   :  { %7780 = vmatprep.subr.bf16.mxu1 %v14447_v21  ;;  %v14503_v53 = vld [vmem:[#allocation7 + $0x718] ss:$52 sps:$4 sm:$0xff]   ;;  %v14504_v21 = vld [vmem:[#allocation7 + $0x440] ss:$52 sps:$4 sm:$0xff]  }
 0x4d6   :  { %7617 = vmatpush1.bf16.msra.mxu0 %v14442_v13  ;;  %v14505_v13 = vld [vmem:[#allocation7 + $0xac0] ss:$52 sps:$4 sm:$0xff]  }
 0x4d7   :  { %7781 = vmatpush1.bf16.msra.mxu1 %v14445_v14  ;;  %7618 = vmatprep.subr.bf16.mxu0 %v14450_v15  ;;  %v14506_v14 = vld [vmem:[#allocation7 + $0x100] ss:$52 sps:$4 sm:$0xff]  }
 0x4d8   :  { %7782 = vmatprep.subr.bf16.mxu1 %v14453_v17  ;;  %v14507_v15 = vld [vmem:[#allocation7 + $0x780] ss:$52 sps:$4 sm:$0xff]   ;;  %v14508_v17 = vld [vmem:[#allocation7 + $0x4a8] ss:$52 sps:$4 sm:$0xff]  }
 0x4da   :  { %7619 = vmatpush1.bf16.msra.mxu0 %v14448_v18 }
 0x4db   :  { %7783 = vmatpush1.bf16.msra.mxu1 %v14451_v19  ;;  %7620 = vmatprep.subr.bf16.mxu0 %v14456_v20  ;;  %v14509_v19 = vld [vmem:[#allocation7 + $0xb28] ss:$52 sps:$4 sm:$0xff]  }
 0x4dc   :  { %7784 = vmatprep.subr.bf16.mxu1 %v14459_v22 }
 0x4de   :  { %7621 = vmatpush1.bf16.msra.mxu0 %v14454_v23  ;;  %v14510_v23 = vld [vmem:[#allocation7 + $0x168] ss:$52 sps:$4 sm:$0xff]  }
 0x4df   :  { %7785 = vmatpush1.bf16.msra.mxu1 %v14457_v24  ;;  %7622 = vmatprep.subr.bf16.mxu0 %v14462_v27 }
 0x4e0   :  { %7786 = vmatprep.subr.bf16.mxu1 %v14465_v29  ;;  %v14511_v29 = vld [vmem:[#allocation7 + $0x7e8] ss:$52 sps:$4 sm:$0xff]  }
 0x4e2   :  { %7623 = vmatpush1.bf16.msra.mxu0 %v14460_v25  ;;  %v14512_v25 = vld [vmem:[#allocation7 + $0x510] ss:$52 sps:$4 sm:$0xff]  }
 0x4e3   :  { %7787 = vmatpush1.bf16.msra.mxu1 %v14463_v32  ;;  %7624 = vmatprep.subr.bf16.mxu0 %v14468_v33  ;;  %v14513_v33 = vld [vmem:[#allocation7 + $0xb90] ss:$52 sps:$4 sm:$0xff]  }
 0x4e4   :  { %7788 = vmatprep.subr.bf16.mxu1 %v14471_v37  ;;  %v14514_v37 = vld [vmem:[#allocation7 + $0x1d0] ss:$52 sps:$4 sm:$0xff]  }
 0x4e6   :  { %7625 = vmatpush1.bf16.msra.mxu0 %v14466_v41  ;;  %v14515_v41 = vld [vmem:[#allocation7 + $0x850] ss:$52 sps:$4 sm:$0xff]  }
 0x4e7   :  { %7789 = vmatpush1.bf16.msra.mxu1 %v14469_v42  ;;  %7626 = vmatprep.subr.bf16.mxu0 %v14474_v43  ;;  %v14516_v42 = vld [vmem:[#allocation7 + $0x578] ss:$52 sps:$4 sm:$0xff]  }
 0x4e8   :  { %7790 = vmatprep.subr.bf16.mxu1 %v14477_v45  ;;  %v14517_v43 = vld [vmem:[#allocation7 + $0xbf8] ss:$52 sps:$4 sm:$0xff]  }
 0x4e9   :  { %v14518_v45 = vld [vmem:[#allocation7 + $0x238] ss:$52 sps:$4 sm:$0xff]  }
 0x4ea   :  { %7627 = vmatpush1.bf16.msra.mxu0 %v14472_v46  ;;  %v14519_v46 = vld [vmem:[#allocation7 + $0x8b8] ss:$52 sps:$4 sm:$0xff]  }
 0x4eb   :  { %7791 = vmatpush1.bf16.msra.mxu1 %v14475_v47  ;;  %7628 = vmatprep.subr.bf16.mxu0 %v14480_v48  ;;  %v14520_v47 = vld [vmem:[#allocation7 + $0x5e0] ss:$52 sps:$4 sm:$0xff]  }
 0x4ec   :  { %7792 = vmatprep.subr.bf16.mxu1 %v14483_v50  ;;  %v14521_v48 = vld [vmem:[#allocation7 + $0xc60] ss:$52 sps:$4 sm:$0xff]  }
 0x4ed   :  { %v14522_v50 = vld [vmem:[#allocation7 + $0x2a0] ss:$52 sps:$4 sm:$0xff]  }
 0x4ee   :  { %7629 = vmatpush1.bf16.msra.mxu0 %v14478_v51  ;;  %v14523_v51 = vld [vmem:[#allocation7 + $0x920] ss:$52 sps:$4 sm:$0xff]  }
 0x4ef   :  { %7793 = vmatpush1.bf16.msra.mxu1 %v14481_v55  ;;  %7639 = vmatprep.subr.bf16.mxu0 %v14486_v57  ;;  %v14524_v55 = vld [vmem:[#allocation7 + $0x648] ss:$52 sps:$4 sm:$0xff]  }
 0x4f0   :  { %7803 = vmatprep.subr.bf16.mxu1 %v14489_v58  ;;  %v14525_v57 = vld [vmem:[#allocation7 + $0xcc8] ss:$52 sps:$4 sm:$0xff]   ;;  %v16538_v58 = vld [vmem:[#allocation9] sm:$0xff] }
 0x4f1   :  { %7631 = vmatmul.mubr.bf16.vlgmr.msra.gmra.mrb[32].mxu0 %v16469_v60 }
 0x4f2   :  { %7795 = vmatmul.mubr.bf16.vlgmr.msra.gmra.mrb[20].mxu1 %v16469_v60  ;;  %7640 = vmatpush1.bf16.msra.mxu0 %v14484_v61  ;;  %v14526_v61 = vld [vmem:[#allocation7 + $0x308] ss:$52 sps:$4 sm:$0xff]  }
 0x4f3   :  { %7804 = vmatpush1.bf16.msra.mxu1 %v14487_v12  ;;  %7641 = vmatprep.subr.bf16.mxu0 %v14492_v62  ;;  %v14527_v12 = vld [vmem:[#allocation7 + $0x988] ss:$52 sps:$4 sm:$0xff]   ;;  %v14528_v62 = vld [vmem:[#allocation7 + $0x1070] ss:$52 sps:$4 sm:$0xff]  }
 0x4f4   :  { %7805 = vmatprep.subr.bf16.mxu1 %v14495_v9  ;;  %7671 = vmatprep.mubr.bf16.mxu0 %v15380_v35  ;;  %v3498_v9 = vrot.slane %v16538_v58, %v15797_v11 }
 0x4f5   :  { %7835 = vmatprep.mubr.bf16.mxu1 %v15380_v35 }
 0x4f6   :  { %7642 = vmatpush1.bf16.msra.mxu0 %v14490_v63  ;;  %v14529_v63 = vld [vmem:[#allocation7 + $0xd30] ss:$52 sps:$4 sm:$0xff]  }
 0x4f7   :  { %7806 = vmatpush1.bf16.msra.mxu1 %v14493_v0  ;;  %12845 = vmatprep.subr.bf16.mxu0 %v14496_v1  ;;  %v14530_v0 = vld [vmem:[#allocation7 + $0x13b0] ss:$52 sps:$4 sm:$0xff]   ;;  %v14531_v1 = vld [vmem:[#allocation7 + $0x10d8] ss:$52 sps:$4 sm:$0xff]  }
 0x4f8   :  { %12867 = vmatprep.subr.bf16.mxu1 %v14497_v2  ;;  %v12985_v2 = vadd.f32 %v16508_v38, %v3498_v9  ;;  %v14542_v38 = vld [vmem:[%s17834_s7 + $0x24] ss:$16 sps:$4 sm:$0xff]   ;;  %v14585_v9 = vld [vmem:[%s17834_s7 + $0x68] ss:$16 sps:$4 sm:$0xff]  }
 0x4fd   :  { %12358 = vmatmul.mubr.msk.bf16.vlgmr.msra.gmra.mrb[32].mxu0 %vm6856_vm4, %v16478_v4 }
 0x4fe   :  { %12359 = vmatmul.mubr.msk.bf16.vlgmr.msra.gmra.mrb[20].mxu1 %vm6856_vm4, %v16478_v4  ;;  %12846 = vmatpush3.bf16.msra.mxu0 %v14498_v3  ;;  %v14532_v3 = vld [vmem:[#allocation7 + $0xd98] ss:$52 sps:$4 sm:$0xff]  }
 0x4ff   :  { %12868 = vmatpush3.bf16.msra.mxu1 %v14499_v5  ;;  %7876 = vmatprep.mubr.bf16.mxu0 %v16435_v44  ;;  %v14533_v5 = vld [vmem:[#allocation7 + $0x1418] ss:$52 sps:$4 sm:$0xff]  }
 0x500   :  { %7916 = vmatprep.mubr.bf16.mxu1 %v16441_v49  ;;  %12847 = vmatprep.subr.bf16.mxu0 %v14500_v6  ;;  %v14534_v6 = vld [vmem:[#allocation7 + $0x1140] ss:$52 sps:$4 sm:$0xff]  }
 0x501   :  { %12869 = vmatprep.subr.bf16.mxu1 %v14501_v28  ;;  %v14537_v28 = vld [vmem:[%s17834_s7 + $0x4] ss:$16 sps:$4 sm:$0xff]  }
 0x502   :  { %12848 = vmatpush3.bf16.msra.mxu0 %v14502_v7  ;;  %v8005_v7 = vmax.f32 %v12985_v2, 0.0  ;;  %v14591_v2 = vld [vmem:[%s17834_s7 + $0x88] ss:$16 sps:$4 sm:$0xff]  }
 0x503   :  { %12870 = vmatpush3.bf16.msra.mxu1 %v14503_v53  ;;  %12849 = vmatprep.subr.bf16.mxu0 %v14504_v21  ;;  %v14540_v21 = vld [vmem:[%s17834_s7 + $0x20] ss:$16 sps:$4 sm:$0xff]  }
 0x504   :  { %12871 = vmatprep.subr.bf16.mxu1 %v14505_v13  ;;  %v16530_v18 = vpop.f32.mrb[28].mxu0  ;;  %v8018_v53 = vpack.c.bf16 %v8005_v7, %v8005_v7  ;;  %v14544_v13 = vld [vmem:[#allocation7 + $0x1210] ss:$52 sps:$4 sm:$0xff]  }
 0x505   :  { %v16532_v20 = vpop.f32.mrb[16].mxu1  ;;  %v16534_v44 = vpop.f32.mrb[29].mxu0  ;;  %v14594_v7 = vld [vmem:[%s17834_s7 + $0x160] ss:$16 sps:$4 sm:$0xff]  }
 0x506   :  { %12850 = vmatpush3.bf16.msra.mxu0 %v14506_v14  ;;  %v16536_v22 = vpop.f32.mrb[17].mxu1  ;;  %v7349_v49 = vpop.f32.mrb[30].mxu0  ;;  %v14547_v14 = vld [vmem:[%s17834_s7 + $0x44] ss:$16 sps:$4 sm:$0xff]  }
 0x507   :  { %12872 = vmatpush3.bf16.msra.mxu1 %v14507_v15  ;;  %v7513_v24 = vpop.f32.mrb[18].mxu1  ;;  %v7350_v27 = vpop.f32.mrb[31].mxu0  ;;  %12851 = vmatprep.subr.bf16.mxu0 %v14508_v17  ;;  %v14548_v15 = vld [vmem:[#allocation7 + $0xed0] ss:$52 sps:$4 sm:$0xff]   ;;  %v14549_v17 = vld [vmem:[#allocation7 + $0x1278] ss:$52 sps:$4 sm:$0xff]  }
 0x508   :  { %v7514_v32 = vpop.f32.mrb[19].mxu1  ;;  %12873 = vmatprep.subr.bf16.mxu1 %v14509_v19  ;;  %v14552_v19 = vld [vmem:[%s17834_s7 + $0x64] ss:$16 sps:$4 sm:$0xff]   ;;  %v14553_v49 = vld [vmem:[#allocation7 + $0xf38] ss:$52 sps:$4 sm:$0xff]  }
 0x509   :  { %v14554_v24 = vld [vmem:[#allocation7 + $0x12e0] ss:$52 sps:$4 sm:$0xff]   ;;  %v14559_v32 = vld [vmem:[#allocation7 + $0x1348] ss:$52 sps:$4 sm:$0xff]  }
 0x50a   :  { %12852 = vmatpush3.bf16.msra.mxu0 %v14510_v23  ;;  %v14550_v23 = vld [vmem:[%s17834_s7 + $0x60] ss:$16 sps:$4 sm:$0xff]   ;;  %v14557_v27 = vld [vmem:[%s17834_s7 + $0x84] ss:$16 sps:$4 sm:$0xff]  }
 0x50b   :  { %12874 = vmatpush3.bf16.msra.mxu1 %v14511_v29  ;;  %12853 = vmatprep.subr.bf16.mxu0 %v14512_v25  ;;  %v14558_v29 = vld [vmem:[#allocation7 + $0xfa0] ss:$52 sps:$4 sm:$0xff]  }
 0x50c   :  { %12875 = vmatprep.subr.bf16.mxu1 %v14513_v33  ;;  %v14555_v25 = vld [vmem:[%s17834_s7 + $0x80] ss:$16 sps:$4 sm:$0xff]   ;;  %v14562_v33 = vld [vmem:[%s17834_s7 + $0xa4] ss:$16 sps:$4 sm:$0xff]  }
 0x50e   :  { %12854 = vmatpush3.bf16.msra.mxu0 %v14514_v37  ;;  %v14563_v37 = vld [vmem:[#allocation7 + $0x1008] ss:$52 sps:$4 sm:$0xff]  }
 0x50f   :  { %12876 = vmatpush3.bf16.msra.mxu1 %v14515_v41  ;;  %12855 = vmatprep.subr.bf16.mxu0 %v14516_v42  ;;  %v14560_v41 = vld [vmem:[%s17834_s7 + $0xa0] ss:$16 sps:$4 sm:$0xff]   ;;  %v14569_v42 = vld [vmem:[%s17834_s7 + $0xc] ss:$16 sps:$4 sm:$0xff]  }
 0x510   :  { %12877 = vmatprep.subr.bf16.mxu1 %v14517_v43  ;;  %v14566_v43 = vld [vmem:[%s17834_s7 + $0xc4] ss:$16 sps:$4 sm:$0xff]  }
 0x512   :  { %12856 = vmatpush3.bf16.msra.mxu0 %v14518_v45  ;;  %v14567_v45 = vld [vmem:[%s17834_s7 + $0x8] ss:$16 sps:$4 sm:$0xff]  }
 0x513   :  { %12878 = vmatpush3.bf16.msra.mxu1 %v14519_v46  ;;  %12857 = vmatprep.subr.bf16.mxu0 %v14520_v47  ;;  %v14564_v46 = vld [vmem:[%s17834_s7 + $0xc0] ss:$16 sps:$4 sm:$0xff]   ;;  %v14575_v47 = vld [vmem:[%s17834_s7 + $0x2c] ss:$16 sps:$4 sm:$0xff]  }
 0x514   :  { %12879 = vmatprep.subr.bf16.mxu1 %v14521_v48  ;;  %v14572_v48 = vld [vmem:[%s17834_s7 + $0xe4] ss:$16 sps:$4 sm:$0xff]  }
 0x516   :  { %12858 = vmatpush3.bf16.msra.mxu0 %v14522_v50  ;;  %v14573_v50 = vld [vmem:[%s17834_s7 + $0x28] ss:$16 sps:$4 sm:$0xff]  }
 0x517   :  { %12880 = vmatpush3.bf16.msra.mxu1 %v14523_v51  ;;  %12859 = vmatprep.subr.bf16.mxu0 %v14524_v55  ;;  %v14570_v51 = vld [vmem:[%s17834_s7 + $0xe0] ss:$16 sps:$4 sm:$0xff]   ;;  %v14581_v55 = vld [vmem:[%s17834_s7 + $0x4c] ss:$16 sps:$4 sm:$0xff]  }
 0x518   :  { %12881 = vmatprep.subr.bf16.mxu1 %v14525_v57  ;;  %v14579_v57 = vld [vmem:[%s17834_s7 + $0x48] ss:$16 sps:$4 sm:$0xff]  }
 0x51a   :  { %12860 = vmatpush3.bf16.msra.mxu0 %v14526_v61  ;;  %v14576_v61 = vld [vmem:[%s17834_s7 + $0x100] ss:$16 sps:$4 sm:$0xff]  }
 0x51b   :  { %12882 = vmatpush3.bf16.msra.mxu1 %v14527_v12  ;;  %12889 = vmatprep.subr.bf16.mxu0 %v14528_v62  ;;  %v14587_v12 = vld [vmem:[%s17834_s7 + $0x6c] ss:$16 sps:$4 sm:$0xff]   ;;  %v14584_v62 = vld [vmem:[%s17834_s7 + $0x124] ss:$16 sps:$4 sm:$0xff]  }
 0x51c   :  { %12970 = vmatprep.subr.bf16.mxu1 %v15381_v26 }
 0x51d   :  { %7877 = vmatmul.mubr.bf16.vlgmr.msra.gmra.mrb[36].mxu0 %v16437_v39  ;;  %v14538_v39 = vld [vmem:[#allocation7 + $0xe00] ss:$52 sps:$4 sm:$0xff]  }
 0x51e   :  { %7917 = vmatmul.mubr.bf16.vlgmr.msra.gmra.mrb[24].mxu1 %v16457_v16  ;;  %12890 = vmatpush3.bf16.msra.mxu0 %v14529_v63  ;;  %v14535_v16 = vld [vmem:[%s17834_s7] ss:$16 sps:$4 sm:$0xff]  }
 0x51f   :  { %7956 = vmatprep.mubr.bf16.mxu0 %v16467_v59  ;;  %12971 = vmatpush3.bf16.msra.mxu1 %v14530_v0  ;;  %v14539_v59 = vld [vmem:[#allocation7 + $0x11a8] ss:$52 sps:$4 sm:$0xff]  }
 0x520   :  { %12891 = vmatprep.subr.bf16.mxu0 %v14531_v1  ;;  %12972 = vmatprep.subr.bf16.mxu1 %v15381_v26  ;;  %v14582_v63 = vld [vmem:[%s17834_s7 + $0x120] ss:$16 sps:$4 sm:$0xff]   ;;  %v14593_v0 = vld [vmem:[%s17834_s7 + $0x8c] ss:$16 sps:$4 sm:$0xff]   ;;  %v14590_v1 = vld [vmem:[%s17834_s7 + $0x144] ss:$16 sps:$4 sm:$0xff]  }
 0x521   :  { %12974 = vmatprep.mubr.msk.bf16.mxu1 %vm15382_vm3, %v15381_v26  ;;  %v14543_v26 = vld [vmem:[#allocation7 + $0xe68] ss:$52 sps:$4 sm:$0xff]  }
 0x522   :  { %12892 = vmatpush3.bf16.msra.mxu0 %v14532_v3  ;;  %v14588_v3 = vld [vmem:[%s17834_s7 + $0x140] ss:$16 sps:$4 sm:$0xff]  }
 0x523   :  { %12973 = vmatpush3.bf16.msra.mxu1 %v14533_v5  ;;  %12893 = vmatprep.subr.bf16.mxu0 %v14534_v6  ;;  %v14599_v5 = vld [vmem:[%s17834_s7 + $0xac] ss:$16 sps:$4 sm:$0xff]   ;;  %v14596_v6 = vld [vmem:[%s17834_s7 + $0x164] ss:$16 sps:$4 sm:$0xff]  }
 0x524   :  { %10455 = vmatprep.subr.bf16.mxu1 %v14537_v28  ;;  %v14597_v28 = vld [vmem:[%s17834_s7 + $0xa8] ss:$16 sps:$4 sm:$0xff]  }
 0x526   :  { %12975 = vmatmul.mubr.msk.bf16.vlgmr.msra.gmra.mrb[28].mxu1 %vm6856_vm4, %v16478_v4  ;;  %12894 = vmatpush3.bf16.msra.mxu0 %v14538_v39  ;;  %v14545_v4 = vld [vmem:[%s17834_s7 + $0x40] ss:$16 sps:$4 sm:$0xff]   ;;  %v14605_v39 = vld [vmem:[%s17834_s7 + $0xcc] ss:$16 sps:$4 sm:$0xff]  }
 0x527   :  { %10456 = vmatpush1.bf16.msra.mxu1 %v14535_v16  ;;  %10487 = vmatprep.mubr.bf16.mxu1 %v8018_v53  ;;  %v14602_v16 = vld [vmem:[%s17834_s7 + $0x184] ss:$16 sps:$4 sm:$0xff]  }
 0x528   :  { %12895 = vmatprep.subr.bf16.mxu0 %v14539_v59  ;;  %10457 = vmatprep.subr.bf16.mxu1 %v14542_v38  ;;  %v14603_v59 = vld [vmem:[%s17834_s7 + $0xc8] ss:$16 sps:$4 sm:$0xff]   ;;  %v14600_v38 = vld [vmem:[%s17834_s7 + $0x180] ss:$16 sps:$4 sm:$0xff]  }
 0x52a   :  { %12896 = vmatpush3.bf16.msra.mxu0 %v14543_v26  ;;  %v14608_v26 = vld [vmem:[%s17834_s7 + $0x1a4] ss:$16 sps:$4 sm:$0xff]  }
 0x52b   :  { %10458 = vmatpush1.bf16.msra.mxu1 %v14540_v21  ;;  %12897 = vmatprep.subr.bf16.mxu0 %v14544_v13  ;;  %v14609_v21 = vld [vmem:[%s17834_s7 + $0xe8] ss:$16 sps:$4 sm:$0xff]   ;;  %v14606_v13 = vld [vmem:[%s17834_s7 + $0x1a0] ss:$16 sps:$4 sm:$0xff]  }
 0x52c   :  { %10459 = vmatprep.subr.bf16.mxu1 %v14547_v14  ;;  %v14617_v14 = vld [vmem:[%s17834_s7 + $0x10c] ss:$16 sps:$4 sm:$0xff]  }
 0x52e   :  { %12898 = vmatpush3.bf16.msra.mxu0 %v14548_v15  ;;  %v3494_v15 = vrot.slane %v16538_v58, %v15794_v10 }
 0x52f   :  { %10460 = vmatpush1.bf16.msra.mxu1 %v14545_v4  ;;  %12899 = vmatprep.subr.bf16.mxu0 %v14549_v17  ;;  %v14614_v4 = vld [vmem:[%s17834_s7 + $0x1c4] ss:$16 sps:$4 sm:$0xff]   ;;  %v3506_v17 = vrot.slane %v16538_v58, %v15830_v30 }
 0x530   :  { %10461 = vmatprep.subr.bf16.mxu1 %v14552_v19  ;;  %v14615_v19 = vld [vmem:[%s17834_s7 + $0x108] ss:$16 sps:$4 sm:$0xff]  }
 0x532   :  { %12900 = vmatpush3.bf16.msra.mxu0 %v14553_v49  ;;  %v14612_v49 = vld [vmem:[%s17834_s7 + $0x1c0] ss:$16 sps:$4 sm:$0xff]  }
 0x533   :  { %10462 = vmatpush1.bf16.msra.mxu1 %v14550_v23  ;;  %12901 = vmatprep.subr.bf16.mxu0 %v14554_v24  ;;  %v14623_v23 = vld [vmem:[%s17834_s7 + $0x12c] ss:$16 sps:$4 sm:$0xff]   ;;  %v12984_v24 = vadd.f32 %v16504_v34, %v3494_v15  ;;  %v14675_v15 = vld [vmem:[%s17834_s7 + $0x248] ss:$16 sps:$4 sm:$0xff]  }
 0x534   :  { %10463 = vmatprep.subr.bf16.mxu1 %v14557_v27  ;;  %v14620_v27 = vld [vmem:[%s17834_s7 + $0x1e4] ss:$16 sps:$4 sm:$0xff]   ;;  %v14629_v34 = vld [vmem:[%s17834_s7 + $0x14c] ss:$16 sps:$4 sm:$0xff]  }
 0x536   :  { %12902 = vmatpush3.bf16.msra.mxu0 %v14558_v29  ;;  %v12987_v29 = vadd.f32 %v16510_v52, %v3506_v17  ;;  %v14626_v52 = vld [vmem:[%s17834_s7 + $0x204] ss:$16 sps:$4 sm:$0xff]   ;;  %v14683_v17 = vld [vmem:[%s17834_s7 + $0x26c] ss:$16 sps:$4 sm:$0xff]  }
 0x537   :  { %10464 = vmatpush1.bf16.msra.mxu1 %v14555_v25  ;;  %12903 = vmatprep.subr.bf16.mxu0 %v14559_v32  ;;  %v14621_v25 = vld [vmem:[%s17834_s7 + $0x128] ss:$16 sps:$4 sm:$0xff]   ;;  %v14618_v32 = vld [vmem:[%s17834_s7 + $0x1e0] ss:$16 sps:$4 sm:$0xff]  }
 0x538   :  { %10465 = vmatprep.subr.bf16.mxu1 %v14562_v33  ;;  %v8004_v33 = vmax.f32 %v12984_v24, 0.0  ;;  %v14689_v24 = vld [vmem:[%s17834_s7 + $0x28c] ss:$16 sps:$4 sm:$0xff]  }
 0x53a   :  { %12904 = vmatpush3.bf16.msra.mxu0 %v14563_v37  ;;  %v8007_v37 = vmax.f32 %v12987_v29, 0.0  ;;  %v14687_v29 = vld [vmem:[%s17834_s7 + $0x288] ss:$16 sps:$4 sm:$0xff]  }
 0x53b   :  { %10466 = vmatpush1.bf16.msra.mxu1 %v14560_v41  ;;  %10742 = vmatprep.subr.bf16.mxu0 %v14569_v42  ;;  %v14627_v41 = vld [vmem:[%s17834_s7 + $0x148] ss:$16 sps:$4 sm:$0xff]   ;;  %v14624_v42 = vld [vmem:[%s17834_s7 + $0x200] ss:$16 sps:$4 sm:$0xff]  }
 0x53c   :  { %10467 = vmatprep.subr.bf16.mxu1 %v14566_v43  ;;  %v8017_v43 = vpack.c.bf16 %v8004_v33, %v8004_v33  ;;  %v14693_v33 = vld [vmem:[%s17834_s7 + $0x2a8] ss:$16 sps:$4 sm:$0xff]  }
 0x53d   :  { %7957 = vmatmul.mubr.bf16.vlgmr.msra.gmra.mrb[40].mxu0 %v16469_v60  ;;  %v14578_v60 = vld [vmem:[%s17834_s7 + $0x104] ss:$16 sps:$4 sm:$0xff]  }
 0x53e   :  { %10743 = vmatpush1.bf16.msra.mxu0 %v14567_v45  ;;  %10774 = vmatprep.mubr.bf16.mxu0 %v8018_v53  ;;  %v14611_v53 = vld [vmem:[%s17834_s7 + $0xec] ss:$16 sps:$4 sm:$0xff]   ;;  %v14632_v45 = vld [vmem:[%s17834_s7 + $0x224] ss:$16 sps:$4 sm:$0xff]  }
 0x53f   :  { %10468 = vmatpush1.bf16.msra.mxu1 %v14564_v46  ;;  %10744 = vmatprep.subr.bf16.mxu0 %v14575_v47  ;;  %v14635_v46 = vld [vmem:[%s17834_s7 + $0x16c] ss:$16 sps:$4 sm:$0xff]   ;;  %v8020_v47 = vpack.c.bf16 %v8007_v37, %v8007_v37 }
 0x540   :  { %10469 = vmatprep.subr.bf16.mxu1 %v14572_v48  ;;  %v14633_v48 = vld [vmem:[%s17834_s7 + $0x168] ss:$16 sps:$4 sm:$0xff]   ;;  %v14701_v37 = vld [vmem:[%s17834_s7 + $0x2cc] ss:$16 sps:$4 sm:$0xff]  }
 0x542   :  { %10745 = vmatpush1.bf16.msra.mxu0 %v14573_v50  ;;  %v14630_v50 = vld [vmem:[%s17834_s7 + $0x220] ss:$16 sps:$4 sm:$0xff]  }
 0x543   :  { %10470 = vmatpush1.bf16.msra.mxu1 %v14570_v51  ;;  %10746 = vmatprep.subr.bf16.mxu0 %v14581_v55  ;;  %v14641_v51 = vld [vmem:[%s17834_s7 + $0x18c] ss:$16 sps:$4 sm:$0xff]   ;;  %v14638_v55 = vld [vmem:[%s17834_s7 + $0x244] ss:$16 sps:$4 sm:$0xff]  }
 0x544   :  { %10471 = vmatprep.subr.bf16.mxu1 %v14578_v60  ;;  %v14639_v60 = vld [vmem:[%s17834_s7 + $0x188] ss:$16 sps:$4 sm:$0xff]  }
 0x546   :  { %10747 = vmatpush1.bf16.msra.mxu0 %v14579_v57  ;;  %v14636_v57 = vld [vmem:[%s17834_s7 + $0x240] ss:$16 sps:$4 sm:$0xff]  }
 0x547   :  { %10472 = vmatpush1.bf16.msra.mxu1 %v14576_v61  ;;  %10748 = vmatprep.subr.bf16.mxu0 %v14587_v12  ;;  %v14647_v61 = vld [vmem:[%s17834_s7 + $0x1ac] ss:$16 sps:$4 sm:$0xff]   ;;  %v14644_v12 = vld [vmem:[%s17834_s7 + $0x264] ss:$16 sps:$4 sm:$0xff]  }
 0x548   :  { %10473 = vmatprep.subr.bf16.mxu1 %v14584_v62  ;;  %v14645_v62 = vld [vmem:[%s17834_s7 + $0x1a8] ss:$16 sps:$4 sm:$0xff]  }
 0x54a   :  { %10749 = vmatpush1.bf16.msra.mxu0 %v14585_v9  ;;  %v14642_v9 = vld [vmem:[%s17834_s7 + $0x260] ss:$16 sps:$4 sm:$0xff]  }
 0x54b   :  { %10474 = vmatpush1.bf16.msra.mxu1 %v14582_v63  ;;  %10750 = vmatprep.subr.bf16.mxu0 %v14593_v0  ;;  %v14653_v63 = vld [vmem:[%s17834_s7 + $0x1cc] ss:$16 sps:$4 sm:$0xff]   ;;  %v14650_v0 = vld [vmem:[%s17834_s7 + $0x284] ss:$16 sps:$4 sm:$0xff]  }
 0x54c   :  { %10475 = vmatprep.subr.bf16.mxu1 %v14590_v1  ;;  %v14651_v1 = vld [vmem:[%s17834_s7 + $0x1c8] ss:$16 sps:$4 sm:$0xff]  }
 0x54e   :  { %10751 = vmatpush1.bf16.msra.mxu0 %v14591_v2  ;;  %v14648_v2 = vld [vmem:[%s17834_s7 + $0x280] ss:$16 sps:$4 sm:$0xff]  }
 0x54f   :  { %10476 = vmatpush1.bf16.msra.mxu1 %v14588_v3  ;;  %10752 = vmatprep.subr.bf16.mxu0 %v14599_v5  ;;  %v14659_v3 = vld [vmem:[%s17834_s7 + $0x1ec] ss:$16 sps:$4 sm:$0xff]   ;;  %v14656_v5 = vld [vmem:[%s17834_s7 + $0x2a4] ss:$16 sps:$4 sm:$0xff]  }
 0x550   :  { %10477 = vmatprep.subr.bf16.mxu1 %v14596_v6  ;;  %v14657_v6 = vld [vmem:[%s17834_s7 + $0x1e8] ss:$16 sps:$4 sm:$0xff]  }
 0x552   :  { %10753 = vmatpush1.bf16.msra.mxu0 %v14597_v28  ;;  %v14654_v28 = vld [vmem:[%s17834_s7 + $0x2a0] ss:$16 sps:$4 sm:$0xff]  }
 0x553   :  { %10478 = vmatpush1.bf16.msra.mxu1 %v14594_v7  ;;  %10754 = vmatprep.subr.bf16.mxu0 %v14605_v39  ;;  %v14665_v7 = vld [vmem:[%s17834_s7 + $0x20c] ss:$16 sps:$4 sm:$0xff]   ;;  %v14662_v39 = vld [vmem:[%s17834_s7 + $0x2c4] ss:$16 sps:$4 sm:$0xff]  }
 0x554   :  { %10479 = vmatprep.subr.bf16.mxu1 %v14602_v16  ;;  %v14663_v16 = vld [vmem:[%s17834_s7 + $0x208] ss:$16 sps:$4 sm:$0xff]  }
 0x556   :  { %10755 = vmatpush1.bf16.msra.mxu0 %v14603_v59  ;;  %v14660_v59 = vld [vmem:[%s17834_s7 + $0x2c0] ss:$16 sps:$4 sm:$0xff]  }
 0x557   :  { %10480 = vmatpush1.bf16.msra.mxu1 %v14600_v38  ;;  %10756 = vmatprep.subr.bf16.mxu0 %v14611_v53  ;;  %v14671_v38 = vld [vmem:[%s17834_s7 + $0x22c] ss:$16 sps:$4 sm:$0xff]   ;;  %v14668_v53 = vld [vmem:[%s17834_s7 + $0x2e4] ss:$16 sps:$4 sm:$0xff]  }
 0x558   :  { %10481 = vmatprep.subr.bf16.mxu1 %v14608_v26  ;;  %v14669_v26 = vld [vmem:[%s17834_s7 + $0x228] ss:$16 sps:$4 sm:$0xff]  }
 0x55a   :  { %10757 = vmatpush1.bf16.msra.mxu0 %v14609_v21  ;;  %v14666_v21 = vld [vmem:[%s17834_s7 + $0x2e0] ss:$16 sps:$4 sm:$0xff]  }
 0x55b   :  { %10482 = vmatpush1.bf16.msra.mxu1 %v14606_v13  ;;  %10758 = vmatprep.subr.bf16.mxu0 %v14617_v14  ;;  %v14677_v13 = vld [vmem:[%s17834_s7 + $0x24c] ss:$16 sps:$4 sm:$0xff]   ;;  %v14674_v14 = vld [vmem:[%s17834_s7 + $0x304] ss:$16 sps:$4 sm:$0xff]  }
 0x55c   :  { %10483 = vmatprep.subr.bf16.mxu1 %v14614_v4  ;;  %v14672_v4 = vld [vmem:[%s17834_s7 + $0x300] ss:$16 sps:$4 sm:$0xff]  }
 0x55e   :  { %10759 = vmatpush1.bf16.msra.mxu0 %v14615_v19  ;;  %v14680_v19 = vld [vmem:[%s17834_s7 + $0x324] ss:$16 sps:$4 sm:$0xff]  }
 0x55f   :  { %10484 = vmatpush1.bf16.msra.mxu1 %v14612_v49  ;;  %10760 = vmatprep.subr.bf16.mxu0 %v14623_v23  ;;  %v14681_v49 = vld [vmem:[%s17834_s7 + $0x268] ss:$16 sps:$4 sm:$0xff]   ;;  %v14678_v23 = vld [vmem:[%s17834_s7 + $0x320] ss:$16 sps:$4 sm:$0xff]  }
 0x560   :  { %10485 = vmatprep.subr.bf16.mxu1 %v14620_v27  ;;  %v14686_v27 = vld [vmem:[%s17834_s7 + $0x344] ss:$16 sps:$4 sm:$0xff]  }
 0x562   :  { %10761 = vmatpush1.bf16.msra.mxu0 %v14621_v25  ;;  %v14684_v25 = vld [vmem:[%s17834_s7 + $0x340] ss:$16 sps:$4 sm:$0xff]  }
 0x563   :  { %10486 = vmatpush1.bf16.msra.mxu1 %v14618_v32  ;;  %10762 = vmatprep.subr.bf16.mxu0 %v14629_v34  ;;  %v14695_v32 = vld [vmem:[%s17834_s7 + $0x2ac] ss:$16 sps:$4 sm:$0xff]   ;;  %v14692_v34 = vld [vmem:[%s17834_s7 + $0x364] ss:$16 sps:$4 sm:$0xff]  }
 0x564   :  { %10496 = vmatprep.subr.bf16.mxu1 %v14626_v52  ;;  %v14690_v52 = vld [vmem:[%s17834_s7 + $0x360] ss:$16 sps:$4 sm:$0xff]  }
 0x566   :  { %10488 = vmatmul.mubr.bf16.vlgmr.msra.gmra.mrb[32].mxu1 %v8017_v43  ;;  %10763 = vmatpush1.bf16.msra.mxu0 %v14627_v41  ;;  %v14698_v41 = vld [vmem:[%s17834_s7 + $0x384] ss:$16 sps:$4 sm:$0xff]  }
 0x567   :  { %10497 = vmatpush1.bf16.msra.mxu1 %v14624_v42  ;;  %10528 = vmatprep.mubr.bf16.mxu1 %v8020_v47  ;;  %v14699_v42 = vld [vmem:[%s17834_s7 + $0x2c8] ss:$16 sps:$4 sm:$0xff]  }
 0x568   :  { %10498 = vmatprep.subr.bf16.mxu1 %v14632_v45  ;;  %10764 = vmatprep.subr.bf16.mxu0 %v14635_v46  ;;  %v14707_v45 = vld [vmem:[%s17834_s7 + $0x2ec] ss:$16 sps:$4 sm:$0xff]   ;;  %v14704_v46 = vld [vmem:[%s17834_s7 + $0x3a4] ss:$16 sps:$4 sm:$0xff]  }
 0x56a   :  { %10765 = vmatpush1.bf16.msra.mxu0 %v14633_v48  ;;  %v14702_v48 = vld [vmem:[%s17834_s7 + $0x3a0] ss:$16 sps:$4 sm:$0xff]  }
 0x56b   :  { %10499 = vmatpush1.bf16.msra.mxu1 %v14630_v50  ;;  %10766 = vmatprep.subr.bf16.mxu0 %v14641_v51  ;;  %v14713_v50 = vld [vmem:[%s17834_s7 + $0x30c] ss:$16 sps:$4 sm:$0xff]   ;;  %v3502_v51 = vrot.slane %v16538_v58, %v15975_v31 }
 0x56c   :  { %10500 = vmatprep.subr.bf16.mxu1 %v14638_v55  ;;  %v14710_v55 = vld [vmem:[%s17834_s7 + $0x3c4] ss:$16 sps:$4 sm:$0xff]  }
 0x56e   :  { %10767 = vmatpush1.bf16.msra.mxu0 %v14639_v60  ;;  %v3514_v60 = vrot.slane %v16538_v58, %v971_v40  ;;  %v14716_v40 = vld [vmem:[%s17834_s7 + $0x3e4] ss:$16 sps:$4 sm:$0xff]  }
 0x56f   :  { %10501 = vmatpush1.bf16.msra.mxu1 %v14636_v57  ;;  %10768 = vmatprep.subr.bf16.mxu0 %v14647_v61  ;;  %v14711_v57 = vld [vmem:[%s17834_s7 + $0x308] ss:$16 sps:$4 sm:$0xff]   ;;  %v14708_v61 = vld [vmem:[%s17834_s7 + $0x3c0] ss:$16 sps:$4 sm:$0xff]  }
 0x570   :  { %10502 = vmatprep.subr.bf16.mxu1 %v14644_v12  ;;  %v14719_v12 = vld [vmem:[%s17834_s7 + $0x32c] ss:$16 sps:$4 sm:$0xff]  }
 0x572   :  { %10769 = vmatpush1.bf16.msra.mxu0 %v14645_v62  ;;  %v12986_v62 = vadd.f32 %v16506_v36, %v3502_v51  ;;  %v14725_v36 = vld [vmem:[%s17834_s7 + $0x34c] ss:$16 sps:$4 sm:$0xff]   ;;  %v14776_v51 = vld [vmem:[%s17834_s7 + $0x524] ss:$16 sps:$4 sm:$0xff]  }
 0x573   :  { %10503 = vmatpush1.bf16.msra.mxu1 %v14642_v9  ;;  %10770 = vmatprep.subr.bf16.mxu0 %v14653_v63  ;;  %v12989_v9 = vadd.f32 %v16534_v44, %v3514_v60  ;;  %v14717_v63 = vld [vmem:[%s17834_s7 + $0x328] ss:$16 sps:$4 sm:$0xff]   ;;  %v14722_v44 = vld [vmem:[%s17834_s7 + $0x404] ss:$16 sps:$4 sm:$0xff]   ;;  %v14774_v60 = vld [vmem:[%s17834_s7 + $0x520] ss:$16 sps:$4 sm:$0xff]  }
 0x574   :  { %10504 = vmatprep.subr.bf16.mxu1 %v14650_v0  ;;  %v14714_v0 = vld [vmem:[%s17834_s7 + $0x3e0] ss:$16 sps:$4 sm:$0xff]  }
 0x576   :  { %10771 = vmatpush1.bf16.msra.mxu0 %v14651_v1  ;;  %v8006_v1 = vmax.f32 %v12986_v62, 0.0  ;;  %v14780_v62 = vld [vmem:[%s17834_s7 + $0x540] ss:$16 sps:$4 sm:$0xff]  }
 0x577   :  { %10505 = vmatpush1.bf16.msra.mxu1 %v14648_v2  ;;  %10772 = vmatprep.subr.bf16.mxu0 %v14659_v3  ;;  %v8009_v2 = vmax.f32 %v12989_v9, 0.0  ;;  %v14723_v3 = vld [vmem:[%s17834_s7 + $0x348] ss:$16 sps:$4 sm:$0xff]   ;;  %v14791_v9 = vld [vmem:[%s17834_s7 + $0x4ac] ss:$16 sps:$4 sm:$0xff]  }
 0x578   :  { %10506 = vmatprep.subr.bf16.mxu1 %v14656_v5  ;;  %v14720_v5 = vld [vmem:[%s17834_s7 + $0x400] ss:$16 sps:$4 sm:$0xff]  }
 0x57a   :  { %10773 = vmatpush1.bf16.msra.mxu0 %v14657_v6  ;;  %v8019_v6 = vpack.c.bf16 %v8006_v1, %v8006_v1  ;;  %v14786_v1 = vld [vmem:[%s17834_s7 + $0x560] ss:$16 sps:$4 sm:$0xff]  }
 0x57b   :  { %10507 = vmatpush1.bf16.msra.mxu1 %v14654_v28  ;;  %10783 = vmatprep.subr.bf16.mxu0 %v14665_v7  ;;  %v14728_v28 = vld [vmem:[%s17834_s7 + $0x424] ss:$16 sps:$4 sm:$0xff]   ;;  %v14731_v7 = vld [vmem:[%s17834_s7 + $0x36c] ss:$16 sps:$4 sm:$0xff]  }
 0x57c   :  { %10508 = vmatprep.subr.bf16.mxu1 %v14662_v39  ;;  %v8022_v39 = vpack.c.bf16 %v8009_v2, %v8009_v2  ;;  %v14797_v2 = vld [vmem:[%s17834_s7 + $0x4cc] ss:$16 sps:$4 sm:$0xff]  }
 0x57d   :  { %10775 = vmatmul.mubr.bf16.vlgmr.msra.gmra.mrb[44].mxu0 %v8017_v43  ;;  %v14696_v43 = vld [vmem:[%s17834_s7 + $0x380] ss:$16 sps:$4 sm:$0xff]  }
 0x57e   :  { %10784 = vmatpush1.bf16.msra.mxu0 %v14663_v16  ;;  %10815 = vmatprep.mubr.bf16.mxu0 %v8020_v47  ;;  %v14705_v47 = vld [vmem:[%s17834_s7 + $0x2e8] ss:$16 sps:$4 sm:$0xff]  }
 0x57f   :  { %10509 = vmatpush1.bf16.msra.mxu1 %v14660_v59  ;;  %10785 = vmatprep.subr.bf16.mxu0 %v14671_v38  ;;  %v14729_v16 = vld [vmem:[%s17834_s7 + $0x368] ss:$16 sps:$4 sm:$0xff]   ;;  %v14726_v59 = vld [vmem:[%s17834_s7 + $0x420] ss:$16 sps:$4 sm:$0xff]   ;;  %v14737_v38 = vld [vmem:[%s17834_s7 + $0x38c] ss:$16 sps:$4 sm:$0xff]  }
 0x580   :  { %10510 = vmatprep.subr.bf16.mxu1 %v14668_v53  ;;  %v14734_v53 = vld [vmem:[%s17834_s7 + $0x444] ss:$16 sps:$4 sm:$0xff]  }
 0x582   :  { %10786 = vmatpush1.bf16.msra.mxu0 %v14669_v26  ;;  %v14735_v26 = vld [vmem:[%s17834_s7 + $0x388] ss:$16 sps:$4 sm:$0xff]  }
 0x583   :  { %10511 = vmatpush1.bf16.msra.mxu1 %v14666_v21  ;;  %10787 = vmatprep.subr.bf16.mxu0 %v14677_v13  ;;  %v14732_v21 = vld [vmem:[%s17834_s7 + $0x440] ss:$16 sps:$4 sm:$0xff]   ;;  %v14743_v13 = vld [vmem:[%s17834_s7 + $0x3ac] ss:$16 sps:$4 sm:$0xff]  }
 0x584   :  { %10512 = vmatprep.subr.bf16.mxu1 %v14674_v14  ;;  %v14740_v14 = vld [vmem:[%s17834_s7 + $0x464] ss:$16 sps:$4 sm:$0xff]  }
 0x586   :  { %10788 = vmatpush1.bf16.msra.mxu0 %v14675_v15  ;;  %v14741_v15 = vld [vmem:[%s17834_s7 + $0x3a8] ss:$16 sps:$4 sm:$0xff]  }
 0x587   :  { %10513 = vmatpush1.bf16.msra.mxu1 %v14672_v4  ;;  %10789 = vmatprep.subr.bf16.mxu0 %v14683_v17  ;;  %v14738_v4 = vld [vmem:[%s17834_s7 + $0x460] ss:$16 sps:$4 sm:$0xff]   ;;  %v14749_v17 = vld [vmem:[%s17834_s7 + $0x3cc] ss:$16 sps:$4 sm:$0xff]  }
 0x588   :  { %10514 = vmatprep.subr.bf16.mxu1 %v14680_v19  ;;  %v14746_v19 = vld [vmem:[%s17834_s7 + $0x484] ss:$16 sps:$4 sm:$0xff]  }
 0x58a   :  { %10790 = vmatpush1.bf16.msra.mxu0 %v14681_v49  ;;  %v14747_v49 = vld [vmem:[%s17834_s7 + $0x3c8] ss:$16 sps:$4 sm:$0xff]  }
 0x58b   :  { %10515 = vmatpush1.bf16.msra.mxu1 %v14678_v23  ;;  %10791 = vmatprep.subr.bf16.mxu0 %v14689_v24  ;;  %v14744_v23 = vld [vmem:[%s17834_s7 + $0x480] ss:$16 sps:$4 sm:$0xff]   ;;  %v14755_v24 = vld [vmem:[%s17834_s7 + $0x3ec] ss:$16 sps:$4 sm:$0xff]  }
 0x58c   :  { %10516 = vmatprep.subr.bf16.mxu1 %v14686_v27  ;;  %v14752_v27 = vld [vmem:[%s17834_s7 + $0x4a4] ss:$16 sps:$4 sm:$0xff]  }
 0x58e   :  { %10792 = vmatpush1.bf16.msra.mxu0 %v14687_v29  ;;  %v14753_v29 = vld [vmem:[%s17834_s7 + $0x3e8] ss:$16 sps:$4 sm:$0xff]  }
 0x58f   :  { %10517 = vmatpush1.bf16.msra.mxu1 %v14684_v25  ;;  %10793 = vmatprep.subr.bf16.mxu0 %v14695_v32  ;;  %v14750_v25 = vld [vmem:[%s17834_s7 + $0x4a0] ss:$16 sps:$4 sm:$0xff]   ;;  %v14761_v32 = vld [vmem:[%s17834_s7 + $0x40c] ss:$16 sps:$4 sm:$0xff]  }
 0x590   :  { %10518 = vmatprep.subr.bf16.mxu1 %v14692_v34  ;;  %v14758_v34 = vld [vmem:[%s17834_s7 + $0x4c4] ss:$16 sps:$4 sm:$0xff]  }
 0x592   :  { %10794 = vmatpush1.bf16.msra.mxu0 %v14693_v33  ;;  %v14759_v33 = vld [vmem:[%s17834_s7 + $0x408] ss:$16 sps:$4 sm:$0xff]  }
 0x593   :  { %10519 = vmatpush1.bf16.msra.mxu1 %v14690_v52  ;;  %10795 = vmatprep.subr.bf16.mxu0 %v14701_v37  ;;  %v14756_v52 = vld [vmem:[%s17834_s7 + $0x4c0] ss:$16 sps:$4 sm:$0xff]   ;;  %v14767_v37 = vld [vmem:[%s17834_s7 + $0x42c] ss:$16 sps:$4 sm:$0xff]  }
 0x594   :  { %10520 = vmatprep.subr.bf16.mxu1 %v14698_v41  ;;  %v14764_v41 = vld [vmem:[%s17834_s7 + $0x4e4] ss:$16 sps:$4 sm:$0xff]  }
 0x596   :  { %10796 = vmatpush1.bf16.msra.mxu0 %v14699_v42  ;;  %v14765_v42 = vld [vmem:[%s17834_s7 + $0x428] ss:$16 sps:$4 sm:$0xff]  }
 0x597   :  { %10521 = vmatpush1.bf16.msra.mxu1 %v14696_v43  ;;  %10797 = vmatprep.subr.bf16.mxu0 %v14707_v45  ;;  %v14762_v43 = vld [vmem:[%s17834_s7 + $0x4e0] ss:$16 sps:$4 sm:$0xff]   ;;  %v14773_v45 = vld [vmem:[%s17834_s7 + $0x44c] ss:$16 sps:$4 sm:$0xff]  }
 0x598   :  { %10522 = vmatprep.subr.bf16.mxu1 %v14704_v46  ;;  %v14770_v46 = vld [vmem:[%s17834_s7 + $0x504] ss:$16 sps:$4 sm:$0xff]  }
 0x59a   :  { %10798 = vmatpush1.bf16.msra.mxu0 %v14705_v47  ;;  %v14771_v47 = vld [vmem:[%s17834_s7 + $0x448] ss:$16 sps:$4 sm:$0xff]  }
 0x59b   :  { %10523 = vmatpush1.bf16.msra.mxu1 %v14702_v48  ;;  %10799 = vmatprep.subr.bf16.mxu0 %v14713_v50  ;;  %v14768_v48 = vld [vmem:[%s17834_s7 + $0x500] ss:$16 sps:$4 sm:$0xff]   ;;  %v14779_v50 = vld [vmem:[%s17834_s7 + $0x46c] ss:$16 sps:$4 sm:$0xff]  }
 0x59c   :  { %10524 = vmatprep.subr.bf16.mxu1 %v14710_v55  ;;  %v14777_v55 = vld [vmem:[%s17834_s7 + $0x468] ss:$16 sps:$4 sm:$0xff]  }
 0x59e   :  { %10800 = vmatpush1.bf16.msra.mxu0 %v14711_v57  ;;  %v14785_v57 = vld [vmem:[%s17834_s7 + $0x48c] ss:$16 sps:$4 sm:$0xff]  }
 0x59f   :  { %10525 = vmatpush1.bf16.msra.mxu1 %v14708_v61  ;;  %10801 = vmatprep.subr.bf16.mxu0 %v14719_v12  ;;  %v14782_v61 = vld [vmem:[%s17834_s7 + $0x544] ss:$16 sps:$4 sm:$0xff]   ;;  %v14783_v12 = vld [vmem:[%s17834_s7 + $0x488] ss:$16 sps:$4 sm:$0xff]  }
 0x5a0   :  { %10526 = vmatprep.subr.bf16.mxu1 %v14716_v40  ;;  %v17046_v40 = vld [vmem:[#allocation9 + $0x8] sm:$0x1f] }
 0x5a2   :  { %10802 = vmatpush1.bf16.msra.mxu0 %v14717_v63  ;;  %v14788_v63 = vld [vmem:[%s17834_s7 + $0x564] ss:$16 sps:$4 sm:$0xff]  }
 0x5a3   :  { %10527 = vmatpush1.bf16.msra.mxu1 %v14714_v0  ;;  %10803 = vmatprep.subr.bf16.mxu0 %v14725_v36  ;;  %v3534_v0 = vrot.slane %v17046_v40, %v15975_v31  ;;  %v14789_v36 = vld [vmem:[%s17834_s7 + $0x4a8] ss:$16 sps:$4 sm:$0xff]  }
 0x5a4   :  { %10537 = vmatprep.subr.bf16.mxu1 %v14722_v44  ;;  %v3538_v44 = vrot.slane %v17046_v40, %v15830_v30 }
 0x5a6   :  { %10529 = vmatmul.mubr.bf16.vlgmr.msra.gmra.mrb[32].mxu1 %v8019_v6  ;;  %10804 = vmatpush1.bf16.msra.mxu0 %v14723_v3 }
 0x5a7   :  { %10538 = vmatpush1.bf16.msra.mxu1 %v14720_v5  ;;  %10569 = vmatprep.mubr.bf16.mxu1 %v8022_v39  ;;  %v14794_v5 = vld [vmem:[%s17834_s7 + $0x584] ss:$16 sps:$4 sm:$0xff]  }
 0x5a8   :  { %10539 = vmatprep.subr.bf16.mxu1 %v14728_v28  ;;  %10805 = vmatprep.subr.bf16.mxu0 %v14731_v7 }
 0x5aa   :  { %10806 = vmatpush1.bf16.msra.mxu0 %v14729_v16 }
 0x5ab   :  { %10540 = vmatpush1.bf16.msra.mxu1 %v14726_v59  ;;  %10807 = vmatprep.subr.bf16.mxu0 %v14737_v38  ;;  %v14795_v59 = vld [vmem:[%s17834_s7 + $0x4c8] ss:$16 sps:$4 sm:$0xff]  }
 0x5ac   :  { %10541 = vmatprep.subr.bf16.mxu1 %v14734_v53 }
 0x5ae   :  { %10808 = vmatpush1.bf16.msra.mxu0 %v14735_v26 }
 0x5af   :  { %10542 = vmatpush1.bf16.msra.mxu1 %v14732_v21  ;;  %10809 = vmatprep.subr.bf16.mxu0 %v14743_v13  ;;  %v14792_v21 = vld [vmem:[%s17834_s7 + $0x580] ss:$16 sps:$4 sm:$0xff]   ;;  %v14803_v13 = vld [vmem:[%s17834_s7 + $0x4ec] ss:$16 sps:$4 sm:$0xff]  }
 0x5b0   :  { %10543 = vmatprep.subr.bf16.mxu1 %v14740_v14 }
 0x5b2   :  { %10810 = vmatpush1.bf16.msra.mxu0 %v14741_v15  ;;  %v14800_v15 = vld [vmem:[%s17834_s7 + $0x5a4] ss:$16 sps:$4 sm:$0xff]  }
 0x5b3   :  { %10544 = vmatpush1.bf16.msra.mxu1 %v14738_v4  ;;  %10811 = vmatprep.subr.bf16.mxu0 %v14749_v17  ;;  %v3521_v4 = vsub.s32 7, %v15789_v8  ;;  %v14801_v17 = vld [vmem:[%s17834_s7 + $0x4e8] ss:$16 sps:$4 sm:$0xff]   ;;  %v14911_v8 = vld [vmem:[%s17834_s7 + $0x72c] ss:$16 sps:$4 sm:$0xff]  }
 0x5b4   :  { %10545 = vmatprep.subr.bf16.mxu1 %v14746_v19  ;;  %v14798_v19 = vld [vmem:[%s17834_s7 + $0x5a0] ss:$16 sps:$4 sm:$0xff]  }
 0x5b6   :  { %10812 = vmatpush1.bf16.msra.mxu0 %v14747_v49  ;;  %v14809_v49 = vld [vmem:[%s17834_s7 + $0x50c] ss:$16 sps:$4 sm:$0xff]  }
 0x5b7   :  { %10546 = vmatpush1.bf16.msra.mxu1 %v14744_v23  ;;  %10813 = vmatprep.subr.bf16.mxu0 %v14755_v24  ;;  %v3510_v23 = vrot.slane %v16538_v58, %v16031_v54  ;;  %v14806_v24 = vld [vmem:[%s17834_s7 + $0x5c4] ss:$16 sps:$4 sm:$0xff]  }
 0x5b8   :  { %10547 = vmatprep.subr.bf16.mxu1 %v14752_v27  ;;  %v3522_v27 = vrot.slane %v16538_v58, %v3521_v4  ;;  %v14812_v58 = vld [vmem:[%s17834_s7 + $0x5e4] ss:$16 sps:$4 sm:$0xff]  }
 0x5ba   :  { %10814 = vmatpush1.bf16.msra.mxu0 %v14753_v29  ;;  %v14807_v29 = vld [vmem:[%s17834_s7 + $0x508] ss:$16 sps:$4 sm:$0xff]  }
 0x5bb   :  { %10548 = vmatpush1.bf16.msra.mxu1 %v14750_v25  ;;  %10824 = vmatprep.subr.bf16.mxu0 %v14761_v32  ;;  %v14804_v25 = vld [vmem:[%s17834_s7 + $0x5c0] ss:$16 sps:$4 sm:$0xff]   ;;  %v14815_v32 = vld [vmem:[%s17834_s7 + $0x52c] ss:$16 sps:$4 sm:$0xff]  }
 0x5bc   :  { %10549 = vmatprep.subr.bf16.mxu1 %v14758_v34  ;;  %v12988_v34 = vadd.f32 %v16530_v18, %v3510_v23  ;;  %v14821_v18 = vld [vmem:[%s17834_s7 + $0x54c] ss:$16 sps:$4 sm:$0xff]   ;;  %v14846_v23 = vld [vmem:[%s17834_s7 + $0x6a0] ss:$16 sps:$4 sm:$0xff]  }
 0x5bd   :  { %10816 = vmatmul.mubr.bf16.vlgmr.msra.gmra.mrb[44].mxu0 %v8019_v6 }
 0x5be   :  { %10825 = vmatpush1.bf16.msra.mxu0 %v14759_v33  ;;  %10856 = vmatprep.mubr.bf16.mxu0 %v8022_v39  ;;  %v12991_v33 = vadd.f32 %v16536_v22, %v3522_v27  ;;  %v14818_v22 = vld [vmem:[%s17834_s7 + $0x604] ss:$16 sps:$4 sm:$0xff]  }
 0x5bf   :  { %10550 = vmatpush1.bf16.msra.mxu1 %v14756_v52  ;;  %10826 = vmatprep.subr.bf16.mxu0 %v14767_v37  ;;  %v14813_v52 = vld [vmem:[%s17834_s7 + $0x528] ss:$16 sps:$4 sm:$0xff]   ;;  %v14810_v37 = vld [vmem:[%s17834_s7 + $0x5e0] ss:$16 sps:$4 sm:$0xff]   ;;  %v14854_v27 = vld [vmem:[%s17834_s7 + $0x6c4] ss:$16 sps:$4 sm:$0xff]  }
 0x5c0   :  { %10551 = vmatprep.subr.bf16.mxu1 %v14764_v41  ;;  %v8008_v41 = vmax.f32 %v12988_v34, 0.0 }
 0x5c2   :  { %10827 = vmatpush1.bf16.msra.mxu0 %v14765_v42  ;;  %v8011_v42 = vmax.f32 %v12991_v33, 0.0  ;;  %v14863_v33 = vld [vmem:[%s17834_s7 + $0x62c] ss:$16 sps:$4 sm:$0xff]  }
 0x5c3   :  { %10552 = vmatpush1.bf16.msra.mxu1 %v14762_v43  ;;  %10828 = vmatprep.subr.bf16.mxu0 %v14773_v45  ;;  %v14819_v43 = vld [vmem:[%s17834_s7 + $0x548] ss:$16 sps:$4 sm:$0xff]   ;;  %v14816_v45 = vld [vmem:[%s17834_s7 + $0x600] ss:$16 sps:$4 sm:$0xff]  }
 0x5c4   :  { %10553 = vmatprep.subr.bf16.mxu1 %v14770_v46  ;;  %v17138_v46 = vpack.c.bf16 %v8008_v41, %v8008_v41  ;;  %v14858_v41 = vld [vmem:[%s17834_s7 + $0x6e0] ss:$16 sps:$4 sm:$0xff]  }
 0x5c6   :  { %10829 = vmatpush1.bf16.msra.mxu0 %v14771_v47  ;;  %v14824_v47 = vld [vmem:[%s17834_s7 + $0x624] ss:$16 sps:$4 sm:$0xff]  }
 0x5c7   :  { %10554 = vmatpush1.bf16.msra.mxu1 %v14768_v48  ;;  %10830 = vmatprep.subr.bf16.mxu0 %v14779_v50  ;;  %v14827_v48 = vld [vmem:[%s17834_s7 + $0x56c] ss:$16 sps:$4 sm:$0xff]   ;;  %v17146_v50 = vpack.c.bf16 %v8011_v42, %v8011_v42  ;;  %v14866_v42 = vld [vmem:[%s17834_s7 + $0x704] ss:$16 sps:$4 sm:$0xff]  }
 0x5c8   :  { %10555 = vmatprep.subr.bf16.mxu1 %v14776_v51  ;;  %v14825_v51 = vld [vmem:[%s17834_s7 + $0x568] ss:$16 sps:$4 sm:$0xff]  }
 0x5ca   :  { %10831 = vmatpush1.bf16.msra.mxu0 %v14777_v55  ;;  %v14822_v55 = vld [vmem:[%s17834_s7 + $0x620] ss:$16 sps:$4 sm:$0xff]  }
 0x5cb   :  { %10556 = vmatpush1.bf16.msra.mxu1 %v14774_v60  ;;  %10832 = vmatprep.subr.bf16.mxu0 %v14785_v57  ;;  %v14833_v60 = vld [vmem:[%s17834_s7 + $0x58c] ss:$16 sps:$4 sm:$0xff]   ;;  %v14830_v57 = vld [vmem:[%s17834_s7 + $0x644] ss:$16 sps:$4 sm:$0xff]  }
 0x5cc   :  { %10557 = vmatprep.subr.bf16.mxu1 %v14782_v61  ;;  %v14831_v61 = vld [vmem:[%s17834_s7 + $0x588] ss:$16 sps:$4 sm:$0xff]  }
 0x5ce   :  { %10833 = vmatpush1.bf16.msra.mxu0 %v14783_v12  ;;  %v14828_v12 = vld [vmem:[%s17834_s7 + $0x640] ss:$16 sps:$4 sm:$0xff]  }
 0x5cf   :  { %10558 = vmatpush1.bf16.msra.mxu1 %v14780_v62  ;;  %10834 = vmatprep.subr.bf16.mxu0 %v14791_v9  ;;  %v14839_v62 = vld [vmem:[%s17834_s7 + $0x5ac] ss:$16 sps:$4 sm:$0xff]   ;;  %v14836_v9 = vld [vmem:[%s17834_s7 + $0x664] ss:$16 sps:$4 sm:$0xff]  }
 0x5d0   :  { %v17067_v3 = vpop.f32.mrb[32].mxu0  ;;  %10559 = vmatprep.subr.bf16.mxu1 %v14788_v63  ;;  %v14837_v63 = vld [vmem:[%s17834_s7 + $0x5a8] ss:$16 sps:$4 sm:$0xff]  }
 0x5d1   :  { %v7837_v6 = vpop.f32.mrb[20].mxu1  ;;  %v17072_v28 = vpop.f32.mrb[33].mxu0 }
 0x5d2   :  { %v17074_v7 = vadd.f32 %v7837_v6, %v3534_v0  ;;  %v7839_v39 = vpop.f32.mrb[21].mxu1  ;;  %10835 = vmatpush1.bf16.msra.mxu0 %v14789_v36  ;;  %v7677_v16 = vpop.f32.mrb[34].mxu0  ;;  %v14834_v0 = vld [vmem:[%s17834_s7 + $0x660] ss:$16 sps:$4 sm:$0xff]   ;;  %v14845_v36 = vld [vmem:[%s17834_s7 + $0x5cc] ss:$16 sps:$4 sm:$0xff]  }
 0x5d3   :  { %v17079_v38 = vadd.f32 %v7839_v39, %v3538_v44  ;;  %10560 = vmatpush1.bf16.msra.mxu1 %v14786_v1  ;;  %v7841_v53 = vpop.f32.mrb[22].mxu1  ;;  %v7678_v26 = vpop.f32.mrb[35].mxu0  ;;  %10836 = vmatprep.subr.bf16.mxu0 %v14797_v2  ;;  %v3542_v44 = vrot.slane %v17046_v40, %v16031_v54  ;;  %v14842_v2 = vld [vmem:[%s17834_s7 + $0x684] ss:$16 sps:$4 sm:$0xff]   ;;  %v14840_v54 = vld [vmem:[%s17834_s7 + $0x680] ss:$16 sps:$4 sm:$0xff]  }
 0x5d4   :  { %v7842_v14 = vpop.f32.mrb[23].mxu1  ;;  %10561 = vmatprep.subr.bf16.mxu1 %v14794_v5  ;;  %v14843_v53 = vld [vmem:[%s17834_s7 + $0x5c8] ss:$16 sps:$4 sm:$0xff]  }
 0x5d5   :  { %v14851_v14 = vld [vmem:[%s17834_s7 + $0x5ec] ss:$16 sps:$4 sm:$0xff]  }
 0x5d6   :  { %10837 = vmatpush1.bf16.msra.mxu0 %v14795_v59 }
 0x5d7   :  { %10562 = vmatpush1.bf16.msra.mxu1 %v14792_v21  ;;  %10838 = vmatprep.subr.bf16.mxu0 %v14803_v13 }
 0x5d8   :  { %10563 = vmatprep.subr.bf16.mxu1 %v14800_v15 }
 0x5da   :  { %10839 = vmatpush1.bf16.msra.mxu0 %v14801_v17  ;;  %v14848_v17 = vld [vmem:[%s17834_s7 + $0x6a4] ss:$16 sps:$4 sm:$0xff]  }
 0x5db   :  { %10564 = vmatpush1.bf16.msra.mxu1 %v14798_v19  ;;  %10840 = vmatprep.subr.bf16.mxu0 %v14809_v49  ;;  %v14849_v49 = vld [vmem:[%s17834_s7 + $0x5e8] ss:$16 sps:$4 sm:$0xff]  }
 0x5dc   :  { %10565 = vmatprep.subr.bf16.mxu1 %v14806_v24  ;;  %v14857_v24 = vld [vmem:[%s17834_s7 + $0x60c] ss:$16 sps:$4 sm:$0xff]  }
 0x5de   :  { %10841 = vmatpush1.bf16.msra.mxu0 %v14807_v29 }
 0x5df   :  { %10566 = vmatpush1.bf16.msra.mxu1 %v14804_v25  ;;  %10842 = vmatprep.subr.bf16.mxu0 %v14815_v32  ;;  %v14855_v32 = vld [vmem:[%s17834_s7 + $0x608] ss:$16 sps:$4 sm:$0xff]  }
 0x5e0   :  { %10567 = vmatprep.subr.bf16.mxu1 %v14812_v58  ;;  %v14852_v58 = vld [vmem:[%s17834_s7 + $0x6c0] ss:$16 sps:$4 sm:$0xff]  }
 0x5e2   :  { %10843 = vmatpush1.bf16.msra.mxu0 %v14813_v52 }
 0x5e3   :  { %10568 = vmatpush1.bf16.msra.mxu1 %v14810_v37  ;;  %10844 = vmatprep.subr.bf16.mxu0 %v14821_v18  ;;  %v14860_v37 = vld [vmem:[%s17834_s7 + $0x6e4] ss:$16 sps:$4 sm:$0xff]   ;;  %v14861_v18 = vld [vmem:[%s17834_s7 + $0x628] ss:$16 sps:$4 sm:$0xff]  }
 0x5e4   :  { %10578 = vmatprep.subr.bf16.mxu1 %v14818_v22  ;;  %v14869_v22 = vld [vmem:[%s17834_s7 + $0x64c] ss:$16 sps:$4 sm:$0xff]  }
 0x5e6   :  { %10570 = vmatmul.mubr.bf16.vlgmr.msra.gmra.mrb[32].mxu1 %v17138_v46  ;;  %10845 = vmatpush1.bf16.msra.mxu0 %v14819_v43  ;;  %v14867_v43 = vld [vmem:[%s17834_s7 + $0x648] ss:$16 sps:$4 sm:$0xff]  }
 0x5e7   :  { %10579 = vmatpush1.bf16.msra.mxu1 %v14816_v45  ;;  %10610 = vmatprep.mubr.bf16.mxu1 %v17146_v50  ;;  %v14864_v45 = vld [vmem:[%s17834_s7 + $0x700] ss:$16 sps:$4 sm:$0xff]  }
 0x5e8   :  { %10580 = vmatprep.subr.bf16.mxu1 %v14824_v47  ;;  %10846 = vmatprep.subr.bf16.mxu0 %v14827_v48  ;;  %v14872_v47 = vld [vmem:[%s17834_s7 + $0x724] ss:$16 sps:$4 sm:$0xff]   ;;  %v14873_v48 = vld [vmem:[%s17834_s7 + $0x668] ss:$16 sps:$4 sm:$0xff]  }
 0x5ea   :  { %10847 = vmatpush1.bf16.msra.mxu0 %v14825_v51  ;;  %v14881_v51 = vld [vmem:[%s17834_s7 + $0x68c] ss:$16 sps:$4 sm:$0xff]  }
 0x5eb   :  { %10581 = vmatpush1.bf16.msra.mxu1 %v14822_v55  ;;  %10848 = vmatprep.subr.bf16.mxu0 %v14833_v60  ;;  %v14878_v55 = vld [vmem:[%s17834_s7 + $0x744] ss:$16 sps:$4 sm:$0xff]   ;;  %v14879_v60 = vld [vmem:[%s17834_s7 + $0x688] ss:$16 sps:$4 sm:$0xff]  }
 0x5ec   :  { %10582 = vmatprep.subr.bf16.mxu1 %v14830_v57  ;;  %v14876_v57 = vld [vmem:[%s17834_s7 + $0x740] ss:$16 sps:$4 sm:$0xff]  }
 0x5ee   :  { %10849 = vmatpush1.bf16.msra.mxu0 %v14831_v61  ;;  %v14887_v61 = vld [vmem:[%s17834_s7 + $0x6ac] ss:$16 sps:$4 sm:$0xff]  }
 0x5ef   :  { %10583 = vmatpush1.bf16.msra.mxu1 %v14828_v12  ;;  %10850 = vmatprep.subr.bf16.mxu0 %v14839_v62  ;;  %v14884_v12 = vld [vmem:[%s17834_s7 + $0x764] ss:$16 sps:$4 sm:$0xff]   ;;  %v14885_v62 = vld [vmem:[%s17834_s7 + $0x6a8] ss:$16 sps:$4 sm:$0xff]  }
 0x5f0   :  { %v12861_v1 = vpop.f32.mrb[36].mxu0  ;;  %10584 = vmatprep.subr.bf16.mxu1 %v14836_v9  ;;  %v14882_v9 = vld [vmem:[%s17834_s7 + $0x760] ss:$16 sps:$4 sm:$0xff]  }
 0x5f1   :  { %v12883_v5 = vpop.f32.mrb[24].mxu1  ;;  %v12862_v6 = vpop.f32.mrb[37].mxu0 }
 0x5f2   :  { %v12863_v39 = vadd.f32 %v12862_v6, %v12861_v1  ;;  %v12884_v16 = vpop.f32.mrb[25].mxu1  ;;  %v12864_v59 = vpop.f32.mrb[38].mxu0  ;;  %10851 = vmatpush1.bf16.msra.mxu0 %v14837_v63  ;;  %v14893_v63 = vld [vmem:[%s17834_s7 + $0x6cc] ss:$16 sps:$4 sm:$0xff]  }
 0x5f3   :  { %v12885_v26 = vadd.f32 %v12884_v16, %v12883_v5  ;;  %v12886_v21 = vpop.f32.mrb[26].mxu1  ;;  %10585 = vmatpush1.bf16.msra.mxu1 %v14834_v0  ;;  %v12865_v13 = vpop.f32.mrb[39].mxu0  ;;  %10852 = vmatprep.subr.bf16.mxu0 %v14845_v36  ;;  %v14890_v36 = vld [vmem:[%s17834_s7 + $0x784] ss:$16 sps:$4 sm:$0xff]   ;;  %v14891_v5 = vld [vmem:[%s17834_s7 + $0x6c8] ss:$16 sps:$4 sm:$0xff]  }
 0x5f4   :  { %v7879_v15 = vadd.f32 %v12863_v39, %v3542_v44  ;;  %v12887_v4 = vpop.f32.mrb[27].mxu1  ;;  %10586 = vmatprep.subr.bf16.mxu1 %v14842_v2  ;;  %v14888_v39 = vld [vmem:[%s17834_s7 + $0x780] ss:$16 sps:$4 sm:$0xff]   ;;  %v14899_v16 = vld [vmem:[%s17834_s7 + $0x6ec] ss:$16 sps:$4 sm:$0xff]  }
 0x5f5   :  { %v14897_v21 = vld [vmem:[%s17834_s7 + $0x6e8] ss:$16 sps:$4 sm:$0xff]   ;;  %v14894_v13 = vld [vmem:[%s17834_s7 + $0x7a0] ss:$16 sps:$4 sm:$0xff]   ;;  %v14902_v4 = vld [vmem:[%s17834_s7 + $0x7c4] ss:$16 sps:$4 sm:$0xff]  }
 0x5f6   :  { %v17200_v19 = vadd.f32 %v12885_v26, %v7879_v15  ;;  %10853 = vmatpush1.bf16.msra.mxu0 %v14843_v53  ;;  %v14896_v53 = vld [vmem:[%s17834_s7 + $0x7a4] ss:$16 sps:$4 sm:$0xff]  }
 0x5f7   :  { %10587 = vmatpush1.bf16.msra.mxu1 %v14840_v54  ;;  %10854 = vmatprep.subr.bf16.mxu0 %v14851_v14  ;;  %v14905_v54 = vld [vmem:[%s17834_s7 + $0x70c] ss:$16 sps:$4 sm:$0xff]   ;;  %v15179_v14 = vld [vmem:[#allocation9] sm:$0xff] }
 0x5f8   :  { %10588 = vmatprep.subr.bf16.mxu1 %v14848_v17  ;;  %v3518_v15 = vrot.slane %v15179_v14, %v975_v56  ;;  %v3530_v17 = vrot.slane %v17046_v40, %v15797_v11  ;;  %v14969_v14 = vld [vmem:[%s17834_s7 + $0x868] ss:$16 sps:$4 sm:$0xff]  }
 0x5f9   :  { %v17214_v29 = vpop.f32.mrb[28].mxu1 }
 0x5fa   :  { %v12976_v25 = vpop.f32.mrb[29].mxu1  ;;  %10855 = vmatpush1.bf16.msra.mxu0 %v14849_v49  ;;  %v14900_v49 = vld [vmem:[%s17834_s7 + $0x7c0] ss:$16 sps:$4 sm:$0xff]   ;;  %v12990_v56 = vadd.f32 %v16532_v20, %v3518_v15  ;;  %v14917_v20 = vld [vmem:[%s17834_s7 + $0x74c] ss:$16 sps:$4 sm:$0xff]  }
 0x5fb   :  { %v8001_v34 = vpop.f32.mrb[30].mxu1  ;;  %10589 = vmatpush1.bf16.msra.mxu1 %v14846_v23  ;;  %10865 = vmatprep.subr.bf16.mxu0 %v14857_v24  ;;  %v14908_v23 = vld [vmem:[%s17834_s7 + $0x7e4] ss:$16 sps:$4 sm:$0xff]   ;;  %v12993_v24 = vadd.f32 %v17072_v28, %v3530_v17  ;;  %v14966_v15 = vld [vmem:[%s17834_s7 + $0x920] ss:$16 sps:$4 sm:$0xff]  }
 0x5fc   :  { %v12977_v52 = vpop.f32.mrb[31].mxu1  ;;  %10590 = vmatprep.subr.bf16.mxu1 %v14854_v27  ;;  %v14909_v27 = vld [vmem:[%s17834_s7 + $0x728] ss:$16 sps:$4 sm:$0xff]   ;;  %v8010_v25 = vmax.f32 %v12990_v56, 0.0  ;;  %v14914_v28 = vld [vmem:[%s17834_s7 + $0x804] ss:$16 sps:$4 sm:$0xff]  }
 0x5fd   :  { %10857 = vmatmul.mubr.bf16.vlgmr.msra.gmra.mrb[44].mxu0 %v17138_v46  ;;  %v14875_v46 = vld [vmem:[%s17834_s7 + $0x66c] ss:$16 sps:$4 sm:$0xff]   ;;  %v14915_v34 = vld [vmem:[%s17834_s7 + $0x748] ss:$16 sps:$4 sm:$0xff]   ;;  %v14920_v52 = vld [vmem:[%s17834_s7 + $0x824] ss:$16 sps:$4 sm:$0xff]  }
 0x5fe   :  { %10866 = vmatpush1.bf16.msra.mxu0 %v14855_v32  ;;  %10897 = vmatprep.mubr.bf16.mxu0 %v17146_v50  ;;  %v14870_v50 = vld [vmem:[%s17834_s7 + $0x720] ss:$16 sps:$4 sm:$0xff]   ;;  %v8013_v32 = vmax.f32 %v12993_v24, 0.0  ;;  %v14974_v17 = vld [vmem:[%s17834_s7 + $0x944] ss:$16 sps:$4 sm:$0xff]  }
 0x5ff   :  { %10591 = vmatpush1.bf16.msra.mxu1 %v14852_v58  ;;  %10867 = vmatprep.subr.bf16.mxu0 %v14863_v33  ;;  %v14912_v58 = vld [vmem:[%s17834_s7 + $0x800] ss:$16 sps:$4 sm:$0xff]   ;;  %v8023_v33 = vpack.c.bf16 %v8010_v25, %v8010_v25  ;;  %v14980_v56 = vld [vmem:[%s17834_s7 + $0x964] ss:$16 sps:$4 sm:$0xff]  }
 0x600   :  { %10592 = vmatprep.subr.bf16.mxu1 %v14860_v37  ;;  %v14923_v37 = vld [vmem:[%s17834_s7 + $0x76c] ss:$16 sps:$4 sm:$0xff]   ;;  %v14978_v24 = vld [vmem:[%s17834_s7 + $0x960] ss:$16 sps:$4 sm:$0xff]  }
 0x601   :  { %v14984_v25 = vld [vmem:[%s17834_s7 + $0x980] ss:$16 sps:$4 sm:$0xff]  }
 0x602   :  { %10868 = vmatpush1.bf16.msra.mxu0 %v14861_v18  ;;  %v8026_v18 = vpack.c.bf16 %v8013_v32, %v8013_v32  ;;  %v14992_v32 = vld [vmem:[%s17834_s7 + $0x9a4] ss:$16 sps:$4 sm:$0xff]  }
 0x603   :  { %10593 = vmatpush1.bf16.msra.mxu1 %v14858_v41  ;;  %10869 = vmatprep.subr.bf16.mxu0 %v14869_v22  ;;  %v14921_v41 = vld [vmem:[%s17834_s7 + $0x768] ss:$16 sps:$4 sm:$0xff]   ;;  %v14918_v22 = vld [vmem:[%s17834_s7 + $0x820] ss:$16 sps:$4 sm:$0xff]  }
 0x604   :  { %10594 = vmatprep.subr.bf16.mxu1 %v14866_v42  ;;  %v14929_v42 = vld [vmem:[%s17834_s7 + $0x78c] ss:$16 sps:$4 sm:$0xff]  }
 0x606   :  { %10870 = vmatpush1.bf16.msra.mxu0 %v14867_v43  ;;  %v14926_v43 = vld [vmem:[%s17834_s7 + $0x844] ss:$16 sps:$4 sm:$0xff]  }
 0x607   :  { %10595 = vmatpush1.bf16.msra.mxu1 %v14864_v45  ;;  %10871 = vmatprep.subr.bf16.mxu0 %v14875_v46  ;;  %v14927_v45 = vld [vmem:[%s17834_s7 + $0x788] ss:$16 sps:$4 sm:$0xff]   ;;  %v14924_v46 = vld [vmem:[%s17834_s7 + $0x840] ss:$16 sps:$4 sm:$0xff]  }
 0x608   :  { %10596 = vmatprep.subr.bf16.mxu1 %v14872_v47  ;;  %v14935_v47 = vld [vmem:[%s17834_s7 + $0x7ac] ss:$16 sps:$4 sm:$0xff]  }
 0x60a   :  { %10872 = vmatpush1.bf16.msra.mxu0 %v14873_v48  ;;  %v14932_v48 = vld [vmem:[%s17834_s7 + $0x864] ss:$16 sps:$4 sm:$0xff]  }
 0x60b   :  { %10597 = vmatpush1.bf16.msra.mxu1 %v14870_v50  ;;  %10873 = vmatprep.subr.bf16.mxu0 %v14881_v51  ;;  %v14933_v50 = vld [vmem:[%s17834_s7 + $0x7a8] ss:$16 sps:$4 sm:$0xff]   ;;  %v14930_v51 = vld [vmem:[%s17834_s7 + $0x860] ss:$16 sps:$4 sm:$0xff]  }
 0x60c   :  { %10598 = vmatprep.subr.bf16.mxu1 %v14878_v55  ;;  %v14941_v55 = vld [vmem:[%s17834_s7 + $0x7cc] ss:$16 sps:$4 sm:$0xff]  }
 0x60e   :  { %10874 = vmatpush1.bf16.msra.mxu0 %v14879_v60  ;;  %v14938_v60 = vld [vmem:[%s17834_s7 + $0x884] ss:$16 sps:$4 sm:$0xff]  }
 0x60f   :  { %10599 = vmatpush1.bf16.msra.mxu1 %v14876_v57  ;;  %10875 = vmatprep.subr.bf16.mxu0 %v14887_v61  ;;  %v14939_v57 = vld [vmem:[%s17834_s7 + $0x7c8] ss:$16 sps:$4 sm:$0xff]   ;;  %v14936_v61 = vld [vmem:[%s17834_s7 + $0x880] ss:$16 sps:$4 sm:$0xff]  }
 0x610   :  { %v12905_v0 = vpop.f32.mrb[40].mxu0  ;;  %10600 = vmatprep.subr.bf16.mxu1 %v14884_v12  ;;  %v14947_v12 = vld [vmem:[%s17834_s7 + $0x7ec] ss:$16 sps:$4 sm:$0xff]  }
 0x611   :  { %v12906_v1 = vpop.f32.mrb[41].mxu0 }
 0x612   :  { %v12907_v44 = vadd.f32 %v12906_v1, %v12905_v0  ;;  %v12908_v2 = vpop.f32.mrb[42].mxu0  ;;  %10876 = vmatpush1.bf16.msra.mxu0 %v14885_v62  ;;  %v14944_v62 = vld [vmem:[%s17834_s7 + $0x8a4] ss:$16 sps:$4 sm:$0xff]   ;;  %v14953_v0 = vld [vmem:[%s17834_s7 + $0x80c] ss:$16 sps:$4 sm:$0xff]  }
 0x613   :  { %10601 = vmatpush1.bf16.msra.mxu1 %v14882_v9  ;;  %v12909_v6 = vpop.f32.mrb[43].mxu0  ;;  %10877 = vmatprep.subr.bf16.mxu0 %v14893_v63  ;;  %v14945_v9 = vld [vmem:[%s17834_s7 + $0x7e8] ss:$16 sps:$4 sm:$0xff]   ;;  %v14942_v63 = vld [vmem:[%s17834_s7 + $0x8a0] ss:$16 sps:$4 sm:$0xff]  }
 0x614   :  { %v7959_v59 = vadd.f32 %v12907_v44, %v17200_v19  ;;  %10602 = vmatprep.subr.bf16.mxu1 %v14890_v36  ;;  %v14903_v19 = vld [vmem:[%s17834_s7 + $0x708] ss:$16 sps:$4 sm:$0xff]   ;;  %v14950_v36 = vld [vmem:[%s17834_s7 + $0x8c4] ss:$16 sps:$4 sm:$0xff]   ;;  %v14948_v44 = vld [vmem:[%s17834_s7 + $0x8c0] ss:$16 sps:$4 sm:$0xff]  }
 0x615   :  { %v14951_v1 = vld [vmem:[%s17834_s7 + $0x808] ss:$16 sps:$4 sm:$0xff]   ;;  %v14959_v2 = vld [vmem:[%s17834_s7 + $0x82c] ss:$16 sps:$4 sm:$0xff]  }
 0x616   :  { %v17304_v26 = vadd.f32 %v17214_v29, %v7959_v59  ;;  %10878 = vmatpush1.bf16.msra.mxu0 %v14891_v5  ;;  %v14906_v29 = vld [vmem:[%s17834_s7 + $0x7e0] ss:$16 sps:$4 sm:$0xff]   ;;  %v14956_v5 = vld [vmem:[%s17834_s7 + $0x8e4] ss:$16 sps:$4 sm:$0xff]   ;;  %v14957_v6 = vld [vmem:[%s17834_s7 + $0x828] ss:$16 sps:$4 sm:$0xff]  }
 0x617   :  { %10603 = vmatpush1.bf16.msra.mxu1 %v14888_v39  ;;  %10879 = vmatprep.subr.bf16.mxu0 %v14899_v16  ;;  %v14954_v39 = vld [vmem:[%s17834_s7 + $0x8e0] ss:$16 sps:$4 sm:$0xff]   ;;  %v14965_v16 = vld [vmem:[%s17834_s7 + $0x84c] ss:$16 sps:$4 sm:$0xff]   ;;  %v14962_v59 = vld [vmem:[%s17834_s7 + $0x904] ss:$16 sps:$4 sm:$0xff]  }
 0x618   :  { %10604 = vmatprep.subr.bf16.mxu1 %v14896_v53  ;;  %v14963_v53 = vld [vmem:[%s17834_s7 + $0x848] ss:$16 sps:$4 sm:$0xff]  }
 0x61a   :  { %10880 = vmatpush1.bf16.msra.mxu0 %v14897_v21  ;;  %v14960_v21 = vld [vmem:[%s17834_s7 + $0x900] ss:$16 sps:$4 sm:$0xff]  }
 0x61b   :  { %10605 = vmatpush1.bf16.msra.mxu1 %v14894_v13  ;;  %10881 = vmatprep.subr.bf16.mxu0 %v14905_v54  ;;  %v14971_v13 = vld [vmem:[%s17834_s7 + $0x86c] ss:$16 sps:$4 sm:$0xff]   ;;  %v14968_v54 = vld [vmem:[%s17834_s7 + $0x924] ss:$16 sps:$4 sm:$0xff]  }
 0x61c   :  { %10606 = vmatprep.subr.bf16.mxu1 %v14902_v4  ;;  %v14977_v4 = vld [vmem:[%s17834_s7 + $0x88c] ss:$16 sps:$4 sm:$0xff]  }
 0x61e   :  { %10882 = vmatpush1.bf16.msra.mxu0 %v14903_v19  ;;  %v14975_v19 = vld [vmem:[%s17834_s7 + $0x888] ss:$16 sps:$4 sm:$0xff]  }
 0x61f   :  { %10607 = vmatpush1.bf16.msra.mxu1 %v14900_v49  ;;  %10883 = vmatprep.subr.bf16.mxu0 %v14911_v8  ;;  %v14972_v49 = vld [vmem:[%s17834_s7 + $0x940] ss:$16 sps:$4 sm:$0xff]   ;;  %v14983_v8 = vld [vmem:[%s17834_s7 + $0x8ac] ss:$16 sps:$4 sm:$0xff]  }
 0x620   :  { %10608 = vmatprep.subr.bf16.mxu1 %v14908_v23  ;;  %v14981_v23 = vld [vmem:[%s17834_s7 + $0x8a8] ss:$16 sps:$4 sm:$0xff]  }
 0x622   :  { %10884 = vmatpush1.bf16.msra.mxu0 %v14909_v27  ;;  %v14989_v27 = vld [vmem:[%s17834_s7 + $0x8cc] ss:$16 sps:$4 sm:$0xff]  }
 0x623   :  { %10609 = vmatpush1.bf16.msra.mxu1 %v14906_v29  ;;  %10885 = vmatprep.subr.bf16.mxu0 %v14917_v20  ;;  %v14986_v29 = vld [vmem:[%s17834_s7 + $0x984] ss:$16 sps:$4 sm:$0xff]   ;;  %v14987_v20 = vld [vmem:[%s17834_s7 + $0x8c8] ss:$16 sps:$4 sm:$0xff]  }
 0x624   :  { %10619 = vmatprep.subr.bf16.mxu1 %v14914_v28  ;;  %v14995_v28 = vld [vmem:[%s17834_s7 + $0x8ec] ss:$16 sps:$4 sm:$0xff]  }
 0x626   :  { %10611 = vmatmul.mubr.bf16.vlgmr.msra.gmra.mrb[32].mxu1 %v8023_v33  ;;  %10886 = vmatpush1.bf16.msra.mxu0 %v14915_v34  ;;  %v14993_v34 = vld [vmem:[%s17834_s7 + $0x8e8] ss:$16 sps:$4 sm:$0xff]  }
 0x627   :  { %10620 = vmatpush1.bf16.msra.mxu1 %v14912_v58  ;;  %10651 = vmatprep.mubr.bf16.mxu1 %v8026_v18  ;;  %v14990_v58 = vld [vmem:[%s17834_s7 + $0x9a0] ss:$16 sps:$4 sm:$0xff]  }
 0x628   :  { %10621 = vmatprep.subr.bf16.mxu1 %v14920_v52  ;;  %10887 = vmatprep.subr.bf16.mxu0 %v14923_v37  ;;  %v3526_v52 = vrot.slane %v17046_v40, %v15794_v10  ;;  %v14998_v37 = vld [vmem:[%s17834_s7 + $0x9c4] ss:$16 sps:$4 sm:$0xff]   ;;  %v15007_v40 = vld [vmem:[%s17834_s7 + $0x92c] ss:$16 sps:$4 sm:$0xff]  }
 0x62a   :  { %10888 = vmatpush1.bf16.msra.mxu0 %v14921_v41  ;;  %v14996_v41 = vld [vmem:[%s17834_s7 + $0x9c0] ss:$16 sps:$4 sm:$0xff]  }
 0x62b   :  { %10622 = vmatpush1.bf16.msra.mxu1 %v14918_v22  ;;  %10889 = vmatprep.subr.bf16.mxu0 %v14929_v42  ;;  %v12992_v22 = vadd.f32 %v17067_v3, %v3526_v52  ;;  %v15004_v42 = vld [vmem:[%s17834_s7 + $0x9e4] ss:$16 sps:$4 sm:$0xff]   ;;  %v15013_v3 = vld [vmem:[%s17834_s7 + $0x94c] ss:$16 sps:$4 sm:$0xff]  }
 0x62c   :  { %10623 = vmatprep.subr.bf16.mxu1 %v14926_v43  ;;  %v15005_v43 = vld [vmem:[%s17834_s7 + $0x928] ss:$16 sps:$4 sm:$0xff]   ;;  %v15079_v52 = vld [vmem:[%s17834_s7 + $0xaac] ss:$16 sps:$4 sm:$0xff]  }
 0x62e   :  { %10890 = vmatpush1.bf16.msra.mxu0 %v14927_v45  ;;  %v15002_v45 = vld [vmem:[%s17834_s7 + $0x9e0] ss:$16 sps:$4 sm:$0xff]  }
 0x62f   :  { %10624 = vmatpush1.bf16.msra.mxu1 %v14924_v46  ;;  %10891 = vmatprep.subr.bf16.mxu0 %v14935_v47  ;;  %v8012_v46 = vmax.f32 %v12992_v22, 0.0  ;;  %v15010_v47 = vld [vmem:[%s17834_s7 + $0xa04] ss:$16 sps:$4 sm:$0xff]  }
 0x630   :  { %10625 = vmatprep.subr.bf16.mxu1 %v14932_v48  ;;  %v8015_v48 = vmax.f32 %v17079_v38, 0.0  ;;  %v15019_v38 = vld [vmem:[%s17834_s7 + $0x96c] ss:$16 sps:$4 sm:$0xff]   ;;  %v15082_v22 = vld [vmem:[%s17834_s7 + $0xb84] ss:$16 sps:$4 sm:$0xff]  }
 0x632   :  { %10892 = vmatpush1.bf16.msra.mxu0 %v14933_v50  ;;  %v15011_v50 = vld [vmem:[%s17834_s7 + $0x948] ss:$16 sps:$4 sm:$0xff]  }
 0x633   :  { %10626 = vmatpush1.bf16.msra.mxu1 %v14930_v51  ;;  %10893 = vmatprep.subr.bf16.mxu0 %v14941_v55  ;;  %v15008_v51 = vld [vmem:[%s17834_s7 + $0xa00] ss:$16 sps:$4 sm:$0xff]   ;;  %v8025_v55 = vpack.c.bf16 %v8012_v46, %v8012_v46  ;;  %v15089_v46 = vld [vmem:[%s17834_s7 + $0xae8] ss:$16 sps:$4 sm:$0xff]  }
 0x634   :  { %10627 = vmatprep.subr.bf16.mxu1 %v14938_v60  ;;  %v15016_v60 = vld [vmem:[%s17834_s7 + $0xa24] ss:$16 sps:$4 sm:$0xff]  }
 0x636   :  { %10894 = vmatpush1.bf16.msra.mxu0 %v14939_v57  ;;  %v8028_v57 = vpack.c.bf16 %v8015_v48, %v8015_v48  ;;  %v15097_v48 = vld [vmem:[%s17834_s7 + $0xb0c] ss:$16 sps:$4 sm:$0xff]  }
 0x637   :  { %10628 = vmatpush1.bf16.msra.mxu1 %v14936_v61  ;;  %10895 = vmatprep.subr.bf16.mxu0 %v14947_v12  ;;  %v15017_v61 = vld [vmem:[%s17834_s7 + $0x968] ss:$16 sps:$4 sm:$0xff]   ;;  %v15014_v12 = vld [vmem:[%s17834_s7 + $0xa20] ss:$16 sps:$4 sm:$0xff]  }
 0x638   :  { %10629 = vmatprep.subr.bf16.mxu1 %v14944_v62  ;;  %v15025_v62 = vld [vmem:[%s17834_s7 + $0x98c] ss:$16 sps:$4 sm:$0xff]  }
 0x63a   :  { %10896 = vmatpush1.bf16.msra.mxu0 %v14945_v9  ;;  %v15022_v9 = vld [vmem:[%s17834_s7 + $0xa44] ss:$16 sps:$4 sm:$0xff]  }
 0x63b   :  { %10630 = vmatpush1.bf16.msra.mxu1 %v14942_v63  ;;  %10906 = vmatprep.subr.bf16.mxu0 %v14953_v0  ;;  %v15023_v63 = vld [vmem:[%s17834_s7 + $0x988] ss:$16 sps:$4 sm:$0xff]   ;;  %v15020_v0 = vld [vmem:[%s17834_s7 + $0xa40] ss:$16 sps:$4 sm:$0xff]  }
 0x63c   :  { %10631 = vmatprep.subr.bf16.mxu1 %v14950_v36  ;;  %v15031_v36 = vld [vmem:[%s17834_s7 + $0x9ac] ss:$16 sps:$4 sm:$0xff]  }
 0x63d   :  { %10898 = vmatmul.mubr.bf16.vlgmr.msra.gmra.mrb[44].mxu0 %v8023_v33  ;;  %v15001_v33 = vld [vmem:[%s17834_s7 + $0x90c] ss:$16 sps:$4 sm:$0xff]  }
 0x63e   :  { %10907 = vmatpush1.bf16.msra.mxu0 %v14951_v1  ;;  %10938 = vmatprep.mubr.bf16.mxu0 %v8026_v18  ;;  %v14999_v18 = vld [vmem:[%s17834_s7 + $0x908] ss:$16 sps:$4 sm:$0xff]   ;;  %v15028_v1 = vld [vmem:[%s17834_s7 + $0xa64] ss:$16 sps:$4 sm:$0xff]  }
 0x63f   :  { %10632 = vmatpush1.bf16.msra.mxu1 %v14948_v44  ;;  %10908 = vmatprep.subr.bf16.mxu0 %v14959_v2  ;;  %v15029_v44 = vld [vmem:[%s17834_s7 + $0x9a8] ss:$16 sps:$4 sm:$0xff]   ;;  %v15026_v2 = vld [vmem:[%s17834_s7 + $0xa60] ss:$16 sps:$4 sm:$0xff]  }
 0x640   :  { %10633 = vmatprep.subr.bf16.mxu1 %v14956_v5  ;;  %v15037_v5 = vld [vmem:[%s17834_s7 + $0x9cc] ss:$16 sps:$4 sm:$0xff]  }
 0x642   :  { %10909 = vmatpush1.bf16.msra.mxu0 %v14957_v6  ;;  %v15034_v6 = vld [vmem:[%s17834_s7 + $0xa84] ss:$16 sps:$4 sm:$0xff]  }
 0x643   :  { %10634 = vmatpush1.bf16.msra.mxu1 %v14954_v39  ;;  %10910 = vmatprep.subr.bf16.mxu0 %v14965_v16  ;;  %v15035_v39 = vld [vmem:[%s17834_s7 + $0x9c8] ss:$16 sps:$4 sm:$0xff]   ;;  %v15032_v16 = vld [vmem:[%s17834_s7 + $0xa80] ss:$16 sps:$4 sm:$0xff]  }
 0x644   :  { %10635 = vmatprep.subr.bf16.mxu1 %v14962_v59  ;;  %v15043_v59 = vld [vmem:[%s17834_s7 + $0x9ec] ss:$16 sps:$4 sm:$0xff]  }
 0x646   :  { %10911 = vmatpush1.bf16.msra.mxu0 %v14963_v53  ;;  %v15040_v53 = vld [vmem:[%s17834_s7 + $0xaa4] ss:$16 sps:$4 sm:$0xff]  }
 0x647   :  { %10636 = vmatpush1.bf16.msra.mxu1 %v14960_v21  ;;  %10912 = vmatprep.subr.bf16.mxu0 %v14971_v13  ;;  %v15041_v21 = vld [vmem:[%s17834_s7 + $0x9e8] ss:$16 sps:$4 sm:$0xff]   ;;  %v15038_v13 = vld [vmem:[%s17834_s7 + $0xaa0] ss:$16 sps:$4 sm:$0xff]  }
 0x648   :  { %10637 = vmatprep.subr.bf16.mxu1 %v14968_v54  ;;  %v15049_v54 = vld [vmem:[%s17834_s7 + $0xa0c] ss:$16 sps:$4 sm:$0xff]  }
 0x64a   :  { %10913 = vmatpush1.bf16.msra.mxu0 %v14969_v14  ;;  %v15046_v14 = vld [vmem:[%s17834_s7 + $0xac4] ss:$16 sps:$4 sm:$0xff]  }
 0x64b   :  { %10638 = vmatpush1.bf16.msra.mxu1 %v14966_v15  ;;  %10914 = vmatprep.subr.bf16.mxu0 %v14977_v4  ;;  %v15047_v15 = vld [vmem:[%s17834_s7 + $0xa08] ss:$16 sps:$4 sm:$0xff]   ;;  %v15044_v4 = vld [vmem:[%s17834_s7 + $0xac0] ss:$16 sps:$4 sm:$0xff]  }
 0x64c   :  { %10639 = vmatprep.subr.bf16.mxu1 %v14974_v17  ;;  %v15055_v17 = vld [vmem:[%s17834_s7 + $0xa2c] ss:$16 sps:$4 sm:$0xff]  }
 0x64e   :  { %10915 = vmatpush1.bf16.msra.mxu0 %v14975_v19  ;;  %v15052_v19 = vld [vmem:[%s17834_s7 + $0xae4] ss:$16 sps:$4 sm:$0xff]  }
 0x64f   :  { %10640 = vmatpush1.bf16.msra.mxu1 %v14972_v49  ;;  %10916 = vmatprep.subr.bf16.mxu0 %v14983_v8  ;;  %v15053_v49 = vld [vmem:[%s17834_s7 + $0xa28] ss:$16 sps:$4 sm:$0xff]   ;;  %v15050_v8 = vld [vmem:[%s17834_s7 + $0xae0] ss:$16 sps:$4 sm:$0xff]  }
 0x650   :  { %10641 = vmatprep.subr.bf16.mxu1 %v14980_v56  ;;  %v15061_v56 = vld [vmem:[%s17834_s7 + $0xa4c] ss:$16 sps:$4 sm:$0xff]  }
 0x652   :  { %10917 = vmatpush1.bf16.msra.mxu0 %v14981_v23  ;;  %v15058_v23 = vld [vmem:[%s17834_s7 + $0xb04] ss:$16 sps:$4 sm:$0xff]  }
 0x653   :  { %10642 = vmatpush1.bf16.msra.mxu1 %v14978_v24  ;;  %10918 = vmatprep.subr.bf16.mxu0 %v14989_v27  ;;  %v15059_v24 = vld [vmem:[%s17834_s7 + $0xa48] ss:$16 sps:$4 sm:$0xff]   ;;  %v15056_v27 = vld [vmem:[%s17834_s7 + $0xb00] ss:$16 sps:$4 sm:$0xff]  }
 0x654   :  { %10643 = vmatprep.subr.bf16.mxu1 %v14986_v29  ;;  %v15067_v29 = vld [vmem:[%s17834_s7 + $0xa6c] ss:$16 sps:$4 sm:$0xff]  }
 0x656   :  { %10919 = vmatpush1.bf16.msra.mxu0 %v14987_v20  ;;  %v15064_v20 = vld [vmem:[%s17834_s7 + $0xb24] ss:$16 sps:$4 sm:$0xff]  }
 0x657   :  { %10644 = vmatpush1.bf16.msra.mxu1 %v14984_v25  ;;  %10920 = vmatprep.subr.bf16.mxu0 %v14995_v28  ;;  %v15065_v25 = vld [vmem:[%s17834_s7 + $0xa68] ss:$16 sps:$4 sm:$0xff]   ;;  %v15062_v28 = vld [vmem:[%s17834_s7 + $0xb20] ss:$16 sps:$4 sm:$0xff]  }
 0x658   :  { %10645 = vmatprep.subr.bf16.mxu1 %v14992_v32  ;;  %v15073_v32 = vld [vmem:[%s17834_s7 + $0xa8c] ss:$16 sps:$4 sm:$0xff]  }
 0x65a   :  { %10921 = vmatpush1.bf16.msra.mxu0 %v14993_v34  ;;  %v15070_v34 = vld [vmem:[%s17834_s7 + $0xb44] ss:$16 sps:$4 sm:$0xff]  }
 0x65b   :  { %10646 = vmatpush1.bf16.msra.mxu1 %v14990_v58  ;;  %10922 = vmatprep.subr.bf16.mxu0 %v15001_v33  ;;  %v15071_v58 = vld [vmem:[%s17834_s7 + $0xa88] ss:$16 sps:$4 sm:$0xff]   ;;  %v15068_v33 = vld [vmem:[%s17834_s7 + $0xb40] ss:$16 sps:$4 sm:$0xff]  }
 0x65c   :  { %10647 = vmatprep.subr.bf16.mxu1 %v14998_v37  ;;  %v15076_v37 = vld [vmem:[%s17834_s7 + $0xb64] ss:$16 sps:$4 sm:$0xff]  }
 0x65e   :  { %10923 = vmatpush1.bf16.msra.mxu0 %v14999_v18  ;;  %v15077_v18 = vld [vmem:[%s17834_s7 + $0xaa8] ss:$16 sps:$4 sm:$0xff]  }
 0x65f   :  { %10648 = vmatpush1.bf16.msra.mxu1 %v14996_v41  ;;  %10924 = vmatprep.subr.bf16.mxu0 %v15007_v40  ;;  %v15074_v41 = vld [vmem:[%s17834_s7 + $0xb60] ss:$16 sps:$4 sm:$0xff]   ;;  %v15085_v40 = vld [vmem:[%s17834_s7 + $0xacc] ss:$16 sps:$4 sm:$0xff]  }
 0x660   :  { %10649 = vmatprep.subr.bf16.mxu1 %v15004_v42  ;;  %v15083_v42 = vld [vmem:[%s17834_s7 + $0xac8] ss:$16 sps:$4 sm:$0xff]  }
 0x662   :  { %10925 = vmatpush1.bf16.msra.mxu0 %v15005_v43  ;;  %v15080_v43 = vld [vmem:[%s17834_s7 + $0xb80] ss:$16 sps:$4 sm:$0xff]  }
 0x663   :  { %10650 = vmatpush1.bf16.msra.mxu1 %v15002_v45  ;;  %10926 = vmatprep.subr.bf16.mxu0 %v15013_v3  ;;  %v15091_v45 = vld [vmem:[%s17834_s7 + $0xaec] ss:$16 sps:$4 sm:$0xff]   ;;  %v15088_v3 = vld [vmem:[%s17834_s7 + $0xba4] ss:$16 sps:$4 sm:$0xff]  }
 0x664   :  { %10660 = vmatprep.subr.bf16.mxu1 %v15010_v47  ;;  %v15086_v47 = vld [vmem:[%s17834_s7 + $0xba0] ss:$16 sps:$4 sm:$0xff]  }
 0x666   :  { %10652 = vmatmul.mubr.bf16.vlgmr.msra.gmra.mrb[32].mxu1 %v8025_v55  ;;  %10927 = vmatpush1.bf16.msra.mxu0 %v15011_v50  ;;  %v15094_v50 = vld [vmem:[%s17834_s7 + $0xbc4] ss:$16 sps:$4 sm:$0xff]  }
 0x667   :  { %10661 = vmatpush1.bf16.msra.mxu1 %v15008_v51  ;;  %10692 = vmatprep.mubr.bf16.mxu1 %v8028_v57  ;;  %v15095_v51 = vld [vmem:[%s17834_s7 + $0xb08] ss:$16 sps:$4 sm:$0xff]  }
 0x668   :  { %10662 = vmatprep.subr.bf16.mxu1 %v15016_v60  ;;  %10928 = vmatprep.subr.bf16.mxu0 %v15019_v38  ;;  %v15103_v60 = vld [vmem:[%s17834_s7 + $0xb2c] ss:$16 sps:$4 sm:$0xff]   ;;  %v15100_v38 = vld [vmem:[%s17834_s7 + $0xbe4] ss:$16 sps:$4 sm:$0xff]  }
 0x66a   :  { %10929 = vmatpush1.bf16.msra.mxu0 %v15017_v61  ;;  %v15098_v61 = vld [vmem:[%s17834_s7 + $0xbe0] ss:$16 sps:$4 sm:$0xff]  }
 0x66b   :  { %10663 = vmatpush1.bf16.msra.mxu1 %v15014_v12  ;;  %10930 = vmatprep.subr.bf16.mxu0 %v15025_v62  ;;  %v15109_v12 = vld [vmem:[%s17834_s7 + $0xb4c] ss:$16 sps:$4 sm:$0xff]   ;;  %v8014_v62 = vmax.f32 %v17074_v7, 0.0 }
 0x66c   :  { %10664 = vmatprep.subr.bf16.mxu1 %v15022_v9  ;;  %v15106_v9 = vld [vmem:[%s17834_s7 + $0xc04] ss:$16 sps:$4 sm:$0xff]   ;;  %v15115_v7 = vld [vmem:[%s17834_s7 + $0xb6c] ss:$16 sps:$4 sm:$0xff]  }
 0x66e   :  { %10931 = vmatpush1.bf16.msra.mxu0 %v15023_v63  ;;  %v15107_v63 = vld [vmem:[%s17834_s7 + $0xb48] ss:$16 sps:$4 sm:$0xff]  }
 0x66f   :  { %10665 = vmatpush1.bf16.msra.mxu1 %v15020_v0  ;;  %10932 = vmatprep.subr.bf16.mxu0 %v15031_v36  ;;  %v15104_v0 = vld [vmem:[%s17834_s7 + $0xc00] ss:$16 sps:$4 sm:$0xff]   ;;  %v8027_v36 = vpack.c.bf16 %v8014_v62, %v8014_v62  ;;  %v15175_v62 = vld [vmem:[#allocation12 + $0xb0] sm:$0xff]  }
 0x670   :  { %10666 = vmatprep.subr.bf16.mxu1 %v15028_v1  ;;  %v15112_v1 = vld [vmem:[%s17834_s7 + $0xc24] ss:$16 sps:$4 sm:$0xff]  }
 0x672   :  { %10933 = vmatpush1.bf16.msra.mxu0 %v15029_v44  ;;  %v15113_v44 = vld [vmem:[%s17834_s7 + $0xb68] ss:$16 sps:$4 sm:$0xff]  }
 0x673   :  { %10667 = vmatpush1.bf16.msra.mxu1 %v15026_v2  ;;  %10934 = vmatprep.subr.bf16.mxu0 %v15037_v5  ;;  %v15110_v2 = vld [vmem:[%s17834_s7 + $0xc20] ss:$16 sps:$4 sm:$0xff]   ;;  %v15121_v5 = vld [vmem:[%s17834_s7 + $0xb8c] ss:$16 sps:$4 sm:$0xff]  }
 0x674   :  { %10668 = vmatprep.subr.bf16.mxu1 %v15034_v6  ;;  %v15118_v6 = vld [vmem:[%s17834_s7 + $0xc44] ss:$16 sps:$4 sm:$0xff]  }
 0x676   :  { %10935 = vmatpush1.bf16.msra.mxu0 %v15035_v39  ;;  %v15119_v39 = vld [vmem:[%s17834_s7 + $0xb88] ss:$16 sps:$4 sm:$0xff]  }
 0x677   :  { %10669 = vmatpush1.bf16.msra.mxu1 %v15032_v16  ;;  %10936 = vmatprep.subr.bf16.mxu0 %v15043_v59  ;;  %v15116_v16 = vld [vmem:[%s17834_s7 + $0xc40] ss:$16 sps:$4 sm:$0xff]   ;;  %v15127_v59 = vld [vmem:[%s17834_s7 + $0xbac] ss:$16 sps:$4 sm:$0xff]  }
 0x678   :  { %10670 = vmatprep.subr.bf16.mxu1 %v15040_v53  ;;  %v15124_v53 = vld [vmem:[%s17834_s7 + $0xc64] ss:$16 sps:$4 sm:$0xff]  }
 0x67a   :  { %10937 = vmatpush1.bf16.msra.mxu0 %v15041_v21  ;;  %v15125_v21 = vld [vmem:[%s17834_s7 + $0xba8] ss:$16 sps:$4 sm:$0xff]  }
 0x67b   :  { %10671 = vmatpush1.bf16.msra.mxu1 %v15038_v13  ;;  %10947 = vmatprep.subr.bf16.mxu0 %v15049_v54  ;;  %v15122_v13 = vld [vmem:[%s17834_s7 + $0xc60] ss:$16 sps:$4 sm:$0xff]   ;;  %v15130_v54 = vld [vmem:[%s17834_s7 + $0xbcc] ss:$16 sps:$4 sm:$0xff]  }
 0x67c   :  { %10672 = vmatprep.subr.bf16.mxu1 %v15046_v14  ;;  %v8016_v14 = vmax.f32 %v17304_v26, 0.0  ;;  %v15131_v26 = vld [vmem:[%s17834_s7 + $0xbe8] ss:$16 sps:$4 sm:$0xff]  }
 0x67d   :  { %10939 = vmatmul.mubr.bf16.vlgmr.msra.gmra.mrb[44].mxu0 %v8025_v55  ;;  %v15092_v55 = vld [vmem:[%s17834_s7 + $0xbc0] ss:$16 sps:$4 sm:$0xff]  }
 0x67e   :  { %10948 = vmatpush1.bf16.msra.mxu0 %v15047_v15  ;;  %10979 = vmatprep.mubr.bf16.mxu0 %v8028_v57  ;;  %v15101_v57 = vld [vmem:[%s17834_s7 + $0xb28] ss:$16 sps:$4 sm:$0xff]  }
 0x67f   :  { %10673 = vmatpush1.bf16.msra.mxu1 %v15044_v4  ;;  %10949 = vmatprep.subr.bf16.mxu0 %v15055_v17  ;;  %v15146_v15 = vld [vmem:[#allocation12 + $0x40] sm:$0xff]   ;;  %v15133_v17 = vld [vmem:[%s17834_s7 + $0xbec] ss:$16 sps:$4 sm:$0xff]  }
 0x680   :  { %10674 = vmatprep.subr.bf16.mxu1 %v15052_v19  ;;  %v15128_v4 = vld [vmem:[%s17834_s7 + $0xbc8] ss:$16 sps:$4 sm:$0xff]  }
 0x681   :  { %v15147_v19 = vld [vmem:[#allocation12] sm:$0xff]  }
 0x682   :  { %10950 = vmatpush1.bf16.msra.mxu0 %v15053_v49  ;;  %v8029_v49 = vpack.c.bf16 %v8016_v14, %v8016_v14 }
 0x683   :  { %10675 = vmatpush1.bf16.msra.mxu1 %v15050_v8  ;;  %10951 = vmatprep.subr.bf16.mxu0 %v15061_v56  ;;  %v15148_v8 = vld [vmem:[#allocation12 + $0x48] sm:$0xff]  }
 0x684   :  { %10676 = vmatprep.subr.bf16.mxu1 %v15058_v23  ;;  %v15136_v56 = vld [vmem:[%s17834_s7 + $0xc0c] ss:$16 sps:$4 sm:$0xff]  }
 0x685   :  { %v15149_v23 = vld [vmem:[#allocation12 + $0x8] sm:$0xff]  }
 0x686   :  { %10952 = vmatpush1.bf16.msra.mxu0 %v15059_v24  ;;  %v15150_v24 = vld [vmem:[#allocation12 + $0x50] sm:$0xff]  }
 0x687   :  { %10677 = vmatpush1.bf16.msra.mxu1 %v15056_v27  ;;  %10953 = vmatprep.subr.bf16.mxu0 %v15067_v29  ;;  %v15134_v27 = vld [vmem:[%s17834_s7 + $0xc08] ss:$16 sps:$4 sm:$0xff]   ;;  %v15139_v29 = vld [vmem:[%s17834_s7 + $0xc2c] ss:$16 sps:$4 sm:$0xff]  }
 0x688   :  { %10678 = vmatprep.subr.bf16.mxu1 %v15064_v20  ;;  %v15151_v20 = vld [vmem:[#allocation12 + $0x10] sm:$0xff]  }
 0x68a   :  { %10954 = vmatpush1.bf16.msra.mxu0 %v15065_v25  ;;  %v15152_v25 = vld [vmem:[#allocation12 + $0x58] sm:$0xff]  }
 0x68b   :  { %10679 = vmatpush1.bf16.msra.mxu1 %v15062_v28  ;;  %10955 = vmatprep.subr.bf16.mxu0 %v15073_v32  ;;  %v15137_v28 = vld [vmem:[%s17834_s7 + $0xc28] ss:$16 sps:$4 sm:$0xff]   ;;  %v15142_v32 = vld [vmem:[%s17834_s7 + $0xc4c] ss:$16 sps:$4 sm:$0xff]  }
 0x68c   :  { %10680 = vmatprep.subr.bf16.mxu1 %v15070_v34  ;;  %v15153_v34 = vld [vmem:[#allocation12 + $0x18] sm:$0xff]  }
 0x68e   :  { %10956 = vmatpush1.bf16.msra.mxu0 %v15071_v58  ;;  %v15154_v58 = vld [vmem:[#allocation12 + $0x60] sm:$0xff]  }
 0x68f   :  { %10681 = vmatpush1.bf16.msra.mxu1 %v15068_v33  ;;  %10957 = vmatprep.subr.bf16.mxu0 %v15079_v52  ;;  %v15140_v33 = vld [vmem:[%s17834_s7 + $0xc48] ss:$16 sps:$4 sm:$0xff]   ;;  %v15145_v52 = vld [vmem:[%s17834_s7 + $0xc6c] ss:$16 sps:$4 sm:$0xff]  }
 0x690   :  { %10682 = vmatprep.subr.bf16.mxu1 %v15076_v37  ;;  %v15156_v37 = vld [vmem:[#allocation12 + $0x68] sm:$0xff]  }
 0x692   :  { %10958 = vmatpush1.bf16.msra.mxu0 %v15077_v18  ;;  %v15143_v18 = vld [vmem:[%s17834_s7 + $0xc68] ss:$16 sps:$4 sm:$0xff]  }
 0x693   :  { %10683 = vmatpush1.bf16.msra.mxu1 %v15074_v41  ;;  %10959 = vmatprep.subr.bf16.mxu0 %v15085_v40  ;;  %v15157_v41 = vld [vmem:[#allocation12 + $0x28] sm:$0xff]   ;;  %v15158_v40 = vld [vmem:[#allocation12 + $0x70] sm:$0xff]  }
 0x694   :  { %10684 = vmatprep.subr.bf16.mxu1 %v15082_v22  ;;  %v15159_v22 = vld [vmem:[#allocation12 + $0xc0] sm:$0xff]  }
 0x696   :  { %10960 = vmatpush1.bf16.msra.mxu0 %v15083_v42  ;;  %v15160_v42 = vld [vmem:[#allocation12 + $0x30] sm:$0xff]  }
 0x697   :  { %10685 = vmatpush1.bf16.msra.mxu1 %v15080_v43  ;;  %10961 = vmatprep.subr.bf16.mxu0 %v15091_v45  ;;  %v15161_v43 = vld [vmem:[#allocation12 + $0x80] sm:$0xff]   ;;  %v15162_v45 = vld [vmem:[#allocation12 + $0x78] sm:$0xff]  }
 0x698   :  { %10686 = vmatprep.subr.bf16.mxu1 %v15088_v3  ;;  %v15163_v3 = vld [vmem:[#allocation12 + $0xc8] sm:$0xff]  }
 0x69a   :  { %10962 = vmatpush1.bf16.msra.mxu0 %v15089_v46  ;;  %v15164_v46 = vld [vmem:[#allocation12 + $0x38] sm:$0xff]  }
 0x69b   :  { %10687 = vmatpush1.bf16.msra.mxu1 %v15086_v47  ;;  %10963 = vmatprep.subr.bf16.mxu0 %v15097_v48  ;;  %v15165_v47 = vld [vmem:[#allocation12 + $0x88] sm:$0xff]   ;;  %v15166_v48 = vld [vmem:[#allocation12 + $0xd0] sm:$0xff]  }
 0x69c   :  { %10688 = vmatprep.subr.bf16.mxu1 %v15094_v50  ;;  %v15167_v50 = vld [vmem:[#allocation12 + $0x90] sm:$0xff]  }
 0x69e   :  { %10964 = vmatpush1.bf16.msra.mxu0 %v15095_v51  ;;  %v15168_v51 = vld [vmem:[#allocation12 + $0xd8] sm:$0xff]  }
 0x69f   :  { %10689 = vmatpush1.bf16.msra.mxu1 %v15092_v55  ;;  %10965 = vmatprep.subr.bf16.mxu0 %v15103_v60  ;;  %v15169_v55 = vld [vmem:[#allocation12 + $0x98] sm:$0xff]   ;;  %v15170_v60 = vld [vmem:[#allocation12 + $0xe0] sm:$0xff]  }
 0x6a0   :  { %10690 = vmatprep.subr.bf16.mxu1 %v15100_v38  ;;  %v15171_v38 = vld [vmem:[#allocation12 + $0xa0] sm:$0xff]  }
 0x6a2   :  { %10966 = vmatpush1.bf16.msra.mxu0 %v15101_v57  ;;  %v15172_v57 = vld [vmem:[#allocation12 + $0xe8] sm:$0xff]  }
 0x6a3   :  { %10691 = vmatpush1.bf16.msra.mxu1 %v15098_v61  ;;  %10967 = vmatprep.subr.bf16.mxu0 %v15109_v12  ;;  %v15173_v61 = vld [vmem:[#allocation12 + $0xa8] sm:$0xff]   ;;  %v15174_v12 = vld [vmem:[#allocation12 + $0xf0] sm:$0xff]  }
 0x6a4   :  { %10701 = vmatprep.subr.bf16.mxu1 %v15106_v9  ;;  %v15176_v9 = vld [vmem:[#allocation12 + $0xf8] sm:$0xff]  }
 0x6a6   :  { %10693 = vmatmul.mubr.bf16.vlgmr.msra.gmra.mrb[32].mxu1 %v8027_v36  ;;  %10968 = vmatpush1.bf16.msra.mxu0 %v15107_v63  ;;  %v15177_v63 = vld [vmem:[#allocation12 + $0xb8] sm:$0xff]  }
 0x6a7   :  { %10702 = vmatpush1.bf16.msra.mxu1 %v15104_v0  ;;  %10969 = vmatprep.subr.bf16.mxu0 %v15115_v7  ;;  %v8430_v0 = vld [vmem:[#allocation10] sm:$0xf] }
 0x6a8   :  { %10703 = vmatprep.subr.bf16.mxu1 %v15112_v1  ;;  %10733 = vmatprep.mubr.bf16.mxu1 %v15380_v35  ;;  %v8435_v7 = vrot.slane %v8430_v0, %v15794_v10 }
 0x6aa   :  { %10970 = vmatpush1.bf16.msra.mxu0 %v15113_v44 }
 0x6ab   :  { %10704 = vmatpush1.bf16.msra.mxu1 %v15110_v2  ;;  %10971 = vmatprep.subr.bf16.mxu0 %v15121_v5 }
 0x6ac   :  { %10705 = vmatprep.subr.bf16.mxu1 %v15118_v6 }
 0x6ae   :  { %10972 = vmatpush1.bf16.msra.mxu0 %v15119_v39 }
 0x6af   :  { %10706 = vmatpush1.bf16.msra.mxu1 %v15116_v16  ;;  %10973 = vmatprep.subr.bf16.mxu0 %v15127_v59 }
 0x6b0   :  { %10707 = vmatprep.subr.bf16.mxu1 %v15124_v53 }
 0x6b2   :  { %10974 = vmatpush1.bf16.msra.mxu0 %v15125_v21 }
 0x6b3   :  { %10708 = vmatpush1.bf16.msra.mxu1 %v15122_v13  ;;  %10975 = vmatprep.subr.bf16.mxu0 %v15130_v54  ;;  %v8443_v13 = vrot.slane %v8430_v0, %v15975_v31  ;;  %v8447_v54 = vrot.slane %v8430_v0, %v15830_v30  ;;  %v12763_v31 = vld [vmem:[#allocation13] ss:$0 sm:$0xff] }
 0x6b4   :  { %12914 = vmatprep.subr.bf16.mxu1 %v15146_v15 }
 0x6b6   :  { %12761 = vmatmul.mubr.msk.bf16.vlgmr.msra.gmra.mrb[32].mxu1 %vm2280_vm2, %v8029_v49  ;;  %10976 = vmatpush1.bf16.msra.mxu0 %v15128_v4 }
 0x6b7   :  { %10977 = vmatprep.subr.bf16.mxu0 %v15133_v17  ;;  %12915 = vmatpush3.bf16.msra.mxu1 %v15147_v19 }
 0x6b8   :  { %12916 = vmatprep.subr.bf16.mxu1 %v15148_v8 }
 0x6ba   :  { %10978 = vmatpush1.bf16.msra.mxu0 %v15131_v26 }
 0x6bb   :  { %10988 = vmatprep.subr.bf16.mxu0 %v15136_v56  ;;  %12917 = vmatpush3.bf16.msra.mxu1 %v15149_v23 }
 0x6bc   :  { %12918 = vmatprep.subr.bf16.mxu1 %v15150_v24 }
 0x6bd   :  { %10980 = vmatmul.mubr.bf16.vlgmr.msra.gmra.mrb[44].mxu0 %v8027_v36  ;;  %v8439_v36 = vrot.slane %v8430_v0, %v15797_v11 }
 0x6be   :  { %10989 = vmatpush1.bf16.msra.mxu0 %v15134_v27  ;;  %11020 = vmatprep.mubr.bf16.mxu0 %v15380_v35  ;;  %v15155_v35 = vld [vmem:[#allocation12 + $0x20] sm:$0xff]  }
 0x6bf   :  { %10990 = vmatprep.subr.bf16.mxu0 %v15139_v29  ;;  %12919 = vmatpush3.bf16.msra.mxu1 %v15151_v20 }
 0x6c0   :  { %12920 = vmatprep.subr.bf16.mxu1 %v15152_v25 }
 0x6c2   :  { %10991 = vmatpush1.bf16.msra.mxu0 %v15137_v28 }
 0x6c3   :  { %10992 = vmatprep.subr.bf16.mxu0 %v15142_v32  ;;  %12921 = vmatpush3.bf16.msra.mxu1 %v15153_v34 }
 0x6c4   :  { %12922 = vmatprep.subr.bf16.mxu1 %v15154_v58 }
 0x6c6   :  { %10993 = vmatpush1.bf16.msra.mxu0 %v15140_v33 }
 0x6c7   :  { %10994 = vmatprep.subr.bf16.mxu0 %v15145_v52  ;;  %12923 = vmatpush3.bf16.msra.mxu1 %v15155_v35 }
 0x6c8   :  { %12924 = vmatprep.subr.bf16.mxu1 %v15156_v37 }
 0x6ca   :  { %10995 = vmatpush1.bf16.msra.mxu0 %v15143_v18 }
 0x6cb   :  { %12925 = vmatpush3.bf16.msra.mxu1 %v15157_v41  ;;  %12936 = vmatprep.subr.bf16.mxu0 %v15159_v22 }
 0x6cc   :  { %12926 = vmatprep.subr.bf16.mxu1 %v15158_v40 }
 0x6cd   :  { %12762 = vmatmul.mubr.msk.bf16.vlgmr.msra.gmra.mrb[44].mxu0 %vm2280_vm2, %v8029_v49 }
 0x6ce   :  { %12937 = vmatpush3.bf16.msra.mxu0 %v15161_v43 }
 0x6cf   :  { %12927 = vmatpush3.bf16.msra.mxu1 %v15160_v42  ;;  %12938 = vmatprep.subr.bf16.mxu0 %v15163_v3 }
 0x6d0   :  { %12928 = vmatprep.subr.bf16.mxu1 %v15162_v45 }
 0x6d2   :  { %12939 = vmatpush3.bf16.msra.mxu0 %v15165_v47 }
 0x6d3   :  { %12929 = vmatpush3.bf16.msra.mxu1 %v15164_v46  ;;  %12940 = vmatprep.subr.bf16.mxu0 %v15166_v48 }
 0x6d6   :  { %12941 = vmatpush3.bf16.msra.mxu0 %v15167_v50 }
 0x6d7   :  { %12942 = vmatprep.subr.bf16.mxu0 %v15168_v51 }
 0x6da   :  { %12943 = vmatpush3.bf16.msra.mxu0 %v15169_v55 }
 0x6db   :  { %12944 = vmatprep.subr.bf16.mxu0 %v15170_v60 }
 0x6de   :  { %12945 = vmatpush3.bf16.msra.mxu0 %v15171_v38 }
 0x6df   :  { %12946 = vmatprep.subr.bf16.mxu0 %v15172_v57 }
 0x6e2   :  { %12947 = vmatpush3.bf16.msra.mxu0 %v15173_v61 }
 0x6e3   :  { %12948 = vmatprep.subr.bf16.mxu0 %v15174_v12 }
 0x6e6   :  { %12949 = vmatpush3.bf16.msra.mxu0 %v15175_v62 }
 0x6e7   :  { %12950 = vmatprep.subr.bf16.mxu0 %v15176_v9 }
 0x6ea   :  { %12951 = vmatpush3.bf16.msra.mxu0 %v15177_v63 }
 0x789   :  { %v10735_v1 = vpop.f32.mrb[32].mxu1 }
 0x78a   :  { %v12996_v44 = vadd.f32 %v10735_v1, %v8435_v7  ;;  %v10737_v2 = vpop.f32.mrb[33].mxu1 }
 0x78b   :  { %v12997_v5 = vadd.f32 %v10737_v2, %v8439_v36  ;;  %v10739_v6 = vpop.f32.mrb[34].mxu1 }
 0x78c   :  { %v11029_v39 = vmax.f32 %v12996_v44, 0.0  ;;  %v10740_v16 = vpop.f32.mrb[35].mxu1 }
 0x78d   :  { %v11030_v59 = vmax.f32 %v12997_v5, 0.0 }
 0x78e   :  { %v11033_v21 = vpack.c.bf16 %v11029_v39, %v11029_v39 }
 0x78f   :  { %v11034_v53 = vpack.c.bf16 %v11030_v59, %v11030_v59 }
 0x791   :  { %11332 = vmatprep.mubr.bf16.mxu1 %v11034_v53 }
 0x792   :  { %11333 = vmatmul.mubr.bf16.vlgmr.msra.gmra.mrb[36].mxu1 %v11033_v21 }
 0x7a0   :  { %v11022_v14 = vpop.f32.mrb[44].mxu0 }
 0x7a1   :  { %v12998_v10 = vadd.f32 %v11022_v14, %v8443_v13  ;;  %v11024_v15 = vpop.f32.mrb[45].mxu0 }
 0x7a2   :  { %v12999_v11 = vadd.f32 %v11024_v15, %v8447_v54  ;;  %v11026_v4 = vpop.f32.mrb[46].mxu0 }
 0x7a3   :  { %v11031_v17 = vmax.f32 %v12998_v10, 0.0  ;;  %v11027_v19 = vpop.f32.mrb[47].mxu0 }
 0x7a4   :  { %v11032_v49 = vmax.f32 %v12999_v11, 0.0 }
 0x7a5   :  { %v11035_v26 = vpack.c.bf16 %v11031_v17, %v11031_v17 }
 0x7a6   :  { %v11036_v8 = vpack.c.bf16 %v11032_v49, %v11032_v49 }
 0x7a8   :  { %11372 = vmatprep.mubr.bf16.mxu0 %v11036_v8 }
 0x7a9   :  { %11373 = vmatmul.mubr.bf16.vlgmr.msra.gmra.mrb[48].mxu0 %v11035_v26 }
 0x865   :  { %v12930_v56 = vpop.f32.mrb[36].mxu1 }
 0x866   :  { %v12931_v23 = vpop.f32.mrb[37].mxu1 }
 0x867   :  { %v12932_v24 = vadd.f32 %v12931_v23, %v12930_v56  ;;  %v12933_v27 = vpop.f32.mrb[38].mxu1 }
 0x868   :  { %v12934_v29 = vpop.f32.mrb[39].mxu1 }
 0x869   :  { %v11335_v25 = vadd.f32 %v12932_v24, %v12763_v31 }
 0x87c   :  { %v12952_v20 = vpop.f32.mrb[48].mxu0 }
 0x87d   :  { %v12953_v30 = vpop.f32.mrb[49].mxu0 }
 0x87e   :  { %v12954_v28 = vadd.f32 %v12953_v30, %v12952_v20  ;;  %v12955_v32 = vpop.f32.mrb[50].mxu0 }
 0x87f   :  { %v12956_v34 = vpop.f32.mrb[51].mxu0 }
 0x880   :  { %v11375_v58 = vadd.f32 %v12954_v28, %v11335_v25 }
 0x882   :  { %11380 = vst [vmem:[%s17838_s11] sm:$0xff] %v11375_v58 }
 0x883   :  { %11385 = vsyncpa [#allocation3], 1 }
 0x884   :  { %11386 = vsyncpa [#allocation5], 1 }
 0x885   :  { %11387 = vsyncpa [#allocation8], 1 }
 0x886   :  { %11388 = vsyncpa [#allocation11], 1 }
 0x887   :  { %11389 = vsyncpa [#allocation14], 1 }

</bundles_post_ra>
